<compile_context>
chip_gen: v7x
topology: tpu7x:2x2x1
jax: 0.10.0
libtpu: 0.0.40
codegen_flags: <defaults>
</compile_context>

<pallas_src>
import jax
import jax.numpy as jnp
from jax.experimental import pallas as pl
from jax.experimental.pallas import tpu as pltpu


_VMEM_LIMIT_BYTES = 48 * 1024 * 1024     # scoped-VMEM limit (<= v7x 64 MiB physical)
_CHUNK_VMEM_BUDGET = 24 * 1024 * 1024    # budget used when picking seq chunk size


# --------------------------------------------------------------------------
# Pallas kernels
# --------------------------------------------------------------------------
def _input_proj_kernel(x_ref, w_ref, b_ref, o_ref):
    """xp = x @ W_ih(both dirs, concat on gate axis) + (b_ih + b_hh).

    x_ref: (RT, In) f32/bf16   w_ref: (In, 8H) bf16   b_ref: (1, 8H) f32
    o_ref: (RT, 8H) bf16
    """
    acc = jnp.dot(x_ref[...].astype(w_ref.dtype), w_ref[...],
                  preferred_element_type=jnp.float32) + b_ref[...]
    o_ref[...] = acc.astype(o_ref.dtype)


def _bilstm_recurrent_kernel(xp_ref, whh_ref, out_ref, h_scr, c_scr):
    """Recurrent part of one bidirectional LSTM layer, one (direction, chunk).

    grid = (2 directions [parallel, OUTER axis], n_chunks [arbitrary]).
    NOTE: the shared h_scr/c_scr carry is only correct because the direction
    axis is the outer (slowest) grid axis, re-initialized at j==0, and gets a
    private copy per TensorCore under megacore sharding.  Do not swap axes.

    xp_ref : (ck, Bp, 4H) bf16 precomputed input projection (+bias) for this
             direction / chunk (chunk-order reversal for the bwd direction is
             done by the BlockSpec index_map; in-chunk reversal below).
    whh_ref: (1, H, 4H) bf16 hidden->gates weight for this direction.
    out_ref: (ck, Bp, H) bf16, this direction's half of the (S, Bp, 2H) output.
    h_scr, c_scr: (Bp, H) f32 recurrent state, persists across the chunk axis.
    """
    d = pl.program_id(0)          # direction: 0 = forward, 1 = backward
    j = pl.program_id(1)          # chunk index along the (re-ordered) sequence
    ck = xp_ref.shape[0]
    H = whh_ref.shape[1]

    @pl.when(j == 0)
    def _():
        h_scr[...] = jnp.zeros_like(h_scr)
        c_scr[...] = jnp.zeros_like(c_scr)

    whh = whh_ref[0]              # (H, 4H) bf16, hoisted out of the loop
    unroll = min(ck, 16)

    def cell(t_eff, h, c):
        z = (xp_ref[t_eff].astype(jnp.float32)
             + jnp.dot(h.astype(whh.dtype), whh,
                       preferred_element_type=jnp.float32))        # (Bp, 4H)
        i_g = jax.nn.sigmoid(z[:, 0 * H:1 * H])
        f_g = jax.nn.sigmoid(z[:, 1 * H:2 * H])
        g_g = jnp.tanh(z[:, 2 * H:3 * H])
        o_g = jax.nn.sigmoid(z[:, 3 * H:4 * H])
        c_new = f_g * c + i_g * g_g
        h_new = o_g * jnp.tanh(c_new)
        out_ref[t_eff] = h_new.astype(out_ref.dtype)
        return h_new, c_new

    # h / c live in vregs across the chunk; scratch touched only at boundaries.
    @pl.when(d == 0)
    def _():
        def step(t, carry):
            return cell(t, *carry)
        h, c = jax.lax.fori_loop(0, ck, step, (h_scr[...], c_scr[...]),
                                 unroll=unroll)
        h_scr[...] = h
        c_scr[...] = c

    @pl.when(d == 1)
    def _():
        def step(t, carry):
            return cell(ck - 1 - t, *carry)
        h, c = jax.lax.fori_loop(0, ck, step, (h_scr[...], c_scr[...]),
                                 unroll=unroll)
        h_scr[...] = h
        c_scr[...] = c


# --------------------------------------------------------------------------
# pallas_call wrappers
# --------------------------------------------------------------------------
def _run_input_proj(x2d, w_both, b_both):
    """(rows, In) @ (In, 8H) + b  as one row-tiled GEMM, bf16 output."""
    rows, In = x2d.shape
    G = w_both.shape[1]
    RT = rows if rows <= 512 else 512
    return pl.pallas_call(
        _input_proj_kernel,
        out_shape=jax.ShapeDtypeStruct((rows, G), jnp.bfloat16),
        grid=(pl.cdiv(rows, RT),),
        in_specs=[
            pl.BlockSpec((RT, In), lambda r: (r, 0)),
            pl.BlockSpec((In, G), lambda r: (0, 0)),
            pl.BlockSpec((1, G), lambda r: (0, 0)),
        ],
        out_specs=pl.BlockSpec((RT, G), lambda r: (r, 0)),
        compiler_params=pltpu.CompilerParams(
            dimension_semantics=("parallel",),
            vmem_limit_bytes=_VMEM_LIMIT_BYTES),
    )(x2d, w_both, b_both)


def _choose_seq_chunk(S, Bp, H, budget_bytes=_CHUNK_VMEM_BUDGET):
    """Largest divisor of S whose double-buffered blocks fit the VMEM budget.

    Defaults to the whole sequence (grid=(2,1)) at small B/S -- fastest, since
    the recurrence is grid-step / per-step-overhead bound, not VMEM bound.
    """
    def fits(ck):
        xp_blk = 2 * ck * Bp * 4 * H * 2        # bf16, double-buffered
        out_blk = 2 * ck * Bp * H * 2           # bf16, double-buffered
        whh = 2 * 2 * H * 4 * H * 2             # both dirs' slab, double-buffered
        scratch = 2 * Bp * H * 4                # h, c (f32)
        return xp_blk + out_blk + whh + scratch < budget_bytes

    if fits(S):
        return S
    for ck in range(S // 2, 0, -1):
        if S % ck == 0 and fits(ck):
            return ck
    return 1


def _run_bilstm_layer(xp, whh_both, seq_chunk):
    """Fused fwd+bwd recurrence. xp: (S, Bp, 8H) bf16 [fwd gates | bwd gates]."""
    S, Bp, G2 = xp.shape
    H = whh_both.shape[1]
    assert G2 == 8 * H
    ck = seq_chunk
    nc = S // ck

    # chunk position along the real sequence: fwd walks 0..nc-1, bwd nc-1..0
    def chunk_pos(d, j):
        return j + d * (nc - 1 - 2 * j)

    return pl.pallas_call(
        _bilstm_recurrent_kernel,
        out_shape=jax.ShapeDtypeStruct((S, Bp, 2 * H), jnp.bfloat16),
        grid=(2, nc),
        in_specs=[
            # last-axis block index d picks this direction's 4H gate slab
            pl.BlockSpec((ck, Bp, 4 * H), lambda d, j: (chunk_pos(d, j), 0, d)),
            pl.BlockSpec((1, H, 4 * H), lambda d, j: (d, 0, 0)),
        ],
        # each direction writes its own H-wide half of the (S, Bp, 2H) output
        out_specs=pl.BlockSpec((ck, Bp, H), lambda d, j: (chunk_pos(d, j), 0, d)),
        scratch_shapes=[
            pltpu.VMEM((Bp, H), jnp.float32),   # h state (carried across chunks)
            pltpu.VMEM((Bp, H), jnp.float32),   # c state
        ],
        compiler_params=pltpu.CompilerParams(
            dimension_semantics=("parallel", "arbitrary"),
            vmem_limit_bytes=_VMEM_LIMIT_BYTES),
    )(xp, whh_both)


def bias_detection_bilstm_forward(params, input_ids, attention_mask):
    # TODO(synk): the pretrained 'bert-base-uncased' encoder has no clean Pallas
    # equivalent here; it is replaced by a deterministic token-embedding lookup
    # producing the (B, S, 768) `sequence_output` (attention_mask applied as a
    # simple multiplicative mask).
    seq = params["embedding"][input_ids]                          # (B, S, 768)
    seq = seq * attention_mask[..., None].astype(seq.dtype)

    x = jnp.transpose(seq, (1, 0, 2)).astype(jnp.float32)         # (S, B, 768)
    S, B, _ = x.shape

    # Pad batch to the 8-sublane minimum so VPU ops / output stores are
    # full-vreg and unmasked; sliced back before the classifier.
    Bp = max(8, ((B + 7) // 8) * 8)
    if Bp != B:
        x = jnp.pad(x, ((0, 0), (0, Bp - B), (0, 0)))

    # 2-layer bidirectional LSTM (PyTorch nn.LSTM semantics, inter-layer dropout=0).
    for layer in params["lstm"]:
        In = x.shape[-1]
        H = layer["whh_t"].shape[1]
        # hoisted input projection for BOTH directions: one tall GEMM
        xp2d = _run_input_proj(x.reshape(S * Bp, In),
                               layer["wih_t"], layer["b"])        # (S*Bp, 8H) bf16
        xp = xp2d.reshape(S, Bp, -1)                              # (S, Bp, 8H)
        ck = _choose_seq_chunk(S, Bp, H)
        # fused fwd/bwd recurrence, direct-concat output
        x = _run_bilstm_layer(xp, layer["whh_t"], ck)             # (S, Bp, 2H) bf16

    # lstm_output[:, -1] : fwd state after full pass, bwd state after one step.
    last_lstm_cell = x[-1][:B].astype(jnp.float32)                # (B, 2H)

    # Dropout(p=0.5) is identity on the eval/inference forward pass.
    # Final Linear (B,512)@(512,2) left to XLA per perf review (2 output lanes
    # make a standalone Pallas call pure overhead).
    logits = (jnp.dot(last_lstm_cell, params["linear"]["w_t"],
                      preferred_element_type=jnp.float32)
              + params["linear"]["b"])
    return logits                                                 # (B, n_classes)


# --------------------------------------------------------------------------
# Deterministic parameter initialization (shapes follow the PyTorch module)
# --------------------------------------------------------------------------
def init_params(key, *, vocab_size=1000, emb_dim=768, hidden_size=256,
                num_layers=2, n_classes=2):
    keys = iter(jax.random.split(key, 64))

    def u(shape, scale):
        return jax.random.uniform(next(keys), shape, jnp.float32, -scale, scale)

    H = hidden_size
    params = {}
    params["embedding"] = 0.02 * jax.random.normal(
        next(keys), (vocab_size, emb_dim), jnp.float32)

    k_lstm = 1.0 / float(H) ** 0.5
    lstm = []
    in_dim = emb_dim
    for _ in range(num_layers):
        per_dir = []
        for _d in range(2):                       # fwd, bwd
            wih = u((4 * H, in_dim), k_lstm)      # weight_ih_l{k}[_reverse]
            whh = u((4 * H, H), k_lstm)           # weight_hh_l{k}[_reverse]
            bih = u((4 * H,), k_lstm)
            bhh = u((4 * H,), k_lstm)
            per_dir.append((wih, whh, bih + bhh))
        # prepacked / pre-transposed, bf16 matmul inputs with f32 bias
        wih_t = jnp.concatenate([per_dir[0][0].T, per_dir[1][0].T],
                                axis=1).astype(jnp.bfloat16)       # (In, 8H)
        whh_t = jnp.stack([per_dir[0][1].T, per_dir[1][1].T],
                          axis=0).astype(jnp.bfloat16)             # (2, H, 4H)
        b = jnp.concatenate([per_dir[0][2], per_dir[1][2]]
                            ).reshape(1, 8 * H).astype(jnp.float32)
        lstm.append({"wih_t": wih_t, "whh_t": whh_t, "b": b})
        in_dim = 2 * H
    params["lstm"] = lstm

    k_lin = 1.0 / float(2 * H) ** 0.5
    w_lin = u((n_classes, 2 * H), k_lin)          # nn.Linear weight
    b_lin = u((n_classes,), k_lin)
    params["linear"] = {"w_t": w_lin.T, "b": b_lin}
    return params


# --------------------------------------------------------------------------
if __name__ == "__main__":
    key = jax.random.PRNGKey(0)
    pkey, ikey = jax.random.split(key)

    B, S, VOCAB = 2, 8, 1000
    params = init_params(pkey, vocab_size=VOCAB)

    input_ids = jax.random.randint(ikey, (B, S), 0, VOCAB, dtype=jnp.int32)
    attention_mask = jnp.ones((B, S), dtype=jnp.int32)

    logits = bias_detection_bilstm_forward(params, input_ids, attention_mask)
    logits = jax.block_until_ready(logits)

    assert logits.shape == (B, 2), logits.shape
    assert bool(jnp.all(jnp.isfinite(logits)))
    print("KERNEL_OK")
</pallas_src>

<mosaic_0001>
module attributes {stable_mosaic.version = 11 : i64} {
  func.func @_input_proj_kernel(%arg0: i32, %arg1: memref<64x768xf32, #tpu.memory_space<vmem>>, %arg2: memref<768x2048xbf16, #tpu.memory_space<vmem>>, %arg3: memref<1x2048xf32, #tpu.memory_space<vmem>>, %arg4: memref<64x2048xbf16, #tpu.memory_space<vmem>>) attributes {dimension_semantics = [#tpu.dimension_semantics<parallel>], iteration_bounds = array<i64: 1>, scalar_prefetch = 0 : i64, scratch_operands = 0 : i64, tpu.core_type = #tpu.core_type<tc>, window_params = [{transform_indices = @transform_0, window_bounds = array<i64: 64, 768>}, {pipeline_mode = #tpu.pipeline_mode<synchronous>, transform_indices = @transform_1, window_bounds = array<i64: 768, 2048>}, {pipeline_mode = #tpu.pipeline_mode<synchronous>, transform_indices = @transform_2, window_bounds = array<i64: 1, 2048>}, {transform_indices = @transform_3, window_bounds = array<i64: 64, 2048>}]} {
    %c0 = arith.constant 0 : index
    %c0_0 = arith.constant 0 : index
    %0 = vector.load %arg1[%c0, %c0_0] : memref<64x768xf32, #tpu.memory_space<vmem>>, vector<64x768xf32>
    %1 = arith.truncf %0 : vector<64x768xf32> to vector<64x768xbf16>
    %c0_1 = arith.constant 0 : index
    %c0_2 = arith.constant 0 : index
    %2 = vector.load %arg2[%c0_1, %c0_2] : memref<768x2048xbf16, #tpu.memory_space<vmem>>, vector<768x2048xbf16>
    %cst = arith.constant dense<0.000000e+00> : vector<64x2048xf32>
    %3 = tpu.matmul %1, %2, %cst {dimension_numbers = #tpu.dot_dimension_numbers<[1], [0], [0], [1], [0, 0, 1, 1], [], []>} : vector<64x768xbf16>, vector<768x2048xbf16>, vector<64x2048xf32> -> vector<64x2048xf32>
    %c0_3 = arith.constant 0 : index
    %c0_4 = arith.constant 0 : index
    %4 = vector.load %arg3[%c0_3, %c0_4] : memref<1x2048xf32, #tpu.memory_space<vmem>>, vector<1x2048xf32>
    %5 = vector.broadcast %4 : vector<1x2048xf32> to vector<64x2048xf32>
    %6 = arith.addf %3, %5 : vector<64x2048xf32>
    %7 = arith.truncf %6 : vector<64x2048xf32> to vector<64x2048xbf16>
    %c0_5 = arith.constant 0 : index
    %c0_6 = arith.constant 0 : index
    %8 = vector.load %arg4[%c0_5, %c0_6] : memref<64x2048xbf16, #tpu.memory_space<vmem>>, vector<64x2048xbf16>
    tpu.vector_store %arg4[%c0_5, %c0_6], %7 {strides = array<i32>} : memref<64x2048xbf16, #tpu.memory_space<vmem>>, vector<64x2048xbf16>,
    return
  }
  func.func @transform_0(%arg0: i32) -> (i32, i32) {
    %c0_i32 = arith.constant 0 : i32
    %c0_i32_0 = arith.constant 0 : i32
    return %arg0, %c0_i32 : i32, i32
  }
  func.func @transform_1(%arg0: i32) -> (i32, i32) {
    %c0_i32 = arith.constant 0 : i32
    %c0_i32_0 = arith.constant 0 : i32
    %c0_i32_1 = arith.constant 0 : i32
    return %c0_i32, %c0_i32_0 : i32, i32
  }
  func.func @transform_2(%arg0: i32) -> (i32, i32) {
    %c0_i32 = arith.constant 0 : i32
    %c0_i32_0 = arith.constant 0 : i32
    %c0_i32_1 = arith.constant 0 : i32
    return %c0_i32, %c0_i32_0 : i32, i32
  }
  func.func @transform_3(%arg0: i32) -> (i32, i32) {
    %c0_i32 = arith.constant 0 : i32
    %c0_i32_0 = arith.constant 0 : i32
    return %arg0, %c0_i32 : i32, i32
  }
}

</mosaic_0001>

<bundles_post_ra>
// kernel: tpu_custom_call.1
= control target key start
LH: loop header
LB: loop body
LE: loop exit
PB: predicated region body
PF: predicated region fallthrough
CT: control target
= control target key end

     0   :  { %8 = vsyncpa [#allocation3], 0  ;;  %s8985_s0 = inlined_call_operand.hbm [shape: f32[64,768], index: 0, kind: input, shape index: {}]   ;;  %s8986_s1 = inlined_call_operand.hbm [shape: bf16[768,2048], index: 1, kind: input, shape index: {}]   ;;  %s8987_s2 = inlined_call_operand.hbm [shape: f32[1,2048], index: 2, kind: input, shape index: {}]   ;;  %s8988_s3 = inlined_call_operand.hbm [shape: bf16[64,2048], index: 3, kind: output, shape index: {}]  }
   0x1   :  { %9 = vsyncpa [#allocation6], 0 }
   0x2   :  { %10 = vsyncpa [#allocation4], 0  ;;  %s8419_s12 = smov [#allocation5]   ;;  %s8325_s16 = scalar_lea.hbm %s8986_s1, 98304 }
   0x3   :  { %s28_s13 = sshll.u32 %s8419_s12, 4  ;;  %p8326_p0 = scmp.ne.s32.totalorder %s8986_s1, %s8325_s16  ;;  %s29_s13 = int_to_ptr.vmem [resolvable:$true] %s28_s13 }
   0x4   :  { %p8329_p1 = scmp.lt.u32.totalorder %s8325_s16, %s8986_s1 }
   0x6   :  { %p8331_p2 = pnand %p8329_p1, %p8326_p0 }
   0x8   :  { %8334 = shalt.err (!%p8331_p2)
}
   0x9   :  { %s8335_s21 = scalar_lea.vmem %s29_s13, 98304  ;;  %p8340_p4 = scmp.lt.s32.totalorder %s29_s13, %s29_s13 }
   0xa   :  { %p8336_p3 = scmp.ne.s32.totalorder %s29_s13, %s8335_s21  ;;  %p8341_p5 = scmp.lt.s32.totalorder %s8335_s21, %s8335_s21 }
   0xc   :  { %p8342_p6 = por %p8341_p5, %p8340_p4 }
   0xe   :  { %p8343_p7 = pnand %p8342_p6, %p8336_p3 }
  0x10   :  { %8346 = shalt.err (!%p8343_p7)
}
  0x11   :  { %s8420_s22 = smov 1024   ;;  %s8421_s23 = smov 64  }
  0x12   :  { %34 = dma.hbm_to_vmem [thread:$0]  %s8986_s1, 98304, %s29_s13, [#allocation6], %s8420_s22, %s8420_s22, %s8421_s23  }
  0x13   :  { %s8422_s26 = smov [#allocation2]   ;;  %s8347_s30 = scalar_lea.hbm %s8985_s0, 6144 }
  0x14   :  { %s16_s27 = sshll.u32 %s8422_s26, 4  ;;  %p8348_p8 = scmp.ne.s32.totalorder %s8985_s0, %s8347_s30  ;;  %s17_s27 = int_to_ptr.vmem [resolvable:$true] %s16_s27 }
  0x15   :  { %p8351_p9 = scmp.lt.u32.totalorder %s8347_s30, %s8985_s0 }
  0x17   :  { %p8353_p10 = pnand %p8351_p9, %p8348_p8 }
  0x19   :  { %8356 = shalt.err (!%p8353_p10)
}
  0x1a   :  { %s8357_s8 = scalar_lea.vmem %s17_s27, 6144  ;;  %p8362_p12 = scmp.lt.s32.totalorder %s17_s27, %s17_s27 }
  0x1b   :  { %p8358_p11 = scmp.ne.s32.totalorder %s17_s27, %s8357_s8  ;;  %p8363_p13 = scmp.lt.s32.totalorder %s8357_s8, %s8357_s8 }
  0x1d   :  { %p8364_p0 = por %p8363_p13, %p8362_p12 }
  0x1f   :  { %p8365_p1 = pnand %p8364_p0, %p8358_p11 }
  0x21   :  { %8368 = shalt.err (!%p8365_p1)
}
  0x22   :  { %s8423_s1 = smov 768   ;;  %s8424_s9 = smov 48  }
  0x23   :  { %22 = dma.hbm_to_vmem [thread:$0]  %s8985_s0, 6144, %s17_s27, [#allocation3], %s8423_s1, %s8423_s1, %s8424_s9  }
  0x24   :  { %s8425_s12 = smov [#allocation7]   ;;  %s8369_s16 = scalar_lea.hbm %s8987_s2, 256 }
  0x25   :  { %s41_s13 = sshll.u32 %s8425_s12, 4  ;;  %p8370_p2 = scmp.ne.s32.totalorder %s8987_s2, %s8369_s16  ;;  %s42_s13 = int_to_ptr.vmem [resolvable:$true] %s41_s13 }
  0x26   :  { %p8373_p3 = scmp.lt.u32.totalorder %s8369_s16, %s8987_s2 }
  0x28   :  { %p8375_p4 = pnand %p8373_p3, %p8370_p2 }
  0x2a   :  { %8378 = shalt.err (!%p8375_p4)
}
  0x2b   :  { %s8379_s21 = scalar_lea.vmem %s42_s13, 256  ;;  %p8384_p6 = scmp.lt.s32.totalorder %s42_s13, %s42_s13 }
  0x2c   :  { %p8380_p5 = scmp.ne.s32.totalorder %s42_s13, %s8379_s21  ;;  %p8385_p7 = scmp.lt.s32.totalorder %s8379_s21, %s8379_s21 }
  0x2e   :  { %p8386_p8 = por %p8385_p7, %p8384_p6 }
  0x30   :  { %p8387_p9 = pnand %p8386_p8, %p8380_p5 }
  0x32   :  { %8390 = shalt.err (!%p8387_p9)
}
  0x33   :  { %44 = dma.hbm_to_vmem [thread:$0]  %s8987_s2, 256, %s42_s13, [#allocation6]  }
  0x34   :  { %8413 = dma.done.wait [#allocation3], 6144  }
  0x35   :  { %8414 = vsyncadd [#allocation3], 4294961152 }
  0x36   :  { %8415 = dma.done.wait [#allocation6], 98560  }
  0x37   :  { %8416 = vsyncadd [#allocation6], 4294868736  ;;  %v126_v0 = vld [vmem:[#allocation5] sm:$0xff]  ;;  %v127_v2 = vld [vmem:[#allocation5 + $0x8] sm:$0xff]  ;;  %s8426_s2 = smov [#allocation8]  }
  0x38   :  { %v134_v1 = vld [vmem:[#allocation5 + $0x40] sm:$0xff]  ;;  %v135_v4 = vld [vmem:[#allocation5 + $0x48] sm:$0xff]  ;;  %v61_v54 = vld [vmem:[#allocation2 + $0x38] sm:$0xff]  ;;  %s7023_s25 = sshll.u32 %s8426_s2, 4  ;;  %s7024_s25 = int_to_ptr.vmem [resolvable:$true] %s7023_s25 }
  0x39   :  { %v7037_v3 = vcombine.high %v126_v0, %v134_v1  ;;  %v7036_v5 = vcombine.low %v126_v0, %v134_v1  ;;  %v142_v6 = vld [vmem:[#allocation5 + $0x80] sm:$0xff]  ;;  %v7039_v8 = vcombine.high %v127_v2, %v135_v4  ;;  %v7038_v9 = vcombine.low %v127_v2, %v135_v4  ;;  %v143_v11 = vld [vmem:[#allocation5 + $0x88] sm:$0xff]  ;;  %s8391_s26 = scalar_lea.vmem %s7024_s25, 8192  ;;  %p8396_p11 = scmp.lt.s32.totalorder %s7024_s25, %s7024_s25 }
  0x3a   :  { %v150_v7 = vld [vmem:[#allocation5 + $0xc0] sm:$0xff]  ;;  %v151_v12 = vld [vmem:[#allocation5 + $0xc8] sm:$0xff]  ;;  %p8392_p10 = scmp.ne.s32.totalorder %s7024_s25, %s8391_s26  ;;  %p8397_p12 = scmp.lt.s32.totalorder %s8391_s26, %s8391_s26 }
  0x3b   :  { %v7053_v10 = vcombine.high %v142_v6, %v150_v7  ;;  %v158_v13 = vld [vmem:[#allocation5 + $0x100] sm:$0xff]  ;;  %4818 = vmatprep.subr.bf16.mxu0 %v7037_v3  ;;  %v7055_v14 = vcombine.high %v143_v11, %v151_v12  ;;  %v159_v16 = vld [vmem:[#allocation5 + $0x108] sm:$0xff]  ;;  %5037 = vmatprep.subr.bf16.mxu1 %v7039_v8  ;;  %v7052_v18 = vcombine.low %v142_v6, %v150_v7 }
  0x3c   :  { %v166_v15 = vld [vmem:[#allocation5 + $0x140] sm:$0xff]  ;;  %v167_v17 = vld [vmem:[#allocation5 + $0x148] sm:$0xff]  ;;  %4819 = vmatpush1.bf16.msra.mxu0 %v7036_v5  ;;  %5038 = vmatpush1.bf16.msra.mxu1 %v7038_v9  ;;  %v7054_v19 = vcombine.low %v143_v11, %v151_v12  ;;  %p8398_p13 = por %p8397_p12, %p8396_p11 }
  0x3d   :  { %4820 = vmatprep.subr.bf16.mxu0 %v7053_v10  ;;  %v7069_v20 = vcombine.high %v158_v13, %v166_v15  ;;  %5039 = vmatprep.subr.bf16.mxu1 %v7055_v14  ;;  %v7071_v21 = vcombine.high %v159_v16, %v167_v17  ;;  %v174_v22 = vld [vmem:[#allocation5 + $0x180] sm:$0xff]  ;;  %v175_v24 = vld [vmem:[#allocation5 + $0x188] sm:$0xff]  ;;  %v7068_v26 = vcombine.low %v158_v13, %v166_v15 }
  0x3e   :  { %v182_v23 = vld [vmem:[#allocation5 + $0x1c0] sm:$0xff]  ;;  %v183_v25 = vld [vmem:[#allocation5 + $0x1c8] sm:$0xff]  ;;  %v7070_v27 = vcombine.low %v159_v16, %v167_v17  ;;  %p8399_p0 = pnand %p8398_p13, %p8392_p10 }
  0x3f   :  { %v7085_v28 = vcombine.high %v174_v22, %v182_v23  ;;  %v7087_v29 = vcombine.high %v175_v24, %v183_v25  ;;  %v190_v30 = vld [vmem:[#allocation5 + $0x200] sm:$0xff]  ;;  %v191_v32 = vld [vmem:[#allocation5 + $0x208] sm:$0xff]  ;;  %v7084_v34 = vcombine.low %v174_v22, %v182_v23  ;;  %v7086_v35 = vcombine.low %v175_v24, %v183_v25 }
  0x40   :  { %4821 = vmatpush1.bf16.msra.mxu0 %v7052_v18  ;;  %5040 = vmatpush1.bf16.msra.mxu1 %v7054_v19  ;;  %v198_v31 = vld [vmem:[#allocation5 + $0x240] sm:$0xff]  ;;  %v199_v33 = vld [vmem:[#allocation5 + $0x248] sm:$0xff] }
  0x41   :  { %4822 = vmatprep.subr.bf16.mxu0 %v7069_v20  ;;  %5041 = vmatprep.subr.bf16.mxu1 %v7071_v21  ;;  %v7101_v36 = vcombine.high %v190_v30, %v198_v31  ;;  %v7103_v37 = vcombine.high %v191_v32, %v199_v33  ;;  %v206_v38 = vld [vmem:[#allocation5 + $0x280] sm:$0xff]  ;;  %v207_v40 = vld [vmem:[#allocation5 + $0x288] sm:$0xff]  ;;  %v7100_v42 = vcombine.low %v190_v30, %v198_v31 }
  0x42   :  { %v214_v39 = vld [vmem:[#allocation5 + $0x2c0] sm:$0xff]  ;;  %v215_v41 = vld [vmem:[#allocation5 + $0x2c8] sm:$0xff]  ;;  %v7102_v43 = vcombine.low %v191_v32, %v199_v33 }
  0x43   :  { %v7117_v44 = vcombine.high %v206_v38, %v214_v39  ;;  %v7119_v45 = vcombine.high %v207_v40, %v215_v41  ;;  %v222_v46 = vld [vmem:[#allocation5 + $0x300] sm:$0xff]  ;;  %v223_v48 = vld [vmem:[#allocation5 + $0x308] sm:$0xff]  ;;  %v7116_v50 = vcombine.low %v206_v38, %v214_v39  ;;  %v7118_v51 = vcombine.low %v207_v40, %v215_v41 }
  0x44   :  { %4823 = vmatpush1.bf16.msra.mxu0 %v7068_v26  ;;  %5042 = vmatpush1.bf16.msra.mxu1 %v7070_v27  ;;  %v230_v47 = vld [vmem:[#allocation5 + $0x340] sm:$0xff]  ;;  %v231_v49 = vld [vmem:[#allocation5 + $0x348] sm:$0xff] }
  0x45   :  { %4824 = vmatprep.subr.bf16.mxu0 %v7085_v28  ;;  %5043 = vmatprep.subr.bf16.mxu1 %v7087_v29  ;;  %v7133_v52 = vcombine.high %v222_v46, %v230_v47  ;;  %v55_v53 = vld [vmem:[#allocation2 + $0x8] sm:$0xff]  ;;  %v7135_v55 = vcombine.high %v223_v48, %v231_v49  ;;  %v238_v56 = vld [vmem:[#allocation5 + $0x380] sm:$0xff]  ;;  %v7132_v61 = vcombine.low %v222_v46, %v230_v47 }
  0x46   :  { %v246_v57 = vld [vmem:[#allocation5 + $0x3c0] sm:$0xff]  ;;  %v8486_v58 = vpack.c.bf16 %v61_v54, %v55_v53  ;;  %v239_v59 = vld [vmem:[#allocation5 + $0x388] sm:$0xff]  ;;  %v7134_v62 = vcombine.low %v223_v48, %v231_v49 }
  0x47   :  { %v247_v60 = vld [vmem:[#allocation5 + $0x3c8] sm:$0xff]  ;;  %v7149_v63 = vcombine.high %v238_v56, %v246_v57  ;;  %v254_v1 = vld [vmem:[#allocation5 + $0x400] sm:$0xff]  ;;  %v7148_v5 = vcombine.low %v238_v56, %v246_v57 }
  0x48   :  { %4825 = vmatpush1.bf16.msra.mxu0 %v7084_v34  ;;  %5044 = vmatpush1.bf16.msra.mxu1 %v7086_v35  ;;  %v7151_v0 = vcombine.high %v239_v59, %v247_v60  ;;  %v262_v2 = vld [vmem:[#allocation5 + $0x440] sm:$0xff]  ;;  %v255_v3 = vld [vmem:[#allocation5 + $0x408] sm:$0xff]  ;;  %v7150_v6 = vcombine.low %v239_v59, %v247_v60 }
  0x49   :  { %4826 = vmatprep.subr.bf16.mxu0 %v7101_v36  ;;  %5045 = vmatprep.subr.bf16.mxu1 %v7103_v37  ;;  %v263_v4 = vld [vmem:[#allocation5 + $0x448] sm:$0xff]  ;;  %v7165_v7 = vcombine.high %v254_v1, %v262_v2  ;;  %v270_v9 = vld [vmem:[#allocation5 + $0x480] sm:$0xff]  ;;  %v7164_v13 = vcombine.low %v254_v1, %v262_v2 }
  0x4a   :  { %4850 = vmatprep.mubr.bf16.mxu0 %v8486_v58  ;;  %5069 = vmatprep.mubr.bf16.mxu1 %v8486_v58  ;;  %v7167_v8 = vcombine.high %v255_v3, %v263_v4  ;;  %v278_v10 = vld [vmem:[#allocation5 + $0x4c0] sm:$0xff]  ;;  %v271_v11 = vld [vmem:[#allocation5 + $0x488] sm:$0xff]  ;;  %v7166_v14 = vcombine.low %v255_v3, %v263_v4 }
  0x4b   :  { %v279_v12 = vld [vmem:[#allocation5 + $0x4c8] sm:$0xff]  ;;  %v7181_v15 = vcombine.high %v270_v9, %v278_v10  ;;  %v286_v17 = vld [vmem:[#allocation5 + $0x500] sm:$0xff]  ;;  %v7180_v21 = vcombine.low %v270_v9, %v278_v10 }
  0x4c   :  { %4827 = vmatpush1.bf16.msra.mxu0 %v7100_v42  ;;  %5046 = vmatpush1.bf16.msra.mxu1 %v7102_v43  ;;  %v7183_v16 = vcombine.high %v271_v11, %v279_v12  ;;  %v294_v18 = vld [vmem:[#allocation5 + $0x540] sm:$0xff]  ;;  %v287_v19 = vld [vmem:[#allocation5 + $0x508] sm:$0xff]  ;;  %v7182_v22 = vcombine.low %v271_v11, %v279_v12 }
  0x4d   :  { %4828 = vmatprep.subr.bf16.mxu0 %v7117_v44  ;;  %5047 = vmatprep.subr.bf16.mxu1 %v7119_v45  ;;  %v295_v20 = vld [vmem:[#allocation5 + $0x548] sm:$0xff]  ;;  %v7197_v23 = vcombine.high %v286_v17, %v294_v18  ;;  %v302_v25 = vld [vmem:[#allocation5 + $0x580] sm:$0xff]  ;;  %v7196_v29 = vcombine.low %v286_v17, %v294_v18  ;;  %v73_v18 = vld [vmem:[#allocation2 + $0x98] sm:$0xff] }
  0x4e   :  { %v7199_v24 = vcombine.high %v287_v19, %v295_v20  ;;  %v310_v26 = vld [vmem:[#allocation5 + $0x5c0] sm:$0xff]  ;;  %v303_v27 = vld [vmem:[#allocation5 + $0x588] sm:$0xff]  ;;  %v7198_v30 = vcombine.low %v287_v19, %v295_v20 }
  0x4f   :  { %v311_v28 = vld [vmem:[#allocation5 + $0x5c8] sm:$0xff]  ;;  %v7213_v31 = vcombine.high %v302_v25, %v310_v26  ;;  %v318_v33 = vld [vmem:[#allocation5 + $0x600] sm:$0xff]  ;;  %v7212_v37 = vcombine.low %v302_v25, %v310_v26 }
  0x50   :  { %4829 = vmatpush1.bf16.msra.mxu0 %v7116_v50  ;;  %5048 = vmatpush1.bf16.msra.mxu1 %v7118_v51  ;;  %v7215_v32 = vcombine.high %v303_v27, %v311_v28  ;;  %v326_v34 = vld [vmem:[#allocation5 + $0x640] sm:$0xff]  ;;  %v319_v35 = vld [vmem:[#allocation5 + $0x608] sm:$0xff]  ;;  %v7214_v38 = vcombine.low %v303_v27, %v311_v28 }
  0x51   :  { %4830 = vmatprep.subr.bf16.mxu0 %v7133_v52  ;;  %5049 = vmatprep.subr.bf16.mxu1 %v7135_v55  ;;  %v327_v36 = vld [vmem:[#allocation5 + $0x648] sm:$0xff]  ;;  %v7229_v39 = vcombine.high %v318_v33, %v326_v34  ;;  %v334_v41 = vld [vmem:[#allocation5 + $0x680] sm:$0xff]  ;;  %v7228_v45 = vcombine.low %v318_v33, %v326_v34 }
  0x52   :  { %v7231_v40 = vcombine.high %v319_v35, %v327_v36  ;;  %v342_v42 = vld [vmem:[#allocation5 + $0x6c0] sm:$0xff]  ;;  %v335_v43 = vld [vmem:[#allocation5 + $0x688] sm:$0xff]  ;;  %v7230_v46 = vcombine.low %v319_v35, %v327_v36 }
  0x53   :  { %v343_v44 = vld [vmem:[#allocation5 + $0x6c8] sm:$0xff]  ;;  %v7245_v47 = vcombine.high %v334_v41, %v342_v42  ;;  %v350_v49 = vld [vmem:[#allocation5 + $0x700] sm:$0xff]  ;;  %v7244_v53 = vcombine.low %v334_v41, %v342_v42 }
  0x54   :  { %4831 = vmatpush1.bf16.msra.mxu0 %v7132_v61  ;;  %5050 = vmatpush1.bf16.msra.mxu1 %v7134_v62  ;;  %v7247_v48 = vcombine.high %v335_v43, %v343_v44  ;;  %v358_v50 = vld [vmem:[#allocation5 + $0x740] sm:$0xff]  ;;  %v351_v51 = vld [vmem:[#allocation5 + $0x708] sm:$0xff]  ;;  %v7246_v54 = vcombine.low %v335_v43, %v343_v44 }
  0x55   :  { %4832 = vmatprep.subr.bf16.mxu0 %v7149_v63  ;;  %5051 = vmatprep.subr.bf16.mxu1 %v7151_v0  ;;  %v359_v52 = vld [vmem:[#allocation5 + $0x748] sm:$0xff]  ;;  %v7261_v55 = vcombine.high %v350_v49, %v358_v50  ;;  %v366_v57 = vld [vmem:[#allocation5 + $0x780] sm:$0xff]  ;;  %v7260_v62 = vcombine.low %v350_v49, %v358_v50 }
  0x56   :  { %v7263_v56 = vcombine.high %v351_v51, %v359_v52  ;;  %v374_v59 = vld [vmem:[#allocation5 + $0x7c0] sm:$0xff]  ;;  %v367_v60 = vld [vmem:[#allocation5 + $0x788] sm:$0xff]  ;;  %v7262_v63 = vcombine.low %v351_v51, %v359_v52  ;;  %v84_v52 = vld [vmem:[#allocation2 + $0xf0] sm:$0xff] }
  0x57   :  { %v375_v61 = vld [vmem:[#allocation5 + $0x7c8] sm:$0xff]  ;;  %v7277_v0 = vcombine.high %v366_v57, %v374_v59  ;;  %v382_v2 = vld [vmem:[#allocation5 + $0x800] sm:$0xff] }
  0x58   :  { %4833 = vmatpush1.bf16.msra.mxu0 %v7148_v5  ;;  %5052 = vmatpush1.bf16.msra.mxu1 %v7150_v6  ;;  %v7279_v1 = vcombine.high %v367_v60, %v375_v61  ;;  %v390_v3 = vld [vmem:[#allocation5 + $0x840] sm:$0xff]  ;;  %v383_v4 = vld [vmem:[#allocation5 + $0x808] sm:$0xff]  ;;  %v7276_v6 = vcombine.low %v366_v57, %v374_v59  ;;  %v7278_v9 = vcombine.low %v367_v60, %v375_v61 }
  0x59   :  { %4834 = vmatprep.subr.bf16.mxu0 %v7165_v7  ;;  %5053 = vmatprep.subr.bf16.mxu1 %v7167_v8  ;;  %v391_v5 = vld [vmem:[#allocation5 + $0x848] sm:$0xff]  ;;  %v54_v7 = vld [vmem:[#allocation2] sm:$0xff]  ;;  %v60_v8 = vld [vmem:[#allocation2 + $0x30] sm:$0xff]  ;;  %v7293_v10 = vcombine.high %v382_v2, %v390_v3  ;;  %v7292_v19 = vcombine.low %v382_v2, %v390_v3 }
  0x5a   :  { %v7295_v11 = vcombine.high %v383_v4, %v391_v5  ;;  %v398_v12 = vld [vmem:[#allocation5 + $0x880] sm:$0xff]  ;;  %v67_v17 = vld [vmem:[#allocation2 + $0x68] sm:$0xff]  ;;  %v7294_v20 = vcombine.low %v383_v4, %v391_v5 }
  0x5b   :  { %v8492_v25 = vpack.c.bf16 %v73_v18, %v67_v17  ;;  %v415_v26 = vld [vmem:[#allocation5 + $0x908] sm:$0xff]  ;;  %v430_v34 = vld [vmem:[#allocation5 + $0x980] sm:$0xff] }
  0x5c   :  { %4835 = vmatpush1.bf16.msra.mxu0 %v7164_v13  ;;  %5054 = vmatpush1.bf16.msra.mxu1 %v7166_v14  ;;  %v406_v13 = vld [vmem:[#allocation5 + $0x8c0] sm:$0xff]  ;;  %v399_v14 = vld [vmem:[#allocation5 + $0x888] sm:$0xff] }
  0x5d   :  { %4836 = vmatprep.subr.bf16.mxu0 %v7181_v15  ;;  %5055 = vmatprep.subr.bf16.mxu1 %v7183_v16  ;;  %v8490_v15 = vpack.c.bf16 %v60_v8, %v54_v7  ;;  %v407_v16 = vld [vmem:[#allocation5 + $0x8c8] sm:$0xff]  ;;  %v7308_v28 = vcombine.low %v398_v12, %v406_v13  ;;  %v438_v35 = vld [vmem:[#allocation5 + $0x9c0] sm:$0xff] }
  0x5e   :  { %v423_v27 = vld [vmem:[#allocation5 + $0x948] sm:$0xff]  ;;  %v7341_v43 = vcombine.high %v430_v34, %v438_v35  ;;  %v7340_v50 = vcombine.low %v430_v34, %v438_v35  ;;  %v78_v51 = vld [vmem:[#allocation2 + $0xc0] sm:$0xff] }
  0x5f   :  { %v7327_v33 = vcombine.high %v415_v26, %v423_v27  ;;  %v431_v36 = vld [vmem:[#allocation5 + $0x988] sm:$0xff]  ;;  %v7326_v42 = vcombine.low %v415_v26, %v423_v27  ;;  %v470_v57 = vld [vmem:[#allocation5 + $0xac0] sm:$0xff]  ;;  %v8506_v61 = vpack.c.bf16 %v84_v52, %v78_v51 }
  0x60   :  { %4837 = vmatpush1.bf16.msra.mxu0 %v7180_v21  ;;  %5056 = vmatpush1.bf16.msra.mxu1 %v7182_v22  ;;  %v7309_v21 = vcombine.high %v398_v12, %v406_v13  ;;  %v7311_v22 = vcombine.high %v399_v14, %v407_v16  ;;  %v455_v49 = vld [vmem:[#allocation5 + $0xa48] sm:$0xff]  ;;  %v478_v4 = vld [vmem:[#allocation5 + $0xb00] sm:$0xff] }
  0x61   :  { %4838 = vmatprep.subr.bf16.mxu0 %v7197_v23  ;;  %5057 = vmatprep.subr.bf16.mxu1 %v7199_v24  ;;  %v414_v23 = vld [vmem:[#allocation5 + $0x900] sm:$0xff]  ;;  %v463_v59 = vld [vmem:[#allocation5 + $0xa88] sm:$0xff] }
  0x62   :  { %v422_v24 = vld [vmem:[#allocation5 + $0x940] sm:$0xff]  ;;  %v471_v60 = vld [vmem:[#allocation5 + $0xac8] sm:$0xff] }
  0x63   :  { %v7324_v41 = vcombine.low %v414_v23, %v422_v24  ;;  %v7375_v3 = vcombine.high %v463_v59, %v471_v60  ;;  %v486_v5 = vld [vmem:[#allocation5 + $0xb40] sm:$0xff]  ;;  %v479_v7 = vld [vmem:[#allocation5 + $0xb08] sm:$0xff]  ;;  %v7374_v12 = vcombine.low %v463_v59, %v471_v60 }
  0x64   :  { %4839 = vmatpush1.bf16.msra.mxu0 %v7196_v29  ;;  %5058 = vmatpush1.bf16.msra.mxu1 %v7198_v30  ;;  %v66_v29 = vld [vmem:[#allocation2 + $0x60] sm:$0xff]  ;;  %v72_v30 = vld [vmem:[#allocation2 + $0x90] sm:$0xff]  ;;  %v487_v8 = vld [vmem:[#allocation5 + $0xb48] sm:$0xff]  ;;  %v7389_v13 = vcombine.high %v478_v4, %v486_v5 }
  0x65   :  { %4840 = vmatprep.subr.bf16.mxu0 %v7213_v31  ;;  %5059 = vmatprep.subr.bf16.mxu1 %v7215_v32  ;;  %v7310_v31 = vcombine.low %v399_v14, %v407_v16  ;;  %v7325_v32 = vcombine.high %v414_v23, %v422_v24  ;;  %v7391_v14 = vcombine.high %v479_v7, %v487_v8  ;;  %v494_v16 = vld [vmem:[#allocation5 + $0xb80] sm:$0xff]  ;;  %v495_v18 = vld [vmem:[#allocation5 + $0xb88] sm:$0xff] }
  0x66   :  { %v502_v17 = vld [vmem:[#allocation5 + $0xbc0] sm:$0xff]  ;;  %v7388_v23 = vcombine.low %v478_v4, %v486_v5  ;;  %v7390_v24 = vcombine.low %v479_v7, %v487_v8  ;;  %v567_v59 = vld [vmem:[#allocation5 + $0xdc8] sm:$0xff] }
  0x67   :  { %v7405_v26 = vcombine.high %v494_v16, %v502_v17  ;;  %v583_v4 = vld [vmem:[#allocation5 + $0xe48] sm:$0xff] }
  0x68   :  { %4841 = vmatpush1.bf16.msra.mxu0 %v7212_v37  ;;  %5060 = vmatpush1.bf16.msra.mxu1 %v7214_v38  ;;  %v439_v37 = vld [vmem:[#allocation5 + $0x9c8] sm:$0xff]  ;;  %v8498_v38 = vpack.c.bf16 %v72_v30, %v66_v29  ;;  %v518_v29 = vld [vmem:[#allocation5 + $0xc40] sm:$0xff] }
  0x69   :  { %4842 = vmatprep.subr.bf16.mxu0 %v7229_v39  ;;  %5061 = vmatprep.subr.bf16.mxu1 %v7231_v40  ;;  %v79_v39 = vld [vmem:[#allocation2 + $0xc8] sm:$0xff]  ;;  %v85_v40 = vld [vmem:[#allocation2 + $0xf8] sm:$0xff]  ;;  %v7343_v44 = vcombine.high %v431_v36, %v439_v37 }
  0x6c   :  { %4843 = vmatpush1.bf16.msra.mxu0 %v7228_v45  ;;  %5062 = vmatpush1.bf16.msra.mxu1 %v7230_v46  ;;  %v446_v45 = vld [vmem:[#allocation5 + $0xa00] sm:$0xff] }
  0x6d   :  { %4844 = vmatprep.subr.bf16.mxu0 %v7245_v47  ;;  %5063 = vmatprep.subr.bf16.mxu1 %v7247_v48  ;;  %v454_v46 = vld [vmem:[#allocation5 + $0xa40] sm:$0xff]  ;;  %v8500_v47 = vpack.c.bf16 %v85_v40, %v79_v39  ;;  %v447_v48 = vld [vmem:[#allocation5 + $0xa08] sm:$0xff] }
  0x6e   :  { %v534_v39 = vld [vmem:[#allocation5 + $0xcc0] sm:$0xff]  ;;  %v527_v40 = vld [vmem:[#allocation5 + $0xc88] sm:$0xff] }
  0x70   :  { %4845 = vmatpush1.bf16.msra.mxu0 %v7244_v53  ;;  %5064 = vmatpush1.bf16.msra.mxu1 %v7246_v54  ;;  %v7342_v53 = vcombine.low %v431_v36, %v439_v37  ;;  %v7357_v54 = vcombine.high %v446_v45, %v454_v46  ;;  %v526_v37 = vld [vmem:[#allocation5 + $0xc80] sm:$0xff] }
  0x71   :  { %4846 = vmatprep.subr.bf16.mxu0 %v7261_v55  ;;  %5065 = vmatprep.subr.bf16.mxu1 %v7263_v56  ;;  %v7359_v55 = vcombine.high %v447_v48, %v455_v49  ;;  %v462_v56 = vld [vmem:[#allocation5 + $0xa80] sm:$0xff]  ;;  %v7436_v51 = vcombine.low %v526_v37, %v534_v39 }
  0x72   :  { %v7373_v2 = vcombine.high %v462_v56, %v470_v57 }
  0x74   :  { %4847 = vmatpush1.bf16.msra.mxu0 %v7260_v62  ;;  %5066 = vmatpush1.bf16.msra.mxu1 %v7262_v63  ;;  %v91_v62 = vld [vmem:[#allocation2 + $0x128] sm:$0xff]  ;;  %v97_v63 = vld [vmem:[#allocation2 + $0x158] sm:$0xff] }
  0x75   :  { %4848 = vmatprep.subr.bf16.mxu0 %v7277_v0  ;;  %5067 = vmatprep.subr.bf16.mxu1 %v7279_v1  ;;  %v7356_v0 = vcombine.low %v446_v45, %v454_v46  ;;  %v7358_v1 = vcombine.low %v447_v48, %v455_v49  ;;  %v542_v46 = vld [vmem:[#allocation5 + $0xd00] sm:$0xff]  ;;  %v543_v49 = vld [vmem:[#allocation5 + $0xd08] sm:$0xff] }
  0x76   :  { %v550_v48 = vld [vmem:[#allocation5 + $0xd40] sm:$0xff] }
  0x77   :  { %v7452_v60 = vcombine.low %v542_v46, %v550_v48 }
  0x78   :  { %4849 = vmatpush1.bf16.msra.mxu0 %v7276_v6  ;;  %5068 = vmatpush1.bf16.msra.mxu1 %v7278_v9  ;;  %v8508_v6 = vpack.c.bf16 %v97_v63, %v91_v62  ;;  %v7372_v9 = vcombine.low %v462_v56, %v470_v57  ;;  %v566_v56 = vld [vmem:[#allocation5 + $0xdc0] sm:$0xff]  ;;  %v559_v57 = vld [vmem:[#allocation5 + $0xd88] sm:$0xff] }
  0x79   :  { %4891 = vmatprep.subr.bf16.mxu0 %v7293_v10  ;;  %5110 = vmatprep.subr.bf16.mxu1 %v7295_v11  ;;  %v90_v10 = vld [vmem:[#allocation2 + $0x120] sm:$0xff]  ;;  %v96_v11 = vld [vmem:[#allocation2 + $0x150] sm:$0xff]  ;;  %v7470_v7 = vcombine.low %v559_v57, %v567_v59 }
  0x7b   :  { %4851 = vmatmul.mubr.bf16.vlgmr.msra.gmra.mrb[0].mxu0 %v8490_v15  ;;  %5070 = vmatmul.mubr.bf16.vlgmr.msra.gmra.mrb[0].mxu1 %v8490_v15 }
  0x7c   :  { %4892 = vmatpush1.bf16.msra.mxu0 %v7292_v19  ;;  %5111 = vmatpush1.bf16.msra.mxu1 %v7294_v20  ;;  %v503_v19 = vld [vmem:[#allocation5 + $0xbc8] sm:$0xff]  ;;  %v8514_v20 = vpack.c.bf16 %v96_v11, %v90_v10  ;;  %v590_v10 = vld [vmem:[#allocation5 + $0xe80] sm:$0xff] }
  0x7d   :  { %4893 = vmatprep.subr.bf16.mxu0 %v7309_v21  ;;  %5112 = vmatprep.subr.bf16.mxu1 %v7311_v22  ;;  %v57_v21 = vld [vmem:[#allocation2 + $0x18] sm:$0xff]  ;;  %v63_v22 = vld [vmem:[#allocation2 + $0x48] sm:$0xff]  ;;  %v7407_v27 = vcombine.high %v495_v18, %v503_v19  ;;  %v7406_v34 = vcombine.low %v495_v18, %v503_v19  ;;  %v598_v11 = vld [vmem:[#allocation5 + $0xec0] sm:$0xff] }
  0x7e   :  { %4860 = vmatprep.mubr.bf16.mxu0 %v8492_v25  ;;  %5079 = vmatprep.mubr.bf16.mxu1 %v8492_v25  ;;  %v8516_v30 = vpack.c.bf16 %v63_v22, %v57_v21  ;;  %v606_v19 = vld [vmem:[#allocation5 + $0xf00] sm:$0xff]  ;;  %v607_v22 = vld [vmem:[#allocation5 + $0xf08] sm:$0xff] }
  0x7f   :  { %v614_v21 = vld [vmem:[#allocation5 + $0xf40] sm:$0xff] }
  0x80   :  { %4894 = vmatpush1.bf16.msra.mxu0 %v7308_v28  ;;  %5113 = vmatpush1.bf16.msra.mxu1 %v7310_v31  ;;  %v510_v28 = vld [vmem:[#allocation5 + $0xc00] sm:$0xff]  ;;  %v511_v31 = vld [vmem:[#allocation5 + $0xc08] sm:$0xff] }
  0x81   :  { %4895 = vmatprep.subr.bf16.mxu0 %v7325_v32  ;;  %5114 = vmatprep.subr.bf16.mxu1 %v7327_v33  ;;  %v519_v32 = vld [vmem:[#allocation5 + $0xc48] sm:$0xff]  ;;  %v7404_v33 = vcombine.low %v494_v16, %v502_v17  ;;  %v7421_v35 = vcombine.high %v510_v28, %v518_v29  ;;  %v7501_v17 = vcombine.high %v590_v10, %v598_v11 }
  0x82   :  { %v7423_v36 = vcombine.high %v511_v31, %v519_v32 }
  0x83   :  { %4861 = vmatmul.mubr.bf16.gmra.mrb[4].mxu0 %v8498_v38  ;;  %5080 = vmatmul.mubr.bf16.gmra.mrb[4].mxu1 %v8498_v38 }
  0x84   :  { %4896 = vmatpush1.bf16.msra.mxu0 %v7324_v41  ;;  %5115 = vmatpush1.bf16.msra.mxu1 %v7326_v42  ;;  %v535_v41 = vld [vmem:[#allocation5 + $0xcc8] sm:$0xff]  ;;  %v7420_v42 = vcombine.low %v510_v28, %v518_v29  ;;  %v622_v29 = vld [vmem:[#allocation5 + $0xf80] sm:$0xff] }
  0x85   :  { %4897 = vmatprep.subr.bf16.mxu0 %v7341_v43  ;;  %5116 = vmatprep.subr.bf16.mxu1 %v7343_v44  ;;  %v7422_v43 = vcombine.low %v511_v31, %v519_v32  ;;  %v7437_v44 = vcombine.high %v526_v37, %v534_v39  ;;  %v7439_v45 = vcombine.high %v527_v40, %v535_v41  ;;  %v630_v31 = vld [vmem:[#allocation5 + $0xfc0] sm:$0xff]  ;;  %v623_v32 = vld [vmem:[#allocation5 + $0xf88] sm:$0xff] }
  0x86   :  { %4870 = vmatprep.mubr.bf16.mxu0 %v8500_v47  ;;  %5089 = vmatprep.mubr.bf16.mxu1 %v8500_v47  ;;  %v7438_v52 = vcombine.low %v527_v40, %v535_v41  ;;  %v638_v39 = vld [vmem:[#allocation5 + $0x1000] sm:$0xff]  ;;  %v639_v41 = vld [vmem:[#allocation5 + $0x1008] sm:$0xff] }
  0x87   :  { %v646_v40 = vld [vmem:[#allocation5 + $0x1040] sm:$0xff] }
  0x88   :  { %4898 = vmatpush1.bf16.msra.mxu0 %v7340_v50  ;;  %5117 = vmatpush1.bf16.msra.mxu1 %v7342_v53  ;;  %v551_v50 = vld [vmem:[#allocation5 + $0xd48] sm:$0xff]  ;;  %v7453_v53 = vcombine.high %v542_v46, %v550_v48  ;;  %v7549_v48 = vcombine.high %v638_v39, %v646_v40 }
  0x89   :  { %4899 = vmatprep.subr.bf16.mxu0 %v7357_v54  ;;  %5118 = vmatprep.subr.bf16.mxu1 %v7359_v55  ;;  %v7455_v54 = vcombine.high %v543_v49, %v551_v50  ;;  %v558_v55 = vld [vmem:[#allocation5 + $0xd80] sm:$0xff]  ;;  %v7454_v62 = vcombine.low %v543_v49, %v551_v50 }
  0x8a   :  { %v7469_v63 = vcombine.high %v558_v55, %v566_v56  ;;  %v7468_v5 = vcombine.low %v558_v55, %v566_v56  ;;  %v654_v50 = vld [vmem:[#allocation5 + $0x1080] sm:$0xff]  ;;  %v69_v55 = vld [vmem:[#allocation2 + $0x78] sm:$0xff]  ;;  %v75_v56 = vld [vmem:[#allocation2 + $0xa8] sm:$0xff] }
  0x8b   :  { %4871 = vmatmul.mubr.bf16.gmra.mrb[8].mxu0 %v8506_v61  ;;  %5090 = vmatmul.mubr.bf16.gmra.mrb[8].mxu1 %v8506_v61 }
  0x8c   :  { %4900 = vmatpush1.bf16.msra.mxu0 %v7356_v0  ;;  %5119 = vmatpush1.bf16.msra.mxu1 %v7358_v1  ;;  %v7471_v0 = vcombine.high %v559_v57, %v567_v59  ;;  %v574_v1 = vld [vmem:[#allocation5 + $0xe00] sm:$0xff]  ;;  %v7548_v57 = vcombine.low %v638_v39, %v646_v40  ;;  %v719_v40 = vld [vmem:[#allocation5 + $0x1288] sm:$0xff] }
  0x8d   :  { %4901 = vmatprep.subr.bf16.mxu0 %v7373_v2  ;;  %5120 = vmatprep.subr.bf16.mxu1 %v7375_v3  ;;  %v582_v2 = vld [vmem:[#allocation5 + $0xe40] sm:$0xff]  ;;  %v575_v3 = vld [vmem:[#allocation5 + $0xe08] sm:$0xff] }
  0x8e   :  { %4880 = vmatprep.mubr.bf16.mxu0 %v8508_v6  ;;  %5099 = vmatprep.mubr.bf16.mxu1 %v8508_v6  ;;  %v7485_v8 = vcombine.high %v574_v1, %v582_v2  ;;  %v7486_v16 = vcombine.low %v575_v3, %v583_v4  ;;  %v726_v39 = vld [vmem:[#allocation5 + $0x12c0] sm:$0xff] }
  0x90   :  { %4902 = vmatpush1.bf16.msra.mxu0 %v7372_v9  ;;  %5121 = vmatpush1.bf16.msra.mxu1 %v7374_v12  ;;  %v7487_v9 = vcombine.high %v575_v3, %v583_v4  ;;  %v591_v12 = vld [vmem:[#allocation5 + $0xe88] sm:$0xff] }
  0x91   :  { %4903 = vmatprep.subr.bf16.mxu0 %v7389_v13  ;;  %5122 = vmatprep.subr.bf16.mxu1 %v7391_v14  ;;  %v599_v13 = vld [vmem:[#allocation5 + $0xec8] sm:$0xff]  ;;  %v7484_v14 = vcombine.low %v574_v1, %v582_v2  ;;  %v8524_v1 = vpack.c.bf16 %v75_v56, %v69_v55 }
  0x92   :  { %v7503_v18 = vcombine.high %v591_v12, %v599_v13  ;;  %v671_v2 = vld [vmem:[#allocation5 + $0x1108] sm:$0xff] }
  0x93   :  { %4881 = vmatmul.mubr.bf16.gmra.mrb[12].mxu0 %v8514_v20  ;;  %5100 = vmatmul.mubr.bf16.gmra.mrb[12].mxu1 %v8514_v20  ;;  %v679_v3 = vld [vmem:[#allocation5 + $0x1148] sm:$0xff] }
  0x94   :  { %4904 = vmatpush1.bf16.msra.mxu0 %v7388_v23  ;;  %5123 = vmatpush1.bf16.msra.mxu1 %v7390_v24  ;;  %v615_v23 = vld [vmem:[#allocation5 + $0xf48] sm:$0xff]  ;;  %v7500_v24 = vcombine.low %v590_v10, %v598_v11  ;;  %v7583_v10 = vcombine.high %v671_v2, %v679_v3  ;;  %v686_v11 = vld [vmem:[#allocation5 + $0x1180] sm:$0xff] }
  0x95   :  { %4905 = vmatprep.subr.bf16.mxu0 %v7405_v26  ;;  %5124 = vmatprep.subr.bf16.mxu1 %v7407_v27  ;;  %v7502_v26 = vcombine.low %v591_v12, %v599_v13  ;;  %v7517_v27 = vcombine.high %v606_v19, %v614_v21  ;;  %v7519_v28 = vcombine.high %v607_v22, %v615_v23  ;;  %v694_v12 = vld [vmem:[#allocation5 + $0x11c0] sm:$0xff]  ;;  %v687_v13 = vld [vmem:[#allocation5 + $0x1188] sm:$0xff] }
  0x96   :  { %4923 = vmatprep.mubr.bf16.mxu0 %v8516_v30  ;;  %5142 = vmatprep.mubr.bf16.mxu1 %v8516_v30  ;;  %v743_v55 = vld [vmem:[#allocation5 + $0x1348] sm:$0xff] }
  0x98   :  { %4906 = vmatpush1.bf16.msra.mxu0 %v7404_v33  ;;  %5125 = vmatpush1.bf16.msra.mxu1 %v7406_v34  ;;  %v631_v33 = vld [vmem:[#allocation5 + $0xfc8] sm:$0xff]  ;;  %v7516_v34 = vcombine.low %v606_v19, %v614_v21  ;;  %v7582_v21 = vcombine.low %v671_v2, %v679_v3  ;;  %v758_v2 = vld [vmem:[#allocation5 + $0x13c0] sm:$0xff] }
  0x99   :  { %4907 = vmatprep.subr.bf16.mxu0 %v7421_v35  ;;  %5126 = vmatprep.subr.bf16.mxu1 %v7423_v36  ;;  %v7518_v35 = vcombine.low %v607_v22, %v615_v23  ;;  %v7533_v36 = vcombine.high %v622_v29, %v630_v31  ;;  %v7535_v37 = vcombine.high %v623_v32, %v631_v33  ;;  %v751_v3 = vld [vmem:[#allocation5 + $0x1388] sm:$0xff] }
  0x9a   :  { %v7534_v46 = vcombine.low %v623_v32, %v631_v33  ;;  %v7597_v22 = vcombine.high %v686_v11, %v694_v12  ;;  %v80_v32 = vld [vmem:[#allocation2 + $0xd0] sm:$0xff]  ;;  %v86_v33 = vld [vmem:[#allocation2 + $0x100] sm:$0xff] }
  0x9c   :  { %4908 = vmatpush1.bf16.msra.mxu0 %v7420_v42  ;;  %5127 = vmatpush1.bf16.msra.mxu1 %v7422_v43  ;;  %v647_v42 = vld [vmem:[#allocation5 + $0x1048] sm:$0xff]  ;;  %v7532_v43 = vcombine.low %v622_v29, %v630_v31  ;;  %v7596_v31 = vcombine.low %v686_v11, %v694_v12 }
  0x9d   :  { %4909 = vmatprep.subr.bf16.mxu0 %v7437_v44  ;;  %5128 = vmatprep.subr.bf16.mxu1 %v7439_v45  ;;  %v56_v44 = vld [vmem:[#allocation2 + $0x10] sm:$0xff]  ;;  %v62_v45 = vld [vmem:[#allocation2 + $0x40] sm:$0xff]  ;;  %v7551_v49 = vcombine.high %v639_v41, %v647_v42  ;;  %v7550_v59 = vcombine.low %v639_v41, %v647_v42  ;;  %v711_v29 = vld [vmem:[#allocation5 + $0x1248] sm:$0xff]  ;;  %v8538_v42 = vpack.c.bf16 %v86_v33, %v80_v32 }
  0x9e   :  { %v727_v41 = vld [vmem:[#allocation5 + $0x12c8] sm:$0xff] }
  0xa0   :  { %4910 = vmatpush1.bf16.msra.mxu0 %v7436_v51  ;;  %5129 = vmatpush1.bf16.msra.mxu1 %v7438_v52  ;;  %v662_v51 = vld [vmem:[#allocation5 + $0x10c0] sm:$0xff]  ;;  %v655_v52 = vld [vmem:[#allocation5 + $0x1088] sm:$0xff] }
  0xa1   :  { %4911 = vmatprep.subr.bf16.mxu0 %v7453_v53  ;;  %5130 = vmatprep.subr.bf16.mxu1 %v7455_v54  ;;  %v8522_v53 = vpack.c.bf16 %v62_v45, %v56_v44  ;;  %v663_v54 = vld [vmem:[#allocation5 + $0x10c8] sm:$0xff]  ;;  %v7564_v4 = vcombine.low %v654_v50, %v662_v51 }
  0xa2   :  { %v99_v44 = vld [vmem:[#allocation2 + $0x168] sm:$0xff] }
  0xa4   :  { %4912 = vmatpush1.bf16.msra.mxu0 %v7452_v60  ;;  %5131 = vmatpush1.bf16.msra.mxu1 %v7454_v62  ;;  %v7565_v60 = vcombine.high %v654_v50, %v662_v51  ;;  %v7567_v62 = vcombine.high %v655_v52, %v663_v54  ;;  %v734_v50 = vld [vmem:[#allocation5 + $0x1300] sm:$0xff] }
  0xa5   :  { %4913 = vmatprep.subr.bf16.mxu0 %v7469_v63  ;;  %5132 = vmatprep.subr.bf16.mxu1 %v7471_v0  ;;  %v670_v63 = vld [vmem:[#allocation5 + $0x1100] sm:$0xff] }
  0xa6   :  { %v678_v0 = vld [vmem:[#allocation5 + $0x1140] sm:$0xff] }
  0xa7   :  { %v7580_v19 = vcombine.low %v670_v63, %v678_v0  ;;  %v742_v51 = vld [vmem:[#allocation5 + $0x1340] sm:$0xff] }
  0xa8   :  { %4914 = vmatpush1.bf16.msra.mxu0 %v7468_v5  ;;  %5133 = vmatpush1.bf16.msra.mxu1 %v7470_v7  ;;  %v68_v5 = vld [vmem:[#allocation2 + $0x70] sm:$0xff]  ;;  %v74_v7 = vld [vmem:[#allocation2 + $0xa0] sm:$0xff] }
  0xa9   :  { %4915 = vmatprep.subr.bf16.mxu0 %v7485_v8  ;;  %5134 = vmatprep.subr.bf16.mxu1 %v7487_v9  ;;  %v7566_v8 = vcombine.low %v655_v52, %v663_v54  ;;  %v7581_v9 = vcombine.high %v670_v63, %v678_v0  ;;  %v735_v54 = vld [vmem:[#allocation5 + $0x1308] sm:$0xff]  ;;  %v750_v0 = vld [vmem:[#allocation5 + $0x1380] sm:$0xff] }
  0xaa   :  { %v7647_v63 = vcombine.high %v735_v54, %v743_v55  ;;  %v7661_v11 = vcombine.high %v750_v0, %v758_v2 }
  0xac   :  { %4916 = vmatpush1.bf16.msra.mxu0 %v7484_v14  ;;  %5135 = vmatpush1.bf16.msra.mxu1 %v7486_v16  ;;  %v695_v14 = vld [vmem:[#allocation5 + $0x11c8] sm:$0xff]  ;;  %v8530_v16 = vpack.c.bf16 %v74_v7, %v68_v5 }
  0xad   :  { %4917 = vmatprep.subr.bf16.mxu0 %v7501_v17  ;;  %5136 = vmatprep.subr.bf16.mxu1 %v7503_v18  ;;  %v81_v17 = vld [vmem:[#allocation2 + $0xd8] sm:$0xff]  ;;  %v87_v18 = vld [vmem:[#allocation2 + $0x108] sm:$0xff]  ;;  %v7599_v23 = vcombine.high %v687_v13, %v695_v14 }
  0xae   :  { %v59_v7 = vld [vmem:[#allocation2 + $0x28] sm:$0xff] }
  0xb0   :  { %4918 = vmatpush1.bf16.msra.mxu0 %v7500_v24  ;;  %5137 = vmatpush1.bf16.msra.mxu1 %v7502_v26  ;;  %v702_v24 = vld [vmem:[#allocation5 + $0x1200] sm:$0xff] }
  0xb1   :  { %4919 = vmatprep.subr.bf16.mxu0 %v7517_v27  ;;  %5138 = vmatprep.subr.bf16.mxu1 %v7519_v28  ;;  %v710_v26 = vld [vmem:[#allocation5 + $0x1240] sm:$0xff]  ;;  %v8532_v27 = vpack.c.bf16 %v87_v18, %v81_v17  ;;  %v703_v28 = vld [vmem:[#allocation5 + $0x1208] sm:$0xff] }
  0xb2   :  { %v7612_v45 = vcombine.low %v702_v24, %v710_v26  ;;  %v767_v18 = vld [vmem:[#allocation5 + $0x1408] sm:$0xff] }
  0xb4   :  { %4920 = vmatpush1.bf16.msra.mxu0 %v7516_v34  ;;  %5139 = vmatpush1.bf16.msra.mxu1 %v7518_v35  ;;  %v7598_v34 = vcombine.low %v687_v13, %v695_v14  ;;  %v7613_v35 = vcombine.high %v702_v24, %v710_v26  ;;  %v766_v13 = vld [vmem:[#allocation5 + $0x1400] sm:$0xff] }
  0xb5   :  { %4921 = vmatprep.subr.bf16.mxu0 %v7533_v36  ;;  %5140 = vmatprep.subr.bf16.mxu1 %v7535_v37  ;;  %v7615_v36 = vcombine.high %v703_v28, %v711_v29  ;;  %v718_v37 = vld [vmem:[#allocation5 + $0x1280] sm:$0xff] }
  0xb6   :  { %v7628_v56 = vcombine.low %v718_v37, %v726_v39  ;;  %v774_v14 = vld [vmem:[#allocation5 + $0x1440] sm:$0xff] }
  0xb7   :  { %v782_v26 = vld [vmem:[#allocation5 + $0x1480] sm:$0xff]  ;;  %v7676_v32 = vcombine.low %v766_v13, %v774_v14 }
  0xb8   :  { %4922 = vmatpush1.bf16.msra.mxu0 %v7532_v43  ;;  %5141 = vmatpush1.bf16.msra.mxu1 %v7534_v46  ;;  %v93_v43 = vld [vmem:[#allocation2 + $0x138] sm:$0xff]  ;;  %v7614_v46 = vcombine.low %v703_v28, %v711_v29  ;;  %v790_v28 = vld [vmem:[#allocation5 + $0x14c0] sm:$0xff]  ;;  %v783_v29 = vld [vmem:[#allocation5 + $0x1488] sm:$0xff] }
  0xb9   :  { %4964 = vmatprep.subr.bf16.mxu0 %v7549_v48  ;;  %5183 = vmatprep.subr.bf16.mxu1 %v7551_v49  ;;  %v7629_v48 = vcombine.high %v718_v37, %v726_v39  ;;  %v7631_v49 = vcombine.high %v719_v40, %v727_v41  ;;  %v8540_v52 = vpack.c.bf16 %v99_v44, %v93_v43  ;;  %v806_v37 = vld [vmem:[#allocation5 + $0x1540] sm:$0xff]  ;;  %v799_v39 = vld [vmem:[#allocation5 + $0x1508] sm:$0xff] }
  0xbb   :  { %4924 = vmatmul.mubr.bf16.vlgmr.msra.gmra.mrb[0].mxu0 %v8522_v53  ;;  %5143 = vmatmul.mubr.bf16.vlgmr.msra.gmra.mrb[0].mxu1 %v8522_v53 }
  0xbc   :  { %4965 = vmatpush1.bf16.msra.mxu0 %v7548_v57  ;;  %5184 = vmatpush1.bf16.msra.mxu1 %v7550_v59  ;;  %v92_v57 = vld [vmem:[#allocation2 + $0x130] sm:$0xff]  ;;  %v98_v59 = vld [vmem:[#allocation2 + $0x160] sm:$0xff] }
  0xbd   :  { %4966 = vmatprep.subr.bf16.mxu0 %v7565_v60  ;;  %5185 = vmatprep.subr.bf16.mxu1 %v7567_v62  ;;  %v7630_v60 = vcombine.low %v719_v40, %v727_v41  ;;  %v7645_v62 = vcombine.high %v734_v50, %v742_v51  ;;  %v8546_v5 = vpack.c.bf16 %v98_v59, %v92_v57  ;;  %v807_v40 = vld [vmem:[#allocation5 + $0x1548] sm:$0xff]  ;;  %v830_v57 = vld [vmem:[#allocation5 + $0x1600] sm:$0xff] }
  0xbe   :  { %4933 = vmatprep.mubr.bf16.mxu0 %v8524_v1  ;;  %5152 = vmatprep.mubr.bf16.mxu1 %v8524_v1  ;;  %v7692_v41 = vcombine.low %v782_v26, %v790_v28  ;;  %v838_v59 = vld [vmem:[#allocation5 + $0x1640] sm:$0xff] }
  0xc0   :  { %4967 = vmatpush1.bf16.msra.mxu0 %v7564_v4  ;;  %5186 = vmatpush1.bf16.msra.mxu1 %v7566_v8  ;;  %v759_v4 = vld [vmem:[#allocation5 + $0x13c8] sm:$0xff]  ;;  %v65_v8 = vld [vmem:[#allocation2 + $0x58] sm:$0xff] }
  0xc1   :  { %4968 = vmatprep.subr.bf16.mxu0 %v7581_v9  ;;  %5187 = vmatprep.subr.bf16.mxu1 %v7583_v10  ;;  %v7644_v9 = vcombine.low %v734_v50, %v742_v51  ;;  %v7646_v10 = vcombine.low %v735_v54, %v743_v55  ;;  %v7663_v12 = vcombine.high %v751_v3, %v759_v4  ;;  %v823_v50 = vld [vmem:[#allocation5 + $0x15c8] sm:$0xff] }
  0xc2   :  { %v8548_v17 = vpack.c.bf16 %v65_v8, %v59_v7  ;;  %v7710_v54 = vcombine.low %v799_v39, %v807_v40  ;;  %v854_v7 = vld [vmem:[#allocation5 + $0x16c0] sm:$0xff]  ;;  %v847_v8 = vld [vmem:[#allocation5 + $0x1688] sm:$0xff] }
  0xc3   :  { %4934 = vmatmul.mubr.bf16.gmra.mrb[4].mxu0 %v8530_v16  ;;  %5153 = vmatmul.mubr.bf16.gmra.mrb[4].mxu1 %v8530_v16 }
  0xc4   :  { %4969 = vmatpush1.bf16.msra.mxu0 %v7580_v19  ;;  %5188 = vmatpush1.bf16.msra.mxu1 %v7582_v21  ;;  %v775_v19 = vld [vmem:[#allocation5 + $0x1448] sm:$0xff]  ;;  %v7660_v21 = vcombine.low %v750_v0, %v758_v2  ;;  %v7741_v2 = vcombine.high %v830_v57, %v838_v59 }
  0xc5   :  { %4970 = vmatprep.subr.bf16.mxu0 %v7597_v22  ;;  %5189 = vmatprep.subr.bf16.mxu1 %v7599_v23  ;;  %v7662_v22 = vcombine.low %v751_v3, %v759_v4  ;;  %v7677_v23 = vcombine.high %v766_v13, %v774_v14  ;;  %v7679_v24 = vcombine.high %v767_v18, %v775_v19  ;;  %v846_v4 = vld [vmem:[#allocation5 + $0x1680] sm:$0xff] }
  0xc6   :  { %4943 = vmatprep.mubr.bf16.mxu0 %v8532_v27  ;;  %5162 = vmatprep.mubr.bf16.mxu1 %v8532_v27  ;;  %v7678_v33 = vcombine.low %v767_v18, %v775_v19  ;;  %v862_v14 = vld [vmem:[#allocation5 + $0x1700] sm:$0xff]  ;;  %v863_v19 = vld [vmem:[#allocation5 + $0x1708] sm:$0xff] }
  0xc7   :  { %v870_v18 = vld [vmem:[#allocation5 + $0x1740] sm:$0xff] }
  0xc8   :  { %4971 = vmatpush1.bf16.msra.mxu0 %v7596_v31  ;;  %5190 = vmatpush1.bf16.msra.mxu1 %v7598_v34  ;;  %v791_v31 = vld [vmem:[#allocation5 + $0x14c8] sm:$0xff]  ;;  %v7693_v34 = vcombine.high %v782_v26, %v790_v28  ;;  %v878_v28 = vld [vmem:[#allocation5 + $0x1780] sm:$0xff] }
  0xc9   :  { %4972 = vmatprep.subr.bf16.mxu0 %v7613_v35  ;;  %5191 = vmatprep.subr.bf16.mxu1 %v7615_v36  ;;  %v7695_v35 = vcombine.high %v783_v29, %v791_v31  ;;  %v798_v36 = vld [vmem:[#allocation5 + $0x1500] sm:$0xff]  ;;  %v7694_v43 = vcombine.low %v783_v29, %v791_v31  ;;  %v879_v31 = vld [vmem:[#allocation5 + $0x1788] sm:$0xff] }
  0xca   :  { %v7709_v44 = vcombine.high %v798_v36, %v806_v37  ;;  %v7708_v51 = vcombine.low %v798_v36, %v806_v37  ;;  %v886_v29 = vld [vmem:[#allocation5 + $0x17c0] sm:$0xff]  ;;  %v128_v37 = vld [vmem:[#allocation5 + $0x10] sm:$0xff] }
  0xcb   :  { %4944 = vmatmul.mubr.bf16.gmra.mrb[8].mxu0 %v8538_v42  ;;  %5163 = vmatmul.mubr.bf16.gmra.mrb[8].mxu1 %v8538_v42 }
  0xcc   :  { %4973 = vmatpush1.bf16.msra.mxu0 %v7612_v45  ;;  %5192 = vmatpush1.bf16.msra.mxu1 %v7614_v46  ;;  %v7711_v45 = vcombine.high %v799_v39, %v807_v40  ;;  %v814_v46 = vld [vmem:[#allocation5 + $0x1580] sm:$0xff]  ;;  %v136_v39 = vld [vmem:[#allocation5 + $0x50] sm:$0xff]  ;;  %v129_v40 = vld [vmem:[#allocation5 + $0x18] sm:$0xff] }
  0xcd   :  { %4974 = vmatprep.subr.bf16.mxu0 %v7629_v48  ;;  %5193 = vmatprep.subr.bf16.mxu1 %v7631_v49  ;;  %v822_v48 = vld [vmem:[#allocation5 + $0x15c0] sm:$0xff]  ;;  %v815_v49 = vld [vmem:[#allocation5 + $0x1588] sm:$0xff] }
  0xce   :  { %4953 = vmatprep.mubr.bf16.mxu0 %v8540_v52  ;;  %5172 = vmatprep.mubr.bf16.mxu1 %v8540_v52  ;;  %v7725_v55 = vcombine.high %v814_v46, %v822_v48  ;;  %v7726_v0 = vcombine.low %v815_v49, %v823_v50 }
  0xd0   :  { %4975 = vmatpush1.bf16.msra.mxu0 %v7628_v56  ;;  %5194 = vmatpush1.bf16.msra.mxu1 %v7630_v60  ;;  %v7727_v56 = vcombine.high %v815_v49, %v823_v50  ;;  %v831_v60 = vld [vmem:[#allocation5 + $0x1608] sm:$0xff]  ;;  %v144_v50 = vld [vmem:[#allocation5 + $0x90] sm:$0xff] }
  0xd1   :  { %4976 = vmatprep.subr.bf16.mxu0 %v7645_v62  ;;  %5195 = vmatprep.subr.bf16.mxu1 %v7647_v63  ;;  %v839_v62 = vld [vmem:[#allocation5 + $0x1648] sm:$0xff]  ;;  %v7724_v63 = vcombine.low %v814_v46, %v822_v48  ;;  %v7041_v48 = vcombine.high %v128_v37, %v136_v39 }
  0xd2   :  { %v7743_v3 = vcombine.high %v831_v60, %v839_v62 }
  0xd3   :  { %4954 = vmatmul.mubr.bf16.gmra.mrb[12].mxu0 %v8546_v5  ;;  %5173 = vmatmul.mubr.bf16.gmra.mrb[12].mxu1 %v8546_v5 }
  0xd4   :  { %4977 = vmatpush1.bf16.msra.mxu0 %v7644_v9  ;;  %5196 = vmatpush1.bf16.msra.mxu1 %v7646_v10  ;;  %v855_v9 = vld [vmem:[#allocation5 + $0x16c8] sm:$0xff]  ;;  %v7740_v10 = vcombine.low %v830_v57, %v838_v59  ;;  %v77_v59 = vld [vmem:[#allocation2 + $0xb8] sm:$0xff] }
  0xd5   :  { %4978 = vmatprep.subr.bf16.mxu0 %v7661_v11  ;;  %5197 = vmatprep.subr.bf16.mxu1 %v7663_v12  ;;  %v7742_v11 = vcombine.low %v831_v60, %v839_v62  ;;  %v7757_v12 = vcombine.high %v846_v4, %v854_v7  ;;  %v7759_v13 = vcombine.high %v847_v8, %v855_v9  ;;  %v71_v57 = vld [vmem:[#allocation2 + $0x88] sm:$0xff] }
  0xd6   :  { %4996 = vmatprep.mubr.bf16.mxu0 %v8548_v17  ;;  %5215 = vmatprep.mubr.bf16.mxu1 %v8548_v17  ;;  %v7040_v60 = vcombine.low %v128_v37, %v136_v39  ;;  %v201_v37 = vld [vmem:[#allocation5 + $0x258] sm:$0xff] }
  0xd8   :  { %4979 = vmatpush1.bf16.msra.mxu0 %v7660_v21  ;;  %5198 = vmatpush1.bf16.msra.mxu1 %v7662_v22  ;;  %v871_v21 = vld [vmem:[#allocation5 + $0x1748] sm:$0xff]  ;;  %v7756_v22 = vcombine.low %v846_v4, %v854_v7  ;;  %v168_v4 = vld [vmem:[#allocation5 + $0x150] sm:$0xff]  ;;  %v161_v7 = vld [vmem:[#allocation5 + $0x118] sm:$0xff] }
  0xd9   :  { %4980 = vmatprep.subr.bf16.mxu0 %v7677_v23  ;;  %5199 = vmatprep.subr.bf16.mxu1 %v7679_v24  ;;  %v7758_v23 = vcombine.low %v847_v8, %v855_v9  ;;  %v7773_v24 = vcombine.high %v862_v14, %v870_v18  ;;  %v7775_v26 = vcombine.high %v863_v19, %v871_v21  ;;  %v169_v8 = vld [vmem:[#allocation5 + $0x158] sm:$0xff] }
  0xdc   :  { %4981 = vmatpush1.bf16.msra.mxu0 %v7676_v32  ;;  %5200 = vmatpush1.bf16.msra.mxu1 %v7678_v33  ;;  %v887_v32 = vld [vmem:[#allocation5 + $0x17c8] sm:$0xff]  ;;  %v7772_v33 = vcombine.low %v862_v14, %v870_v18  ;;  %v7075_v14 = vcombine.high %v161_v7, %v169_v8  ;;  %v176_v18 = vld [vmem:[#allocation5 + $0x190] sm:$0xff] }
  0xdd   :  { %4982 = vmatprep.subr.bf16.mxu0 %v7693_v34  ;;  %5201 = vmatprep.subr.bf16.mxu1 %v7695_v35  ;;  %v7774_v34 = vcombine.low %v863_v19, %v871_v21  ;;  %v7789_v35 = vcombine.high %v878_v28, %v886_v29  ;;  %v7791_v36 = vcombine.high %v879_v31, %v887_v32  ;;  %v184_v19 = vld [vmem:[#allocation5 + $0x1d0] sm:$0xff]  ;;  %v177_v21 = vld [vmem:[#allocation5 + $0x198] sm:$0xff] }
  0xde   :  { %v7790_v46 = vcombine.low %v879_v31, %v887_v32  ;;  %v7089_v31 = vcombine.high %v176_v18, %v184_v19  ;;  %v7088_v39 = vcombine.low %v176_v18, %v184_v19  ;;  %v248_v18 = vld [vmem:[#allocation5 + $0x3d0] sm:$0xff] }
  0xe0   :  { %4983 = vmatpush1.bf16.msra.mxu0 %v7692_v41  ;;  %5202 = vmatpush1.bf16.msra.mxu1 %v7694_v43  ;;  %v137_v41 = vld [vmem:[#allocation5 + $0x58] sm:$0xff]  ;;  %v7788_v43 = vcombine.low %v878_v28, %v886_v29  ;;  %v7074_v29 = vcombine.low %v161_v7, %v169_v8 }
  0xe1   :  { %4984 = vmatprep.subr.bf16.mxu0 %v7709_v44  ;;  %5203 = vmatprep.subr.bf16.mxu1 %v7711_v45  ;;  %v58_v44 = vld [vmem:[#allocation2 + $0x20] sm:$0xff]  ;;  %v64_v45 = vld [vmem:[#allocation2 + $0x50] sm:$0xff]  ;;  %v7043_v49 = vcombine.high %v129_v40, %v137_v41  ;;  %v7042_v62 = vcombine.low %v129_v40, %v137_v41  ;;  %v233_v7 = vld [vmem:[#allocation5 + $0x358] sm:$0xff] }
  0xe2   :  { %v82_v40 = vld [vmem:[#allocation2 + $0xe0] sm:$0xff]  ;;  %v88_v41 = vld [vmem:[#allocation2 + $0x110] sm:$0xff] }
  0xe4   :  { %4985 = vmatpush1.bf16.msra.mxu0 %v7708_v51  ;;  %5204 = vmatpush1.bf16.msra.mxu1 %v7710_v54  ;;  %v152_v51 = vld [vmem:[#allocation5 + $0xd0] sm:$0xff]  ;;  %v145_v54 = vld [vmem:[#allocation5 + $0x98] sm:$0xff] }
  0xe5   :  { %4986 = vmatprep.subr.bf16.mxu0 %v7725_v55  ;;  %5205 = vmatprep.subr.bf16.mxu1 %v7727_v56  ;;  %v8554_v55 = vpack.c.bf16 %v64_v45, %v58_v44  ;;  %v153_v56 = vld [vmem:[#allocation5 + $0xd8] sm:$0xff]  ;;  %v7056_v9 = vcombine.low %v144_v50, %v152_v51 }
  0xe8   :  { %4987 = vmatpush1.bf16.msra.mxu0 %v7724_v63  ;;  %5206 = vmatpush1.bf16.msra.mxu1 %v7726_v0  ;;  %v7057_v63 = vcombine.high %v144_v50, %v152_v51  ;;  %v7059_v0 = vcombine.high %v145_v54, %v153_v56  ;;  %v8570_v50 = vpack.c.bf16 %v88_v41, %v82_v40  ;;  %v217_v51 = vld [vmem:[#allocation5 + $0x2d8] sm:$0xff]  ;;  %v272_v41 = vld [vmem:[#allocation5 + $0x490] sm:$0xff] }
  0xe9   :  { %4988 = vmatprep.subr.bf16.mxu0 %v7741_v2  ;;  %5207 = vmatprep.subr.bf16.mxu1 %v7743_v3  ;;  %v8556_v2 = vpack.c.bf16 %v77_v59, %v71_v57  ;;  %v160_v3 = vld [vmem:[#allocation5 + $0x110] sm:$0xff] }
  0xea   :  { %v7072_v28 = vcombine.low %v160_v3, %v168_v4 }
  0xec   :  { %4989 = vmatpush1.bf16.msra.mxu0 %v7740_v10  ;;  %5208 = vmatpush1.bf16.msra.mxu1 %v7742_v11  ;;  %v70_v10 = vld [vmem:[#allocation2 + $0x80] sm:$0xff]  ;;  %v76_v11 = vld [vmem:[#allocation2 + $0xb0] sm:$0xff] }
  0xed   :  { %4990 = vmatprep.subr.bf16.mxu0 %v7757_v12  ;;  %5209 = vmatprep.subr.bf16.mxu1 %v7759_v13  ;;  %v7058_v12 = vcombine.low %v145_v54, %v153_v56  ;;  %v7073_v13 = vcombine.high %v160_v3, %v168_v4  ;;  %v95_v54 = vld [vmem:[#allocation2 + $0x148] sm:$0xff]  ;;  %v101_v56 = vld [vmem:[#allocation2 + $0x178] sm:$0xff]  ;;  %v232_v3 = vld [vmem:[#allocation5 + $0x350] sm:$0xff] }
  0xee   :  { %v225_v4 = vld [vmem:[#allocation5 + $0x318] sm:$0xff] }
  0xf0   :  { %4991 = vmatpush1.bf16.msra.mxu0 %v7756_v22  ;;  %5210 = vmatpush1.bf16.msra.mxu1 %v7758_v23  ;;  %v8562_v22 = vpack.c.bf16 %v76_v11, %v70_v10  ;;  %v185_v23 = vld [vmem:[#allocation5 + $0x1d8] sm:$0xff]  ;;  %v100_v10 = vld [vmem:[#allocation2 + $0x170] sm:$0xff] }
  0xf1   :  { %4992 = vmatprep.subr.bf16.mxu0 %v7773_v24  ;;  %5211 = vmatprep.subr.bf16.mxu1 %v7775_v26  ;;  %v83_v24 = vld [vmem:[#allocation2 + $0xe8] sm:$0xff]  ;;  %v89_v26 = vld [vmem:[#allocation2 + $0x118] sm:$0xff]  ;;  %v7091_v32 = vcombine.high %v177_v21, %v185_v23 }
  0xf4   :  { %4993 = vmatpush1.bf16.msra.mxu0 %v7772_v33  ;;  %5212 = vmatpush1.bf16.msra.mxu1 %v7774_v34  ;;  %v8564_v33 = vpack.c.bf16 %v89_v26, %v83_v24  ;;  %v192_v34 = vld [vmem:[#allocation5 + $0x210] sm:$0xff]  ;;  %v7138_v26 = vcombine.low %v225_v4, %v233_v7 }
  0xf5   :  { %4994 = vmatprep.subr.bf16.mxu0 %v7789_v35  ;;  %5213 = vmatprep.subr.bf16.mxu1 %v7791_v36  ;;  %v200_v35 = vld [vmem:[#allocation5 + $0x250] sm:$0xff]  ;;  %v193_v36 = vld [vmem:[#allocation5 + $0x218] sm:$0xff] }
  0xf6   :  { %v7105_v44 = vcombine.high %v192_v34, %v200_v35  ;;  %v7107_v45 = vcombine.high %v193_v36, %v201_v37  ;;  %v7104_v57 = vcombine.low %v192_v34, %v200_v35  ;;  %v7106_v59 = vcombine.low %v193_v36, %v201_v37  ;;  %v257_v34 = vld [vmem:[#allocation5 + $0x418] sm:$0xff] }
  0xf7   :  { %v265_v35 = vld [vmem:[#allocation5 + $0x458] sm:$0xff] }
  0xf8   :  { %4995 = vmatpush1.bf16.msra.mxu0 %v7788_v43  ;;  %5214 = vmatpush1.bf16.msra.mxu1 %v7790_v46  ;;  %v7090_v43 = vcombine.low %v177_v21, %v185_v23  ;;  %v208_v46 = vld [vmem:[#allocation5 + $0x290] sm:$0xff]  ;;  %v241_v21 = vld [vmem:[#allocation5 + $0x398] sm:$0xff]  ;;  %v7171_v40 = vcombine.high %v257_v34, %v265_v35 }
  0xf9   :  { %5256 = vmatprep.subr.bf16.mxu0 %v7041_v48  ;;  %5475 = vmatprep.subr.bf16.mxu1 %v7043_v49  ;;  %v216_v48 = vld [vmem:[#allocation5 + $0x2d0] sm:$0xff]  ;;  %v209_v49 = vld [vmem:[#allocation5 + $0x298] sm:$0xff] }
  0xfa   :  { %v7120_v8 = vcombine.low %v208_v46, %v216_v48  ;;  %v7122_v11 = vcombine.low %v209_v49, %v217_v51  ;;  %v249_v23 = vld [vmem:[#allocation5 + $0x3d8] sm:$0xff] }
  0xfb   :  { %4997 = vmatmul.mubr.bf16.vlgmr.msra.gmra.mrb[0].mxu0 %v8554_v55  ;;  %5216 = vmatmul.mubr.bf16.vlgmr.msra.gmra.mrb[0].mxu1 %v8554_v55  ;;  %v7154_v37 = vcombine.low %v241_v21, %v249_v23 }
  0xfc   :  { %5257 = vmatpush1.bf16.msra.mxu0 %v7040_v60  ;;  %5476 = vmatpush1.bf16.msra.mxu1 %v7042_v62  ;;  %v7121_v60 = vcombine.high %v208_v46, %v216_v48  ;;  %v7123_v62 = vcombine.high %v209_v49, %v217_v51  ;;  %v7170_v48 = vcombine.low %v257_v34, %v265_v35  ;;  %v337_v34 = vld [vmem:[#allocation5 + $0x698] sm:$0xff] }
  0xfd   :  { %5258 = vmatprep.subr.bf16.mxu0 %v7057_v63  ;;  %5477 = vmatprep.subr.bf16.mxu1 %v7059_v0  ;;  %v8572_v63 = vpack.c.bf16 %v101_v56, %v95_v54  ;;  %v224_v0 = vld [vmem:[#allocation5 + $0x310] sm:$0xff]  ;;  %v345_v35 = vld [vmem:[#allocation5 + $0x6d8] sm:$0xff] }
  0xfe   :  { %5006 = vmatprep.mubr.bf16.mxu0 %v8556_v2  ;;  %5225 = vmatprep.mubr.bf16.mxu1 %v8556_v2  ;;  %v7136_v24 = vcombine.low %v224_v0, %v232_v3  ;;  %v288_v54 = vld [vmem:[#allocation5 + $0x510] sm:$0xff] }
  0xff   :  { %v296_v56 = vld [vmem:[#allocation5 + $0x550] sm:$0xff] }
 0x100   :  { %5259 = vmatpush1.bf16.msra.mxu0 %v7056_v9  ;;  %5478 = vmatpush1.bf16.msra.mxu1 %v7058_v12  ;;  %v94_v9 = vld [vmem:[#allocation2 + $0x140] sm:$0xff]  ;;  %v7137_v12 = vcombine.high %v224_v0, %v232_v3  ;;  %v7201_v0 = vcombine.high %v288_v54, %v296_v56 }
 0x101   :  { %5260 = vmatprep.subr.bf16.mxu0 %v7073_v13  ;;  %5479 = vmatprep.subr.bf16.mxu1 %v7075_v14  ;;  %v7139_v13 = vcombine.high %v225_v4, %v233_v7  ;;  %v240_v14 = vld [vmem:[#allocation5 + $0x390] sm:$0xff]  ;;  %v8578_v19 = vpack.c.bf16 %v100_v10, %v94_v9  ;;  %v313_v9 = vld [vmem:[#allocation5 + $0x5d8] sm:$0xff]  ;;  %v7200_v10 = vcombine.low %v288_v54, %v296_v56 }
 0x102   :  { %v7152_v36 = vcombine.low %v240_v14, %v248_v18  ;;  %v304_v4 = vld [vmem:[#allocation5 + $0x590] sm:$0xff] }
 0x103   :  { %5007 = vmatmul.mubr.bf16.gmra.mrb[4].mxu0 %v8562_v22  ;;  %5226 = vmatmul.mubr.bf16.gmra.mrb[4].mxu1 %v8562_v22  ;;  %v312_v7 = vld [vmem:[#allocation5 + $0x5d0] sm:$0xff] }
 0x104   :  { %5261 = vmatpush1.bf16.msra.mxu0 %v7072_v28  ;;  %5480 = vmatpush1.bf16.msra.mxu1 %v7074_v29  ;;  %v7153_v28 = vcombine.high %v240_v14, %v248_v18  ;;  %v7155_v29 = vcombine.high %v241_v21, %v249_v23  ;;  %v320_v14 = vld [vmem:[#allocation5 + $0x610] sm:$0xff]  ;;  %v321_v21 = vld [vmem:[#allocation5 + $0x618] sm:$0xff] }
 0x105   :  { %5262 = vmatprep.subr.bf16.mxu0 %v7089_v31  ;;  %5481 = vmatprep.subr.bf16.mxu1 %v7091_v32  ;;  %v256_v31 = vld [vmem:[#allocation5 + $0x410] sm:$0xff]  ;;  %v329_v23 = vld [vmem:[#allocation5 + $0x658] sm:$0xff] }
 0x106   :  { %5016 = vmatprep.mubr.bf16.mxu0 %v8564_v33  ;;  %5235 = vmatprep.mubr.bf16.mxu1 %v8564_v33  ;;  %v264_v32 = vld [vmem:[#allocation5 + $0x450] sm:$0xff] }
 0x107   :  { %v7168_v46 = vcombine.low %v256_v31, %v264_v32  ;;  %v328_v18 = vld [vmem:[#allocation5 + $0x650] sm:$0xff] }
 0x108   :  { %5263 = vmatpush1.bf16.msra.mxu0 %v7088_v39  ;;  %5482 = vmatpush1.bf16.msra.mxu1 %v7090_v43  ;;  %v7169_v39 = vcombine.high %v256_v31, %v264_v32  ;;  %v280_v43 = vld [vmem:[#allocation5 + $0x4d0] sm:$0xff] }
 0x109   :  { %5264 = vmatprep.subr.bf16.mxu0 %v7105_v44  ;;  %5483 = vmatprep.subr.bf16.mxu1 %v7107_v45  ;;  %v273_v44 = vld [vmem:[#allocation5 + $0x498] sm:$0xff]  ;;  %v7185_v49 = vcombine.high %v272_v41, %v280_v43  ;;  %v336_v31 = vld [vmem:[#allocation5 + $0x690] sm:$0xff] }
 0x10a   :  { %v281_v45 = vld [vmem:[#allocation5 + $0x4d8] sm:$0xff]  ;;  %v344_v32 = vld [vmem:[#allocation5 + $0x6d0] sm:$0xff] }
 0x10b   :  { %5017 = vmatmul.mubr.bf16.gmra.mrb[8].mxu0 %v8570_v50  ;;  %5236 = vmatmul.mubr.bf16.gmra.mrb[8].mxu1 %v8570_v50  ;;  %v7187_v51 = vcombine.high %v273_v44, %v281_v45  ;;  %v368_v54 = vld [vmem:[#allocation5 + $0x790] sm:$0xff] }
 0x10c   :  { %5265 = vmatpush1.bf16.msra.mxu0 %v7104_v57  ;;  %5484 = vmatpush1.bf16.msra.mxu1 %v7106_v59  ;;  %v289_v57 = vld [vmem:[#allocation5 + $0x518] sm:$0xff]  ;;  %v376_v56 = vld [vmem:[#allocation5 + $0x7d0] sm:$0xff] }
 0x10d   :  { %5266 = vmatprep.subr.bf16.mxu0 %v7121_v60  ;;  %5485 = vmatprep.subr.bf16.mxu1 %v7123_v62  ;;  %v297_v59 = vld [vmem:[#allocation5 + $0x558] sm:$0xff]  ;;  %v7184_v60 = vcombine.low %v272_v41, %v280_v43  ;;  %v7186_v62 = vcombine.low %v273_v44, %v281_v45  ;;  %v352_v41 = vld [vmem:[#allocation5 + $0x710] sm:$0xff] }
 0x10e   :  { %5026 = vmatprep.mubr.bf16.mxu0 %v8572_v63  ;;  %5245 = vmatprep.mubr.bf16.mxu1 %v8572_v63  ;;  %v7203_v3 = vcombine.high %v289_v57, %v297_v59  ;;  %v360_v43 = vld [vmem:[#allocation5 + $0x750] sm:$0xff]  ;;  %v353_v44 = vld [vmem:[#allocation5 + $0x718] sm:$0xff] }
 0x10f   :  { %v361_v45 = vld [vmem:[#allocation5 + $0x758] sm:$0xff] }
 0x110   :  { %5267 = vmatpush1.bf16.msra.mxu0 %v7120_v8  ;;  %5486 = vmatpush1.bf16.msra.mxu1 %v7122_v11  ;;  %v305_v8 = vld [vmem:[#allocation5 + $0x598] sm:$0xff]  ;;  %v7202_v11 = vcombine.low %v289_v57, %v297_v59 }
 0x111   :  { %5268 = vmatprep.subr.bf16.mxu0 %v7137_v12  ;;  %5487 = vmatprep.subr.bf16.mxu1 %v7139_v13  ;;  %v7217_v12 = vcombine.high %v304_v4, %v312_v7  ;;  %v7219_v13 = vcombine.high %v305_v8, %v313_v9  ;;  %v369_v57 = vld [vmem:[#allocation5 + $0x798] sm:$0xff] }
 0x112   :  { %v377_v59 = vld [vmem:[#allocation5 + $0x7d8] sm:$0xff] }
 0x113   :  { %5027 = vmatmul.mubr.bf16.gmra.mrb[12].mxu0 %v8578_v19  ;;  %5246 = vmatmul.mubr.bf16.gmra.mrb[12].mxu1 %v8578_v19 }
 0x114   :  { %5269 = vmatpush1.bf16.msra.mxu0 %v7136_v24  ;;  %5488 = vmatpush1.bf16.msra.mxu1 %v7138_v26  ;;  %v7216_v24 = vcombine.low %v304_v4, %v312_v7  ;;  %v7218_v26 = vcombine.low %v305_v8, %v313_v9  ;;  %v384_v4 = vld [vmem:[#allocation5 + $0x810] sm:$0xff]  ;;  %v385_v8 = vld [vmem:[#allocation5 + $0x818] sm:$0xff] }
 0x115   :  { %5270 = vmatprep.subr.bf16.mxu0 %v7153_v28  ;;  %5489 = vmatprep.subr.bf16.mxu1 %v7155_v29  ;;  %v7233_v28 = vcombine.high %v320_v14, %v328_v18  ;;  %v7235_v29 = vcombine.high %v321_v21, %v329_v23  ;;  %v392_v7 = vld [vmem:[#allocation5 + $0x850] sm:$0xff]  ;;  %v393_v9 = vld [vmem:[#allocation5 + $0x858] sm:$0xff] }
 0x116   :  { %5288 = vmatprep.mubr.bf16.mxu0 %v8486_v58  ;;  %5507 = vmatprep.mubr.bf16.mxu1 %v8486_v58 }
 0x118   :  { %5271 = vmatpush1.bf16.msra.mxu0 %v7152_v36  ;;  %5490 = vmatpush1.bf16.msra.mxu1 %v7154_v37  ;;  %v7232_v36 = vcombine.low %v320_v14, %v328_v18  ;;  %v7234_v37 = vcombine.low %v321_v21, %v329_v23  ;;  %v400_v14 = vld [vmem:[#allocation5 + $0x890] sm:$0xff]  ;;  %v401_v21 = vld [vmem:[#allocation5 + $0x898] sm:$0xff] }
 0x119   :  { %5272 = vmatprep.subr.bf16.mxu0 %v7169_v39  ;;  %5491 = vmatprep.subr.bf16.mxu1 %v7171_v40  ;;  %v7249_v39 = vcombine.high %v336_v31, %v344_v32  ;;  %v7251_v40 = vcombine.high %v337_v34, %v345_v35  ;;  %v408_v18 = vld [vmem:[#allocation5 + $0x8d0] sm:$0xff]  ;;  %v409_v23 = vld [vmem:[#allocation5 + $0x8d8] sm:$0xff] }
 0x11c   :  { %5273 = vmatpush1.bf16.msra.mxu0 %v7168_v46  ;;  %5492 = vmatpush1.bf16.msra.mxu1 %v7170_v48  ;;  %v7248_v46 = vcombine.low %v336_v31, %v344_v32  ;;  %v7250_v48 = vcombine.low %v337_v34, %v345_v35  ;;  %v416_v31 = vld [vmem:[#allocation5 + $0x910] sm:$0xff]  ;;  %v417_v34 = vld [vmem:[#allocation5 + $0x918] sm:$0xff] }
 0x11d   :  { %5274 = vmatprep.subr.bf16.mxu0 %v7185_v49  ;;  %5493 = vmatprep.subr.bf16.mxu1 %v7187_v51  ;;  %v7265_v49 = vcombine.high %v352_v41, %v360_v43  ;;  %v7267_v51 = vcombine.high %v353_v44, %v361_v45  ;;  %v424_v32 = vld [vmem:[#allocation5 + $0x950] sm:$0xff]  ;;  %v425_v35 = vld [vmem:[#allocation5 + $0x958] sm:$0xff] }
 0x120   :  { %5275 = vmatpush1.bf16.msra.mxu0 %v7184_v60  ;;  %5494 = vmatpush1.bf16.msra.mxu1 %v7186_v62  ;;  %v7264_v60 = vcombine.low %v352_v41, %v360_v43  ;;  %v7266_v62 = vcombine.low %v353_v44, %v361_v45  ;;  %v432_v41 = vld [vmem:[#allocation5 + $0x990] sm:$0xff]  ;;  %v433_v44 = vld [vmem:[#allocation5 + $0x998] sm:$0xff] }
 0x121   :  { %5276 = vmatprep.subr.bf16.mxu0 %v7201_v0  ;;  %5495 = vmatprep.subr.bf16.mxu1 %v7203_v3  ;;  %v7281_v0 = vcombine.high %v368_v54, %v376_v56  ;;  %v7283_v3 = vcombine.high %v369_v57, %v377_v59  ;;  %v440_v43 = vld [vmem:[#allocation5 + $0x9d0] sm:$0xff]  ;;  %v441_v45 = vld [vmem:[#allocation5 + $0x9d8] sm:$0xff] }
 0x124   :  { %5277 = vmatpush1.bf16.msra.mxu0 %v7200_v10  ;;  %5496 = vmatpush1.bf16.msra.mxu1 %v7202_v11  ;;  %v7280_v10 = vcombine.low %v368_v54, %v376_v56  ;;  %v7282_v11 = vcombine.low %v369_v57, %v377_v59  ;;  %v448_v54 = vld [vmem:[#allocation5 + $0xa10] sm:$0xff]  ;;  %v449_v57 = vld [vmem:[#allocation5 + $0xa18] sm:$0xff] }
 0x125   :  { %5278 = vmatprep.subr.bf16.mxu0 %v7217_v12  ;;  %5497 = vmatprep.subr.bf16.mxu1 %v7219_v13  ;;  %v7297_v12 = vcombine.high %v384_v4, %v392_v7  ;;  %v7299_v13 = vcombine.high %v385_v8, %v393_v9  ;;  %v456_v56 = vld [vmem:[#allocation5 + $0xa50] sm:$0xff]  ;;  %v457_v59 = vld [vmem:[#allocation5 + $0xa58] sm:$0xff] }
 0x128   :  { %5279 = vmatpush1.bf16.msra.mxu0 %v7216_v24  ;;  %5498 = vmatpush1.bf16.msra.mxu1 %v7218_v26  ;;  %v7296_v24 = vcombine.low %v384_v4, %v392_v7  ;;  %v7298_v26 = vcombine.low %v385_v8, %v393_v9  ;;  %v464_v4 = vld [vmem:[#allocation5 + $0xa90] sm:$0xff]  ;;  %v465_v8 = vld [vmem:[#allocation5 + $0xa98] sm:$0xff] }
 0x129   :  { %5280 = vmatprep.subr.bf16.mxu0 %v7233_v28  ;;  %5499 = vmatprep.subr.bf16.mxu1 %v7235_v29  ;;  %v7313_v28 = vcombine.high %v400_v14, %v408_v18  ;;  %v7315_v29 = vcombine.high %v401_v21, %v409_v23  ;;  %v472_v7 = vld [vmem:[#allocation5 + $0xad0] sm:$0xff]  ;;  %v473_v9 = vld [vmem:[#allocation5 + $0xad8] sm:$0xff] }
 0x12c   :  { %5281 = vmatpush1.bf16.msra.mxu0 %v7232_v36  ;;  %5500 = vmatpush1.bf16.msra.mxu1 %v7234_v37  ;;  %v7312_v36 = vcombine.low %v400_v14, %v408_v18  ;;  %v7314_v37 = vcombine.low %v401_v21, %v409_v23  ;;  %v480_v14 = vld [vmem:[#allocation5 + $0xb10] sm:$0xff]  ;;  %v481_v21 = vld [vmem:[#allocation5 + $0xb18] sm:$0xff] }
 0x12d   :  { %5282 = vmatprep.subr.bf16.mxu0 %v7249_v39  ;;  %5501 = vmatprep.subr.bf16.mxu1 %v7251_v40  ;;  %v7329_v39 = vcombine.high %v416_v31, %v424_v32  ;;  %v7331_v40 = vcombine.high %v417_v34, %v425_v35  ;;  %v488_v18 = vld [vmem:[#allocation5 + $0xb50] sm:$0xff]  ;;  %v489_v23 = vld [vmem:[#allocation5 + $0xb58] sm:$0xff] }
 0x130   :  { %5283 = vmatpush1.bf16.msra.mxu0 %v7248_v46  ;;  %5502 = vmatpush1.bf16.msra.mxu1 %v7250_v48  ;;  %v7328_v46 = vcombine.low %v416_v31, %v424_v32  ;;  %v7330_v48 = vcombine.low %v417_v34, %v425_v35  ;;  %v496_v31 = vld [vmem:[#allocation5 + $0xb90] sm:$0xff]  ;;  %v497_v34 = vld [vmem:[#allocation5 + $0xb98] sm:$0xff] }
 0x131   :  { %5284 = vmatprep.subr.bf16.mxu0 %v7265_v49  ;;  %5503 = vmatprep.subr.bf16.mxu1 %v7267_v51  ;;  %v7345_v49 = vcombine.high %v432_v41, %v440_v43  ;;  %v7347_v51 = vcombine.high %v433_v44, %v441_v45  ;;  %v504_v32 = vld [vmem:[#allocation5 + $0xbd0] sm:$0xff]  ;;  %v505_v35 = vld [vmem:[#allocation5 + $0xbd8] sm:$0xff] }
 0x134   :  { %5285 = vmatpush1.bf16.msra.mxu0 %v7264_v60  ;;  %5504 = vmatpush1.bf16.msra.mxu1 %v7266_v62  ;;  %v7344_v60 = vcombine.low %v432_v41, %v440_v43  ;;  %v7346_v62 = vcombine.low %v433_v44, %v441_v45  ;;  %v512_v41 = vld [vmem:[#allocation5 + $0xc10] sm:$0xff]  ;;  %v513_v44 = vld [vmem:[#allocation5 + $0xc18] sm:$0xff] }
 0x135   :  { %5286 = vmatprep.subr.bf16.mxu0 %v7281_v0  ;;  %5505 = vmatprep.subr.bf16.mxu1 %v7283_v3  ;;  %v7361_v0 = vcombine.high %v448_v54, %v456_v56  ;;  %v7363_v3 = vcombine.high %v449_v57, %v457_v59  ;;  %v520_v43 = vld [vmem:[#allocation5 + $0xc50] sm:$0xff]  ;;  %v521_v45 = vld [vmem:[#allocation5 + $0xc58] sm:$0xff] }
 0x138   :  { %5287 = vmatpush1.bf16.msra.mxu0 %v7280_v10  ;;  %5506 = vmatpush1.bf16.msra.mxu1 %v7282_v11  ;;  %v7360_v10 = vcombine.low %v448_v54, %v456_v56  ;;  %v7362_v11 = vcombine.low %v449_v57, %v457_v59  ;;  %v528_v54 = vld [vmem:[#allocation5 + $0xc90] sm:$0xff]  ;;  %v529_v57 = vld [vmem:[#allocation5 + $0xc98] sm:$0xff] }
 0x139   :  { %5329 = vmatprep.subr.bf16.mxu0 %v7297_v12  ;;  %5548 = vmatprep.subr.bf16.mxu1 %v7299_v13  ;;  %v7377_v12 = vcombine.high %v464_v4, %v472_v7  ;;  %v7379_v13 = vcombine.high %v465_v8, %v473_v9  ;;  %v536_v56 = vld [vmem:[#allocation5 + $0xcd0] sm:$0xff]  ;;  %v537_v59 = vld [vmem:[#allocation5 + $0xcd8] sm:$0xff] }
 0x13b   :  { %5289 = vmatmul.mubr.bf16.vlgmr.msra.gmra.mrb[16].mxu0 %v8490_v15  ;;  %5508 = vmatmul.mubr.bf16.vlgmr.msra.gmra.mrb[16].mxu1 %v8490_v15 }
 0x13c   :  { %5330 = vmatpush1.bf16.msra.mxu0 %v7296_v24  ;;  %5549 = vmatpush1.bf16.msra.mxu1 %v7298_v26  ;;  %v7376_v24 = vcombine.low %v464_v4, %v472_v7  ;;  %v7378_v26 = vcombine.low %v465_v8, %v473_v9  ;;  %v544_v4 = vld [vmem:[#allocation5 + $0xd10] sm:$0xff]  ;;  %v545_v8 = vld [vmem:[#allocation5 + $0xd18] sm:$0xff] }
 0x13d   :  { %5331 = vmatprep.subr.bf16.mxu0 %v7313_v28  ;;  %5550 = vmatprep.subr.bf16.mxu1 %v7315_v29  ;;  %v7393_v28 = vcombine.high %v480_v14, %v488_v18  ;;  %v7395_v29 = vcombine.high %v481_v21, %v489_v23  ;;  %v552_v7 = vld [vmem:[#allocation5 + $0xd50] sm:$0xff]  ;;  %v553_v9 = vld [vmem:[#allocation5 + $0xd58] sm:$0xff] }
 0x13e   :  { %5298 = vmatprep.mubr.bf16.mxu0 %v8492_v25  ;;  %5517 = vmatprep.mubr.bf16.mxu1 %v8492_v25 }
 0x140   :  { %5332 = vmatpush1.bf16.msra.mxu0 %v7312_v36  ;;  %5551 = vmatpush1.bf16.msra.mxu1 %v7314_v37  ;;  %v7392_v36 = vcombine.low %v480_v14, %v488_v18  ;;  %v7394_v37 = vcombine.low %v481_v21, %v489_v23  ;;  %v560_v14 = vld [vmem:[#allocation5 + $0xd90] sm:$0xff]  ;;  %v561_v21 = vld [vmem:[#allocation5 + $0xd98] sm:$0xff] }
 0x141   :  { %5333 = vmatprep.subr.bf16.mxu0 %v7329_v39  ;;  %5552 = vmatprep.subr.bf16.mxu1 %v7331_v40  ;;  %v7409_v39 = vcombine.high %v496_v31, %v504_v32  ;;  %v7411_v40 = vcombine.high %v497_v34, %v505_v35  ;;  %v568_v18 = vld [vmem:[#allocation5 + $0xdd0] sm:$0xff]  ;;  %v569_v23 = vld [vmem:[#allocation5 + $0xdd8] sm:$0xff] }
 0x143   :  { %5299 = vmatmul.mubr.bf16.gmra.mrb[20].mxu0 %v8498_v38  ;;  %5518 = vmatmul.mubr.bf16.gmra.mrb[20].mxu1 %v8498_v38 }
 0x144   :  { %5334 = vmatpush1.bf16.msra.mxu0 %v7328_v46  ;;  %5553 = vmatpush1.bf16.msra.mxu1 %v7330_v48  ;;  %v7408_v46 = vcombine.low %v496_v31, %v504_v32  ;;  %v7410_v48 = vcombine.low %v497_v34, %v505_v35  ;;  %v576_v31 = vld [vmem:[#allocation5 + $0xe10] sm:$0xff]  ;;  %v577_v34 = vld [vmem:[#allocation5 + $0xe18] sm:$0xff] }
 0x145   :  { %5335 = vmatprep.subr.bf16.mxu0 %v7345_v49  ;;  %5554 = vmatprep.subr.bf16.mxu1 %v7347_v51  ;;  %v7425_v49 = vcombine.high %v512_v41, %v520_v43  ;;  %v7427_v51 = vcombine.high %v513_v44, %v521_v45  ;;  %v584_v32 = vld [vmem:[#allocation5 + $0xe50] sm:$0xff]  ;;  %v585_v35 = vld [vmem:[#allocation5 + $0xe58] sm:$0xff] }
 0x146   :  { %5308 = vmatprep.mubr.bf16.mxu0 %v8500_v47  ;;  %5527 = vmatprep.mubr.bf16.mxu1 %v8500_v47 }
 0x148   :  { %5336 = vmatpush1.bf16.msra.mxu0 %v7344_v60  ;;  %5555 = vmatpush1.bf16.msra.mxu1 %v7346_v62  ;;  %v7424_v60 = vcombine.low %v512_v41, %v520_v43  ;;  %v7426_v62 = vcombine.low %v513_v44, %v521_v45  ;;  %v592_v41 = vld [vmem:[#allocation5 + $0xe90] sm:$0xff]  ;;  %v593_v44 = vld [vmem:[#allocation5 + $0xe98] sm:$0xff] }
 0x149   :  { %5337 = vmatprep.subr.bf16.mxu0 %v7361_v0  ;;  %5556 = vmatprep.subr.bf16.mxu1 %v7363_v3  ;;  %v7441_v0 = vcombine.high %v528_v54, %v536_v56  ;;  %v7443_v3 = vcombine.high %v529_v57, %v537_v59  ;;  %v600_v43 = vld [vmem:[#allocation5 + $0xed0] sm:$0xff]  ;;  %v601_v45 = vld [vmem:[#allocation5 + $0xed8] sm:$0xff] }
 0x14b   :  { %5309 = vmatmul.mubr.bf16.gmra.mrb[24].mxu0 %v8506_v61  ;;  %5528 = vmatmul.mubr.bf16.gmra.mrb[24].mxu1 %v8506_v61 }
 0x14c   :  { %5338 = vmatpush1.bf16.msra.mxu0 %v7360_v10  ;;  %5557 = vmatpush1.bf16.msra.mxu1 %v7362_v11  ;;  %v7440_v10 = vcombine.low %v528_v54, %v536_v56  ;;  %v7442_v11 = vcombine.low %v529_v57, %v537_v59  ;;  %v608_v54 = vld [vmem:[#allocation5 + $0xf10] sm:$0xff]  ;;  %v609_v57 = vld [vmem:[#allocation5 + $0xf18] sm:$0xff] }
 0x14d   :  { %5339 = vmatprep.subr.bf16.mxu0 %v7377_v12  ;;  %5558 = vmatprep.subr.bf16.mxu1 %v7379_v13  ;;  %v7457_v12 = vcombine.high %v544_v4, %v552_v7  ;;  %v7459_v13 = vcombine.high %v545_v8, %v553_v9  ;;  %v616_v56 = vld [vmem:[#allocation5 + $0xf50] sm:$0xff]  ;;  %v617_v59 = vld [vmem:[#allocation5 + $0xf58] sm:$0xff] }
 0x14e   :  { %5318 = vmatprep.mubr.bf16.mxu0 %v8508_v6  ;;  %5537 = vmatprep.mubr.bf16.mxu1 %v8508_v6 }
 0x150   :  { %5340 = vmatpush1.bf16.msra.mxu0 %v7376_v24  ;;  %5559 = vmatpush1.bf16.msra.mxu1 %v7378_v26  ;;  %v7456_v24 = vcombine.low %v544_v4, %v552_v7  ;;  %v7458_v26 = vcombine.low %v545_v8, %v553_v9  ;;  %v624_v4 = vld [vmem:[#allocation5 + $0xf90] sm:$0xff]  ;;  %v625_v8 = vld [vmem:[#allocation5 + $0xf98] sm:$0xff] }
 0x151   :  { %5341 = vmatprep.subr.bf16.mxu0 %v7393_v28  ;;  %5560 = vmatprep.subr.bf16.mxu1 %v7395_v29  ;;  %v7473_v28 = vcombine.high %v560_v14, %v568_v18  ;;  %v7475_v29 = vcombine.high %v561_v21, %v569_v23  ;;  %v632_v7 = vld [vmem:[#allocation5 + $0xfd0] sm:$0xff]  ;;  %v633_v9 = vld [vmem:[#allocation5 + $0xfd8] sm:$0xff] }
 0x153   :  { %5319 = vmatmul.mubr.bf16.gmra.mrb[28].mxu0 %v8514_v20  ;;  %5538 = vmatmul.mubr.bf16.gmra.mrb[28].mxu1 %v8514_v20 }
 0x154   :  { %5342 = vmatpush1.bf16.msra.mxu0 %v7392_v36  ;;  %5561 = vmatpush1.bf16.msra.mxu1 %v7394_v37  ;;  %v7472_v36 = vcombine.low %v560_v14, %v568_v18  ;;  %v7474_v37 = vcombine.low %v561_v21, %v569_v23  ;;  %v640_v14 = vld [vmem:[#allocation5 + $0x1010] sm:$0xff]  ;;  %v641_v21 = vld [vmem:[#allocation5 + $0x1018] sm:$0xff] }
 0x155   :  { %5343 = vmatprep.subr.bf16.mxu0 %v7409_v39  ;;  %5562 = vmatprep.subr.bf16.mxu1 %v7411_v40  ;;  %v7489_v39 = vcombine.high %v576_v31, %v584_v32  ;;  %v7491_v40 = vcombine.high %v577_v34, %v585_v35  ;;  %v648_v18 = vld [vmem:[#allocation5 + $0x1050] sm:$0xff]  ;;  %v649_v23 = vld [vmem:[#allocation5 + $0x1058] sm:$0xff] }
 0x156   :  { %5361 = vmatprep.mubr.bf16.mxu0 %v8516_v30  ;;  %5580 = vmatprep.mubr.bf16.mxu1 %v8516_v30 }
 0x158   :  { %5344 = vmatpush1.bf16.msra.mxu0 %v7408_v46  ;;  %5563 = vmatpush1.bf16.msra.mxu1 %v7410_v48  ;;  %v7488_v46 = vcombine.low %v576_v31, %v584_v32  ;;  %v7490_v48 = vcombine.low %v577_v34, %v585_v35  ;;  %v656_v31 = vld [vmem:[#allocation5 + $0x1090] sm:$0xff]  ;;  %v657_v34 = vld [vmem:[#allocation5 + $0x1098] sm:$0xff] }
 0x159   :  { %5345 = vmatprep.subr.bf16.mxu0 %v7425_v49  ;;  %5564 = vmatprep.subr.bf16.mxu1 %v7427_v51  ;;  %v7505_v49 = vcombine.high %v592_v41, %v600_v43  ;;  %v7507_v51 = vcombine.high %v593_v44, %v601_v45  ;;  %v664_v32 = vld [vmem:[#allocation5 + $0x10d0] sm:$0xff]  ;;  %v665_v35 = vld [vmem:[#allocation5 + $0x10d8] sm:$0xff] }
 0x15c   :  { %5346 = vmatpush1.bf16.msra.mxu0 %v7424_v60  ;;  %5565 = vmatpush1.bf16.msra.mxu1 %v7426_v62  ;;  %v7504_v60 = vcombine.low %v592_v41, %v600_v43  ;;  %v7506_v62 = vcombine.low %v593_v44, %v601_v45  ;;  %v672_v41 = vld [vmem:[#allocation5 + $0x1110] sm:$0xff]  ;;  %v673_v44 = vld [vmem:[#allocation5 + $0x1118] sm:$0xff] }
 0x15d   :  { %5347 = vmatprep.subr.bf16.mxu0 %v7441_v0  ;;  %5566 = vmatprep.subr.bf16.mxu1 %v7443_v3  ;;  %v7521_v0 = vcombine.high %v608_v54, %v616_v56  ;;  %v7523_v3 = vcombine.high %v609_v57, %v617_v59  ;;  %v680_v43 = vld [vmem:[#allocation5 + $0x1150] sm:$0xff]  ;;  %v681_v45 = vld [vmem:[#allocation5 + $0x1158] sm:$0xff] }
 0x160   :  { %5348 = vmatpush1.bf16.msra.mxu0 %v7440_v10  ;;  %5567 = vmatpush1.bf16.msra.mxu1 %v7442_v11  ;;  %v7520_v10 = vcombine.low %v608_v54, %v616_v56  ;;  %v7522_v11 = vcombine.low %v609_v57, %v617_v59  ;;  %v688_v54 = vld [vmem:[#allocation5 + $0x1190] sm:$0xff]  ;;  %v689_v57 = vld [vmem:[#allocation5 + $0x1198] sm:$0xff] }
 0x161   :  { %5349 = vmatprep.subr.bf16.mxu0 %v7457_v12  ;;  %5568 = vmatprep.subr.bf16.mxu1 %v7459_v13  ;;  %v7537_v12 = vcombine.high %v624_v4, %v632_v7  ;;  %v7539_v13 = vcombine.high %v625_v8, %v633_v9  ;;  %v696_v56 = vld [vmem:[#allocation5 + $0x11d0] sm:$0xff]  ;;  %v697_v59 = vld [vmem:[#allocation5 + $0x11d8] sm:$0xff] }
 0x164   :  { %5350 = vmatpush1.bf16.msra.mxu0 %v7456_v24  ;;  %5569 = vmatpush1.bf16.msra.mxu1 %v7458_v26  ;;  %v7536_v24 = vcombine.low %v624_v4, %v632_v7  ;;  %v7538_v26 = vcombine.low %v625_v8, %v633_v9  ;;  %v704_v4 = vld [vmem:[#allocation5 + $0x1210] sm:$0xff]  ;;  %v705_v8 = vld [vmem:[#allocation5 + $0x1218] sm:$0xff] }
 0x165   :  { %5351 = vmatprep.subr.bf16.mxu0 %v7473_v28  ;;  %5570 = vmatprep.subr.bf16.mxu1 %v7475_v29  ;;  %v7553_v28 = vcombine.high %v640_v14, %v648_v18  ;;  %v7555_v29 = vcombine.high %v641_v21, %v649_v23  ;;  %v712_v7 = vld [vmem:[#allocation5 + $0x1250] sm:$0xff]  ;;  %v713_v9 = vld [vmem:[#allocation5 + $0x1258] sm:$0xff] }
 0x168   :  { %5352 = vmatpush1.bf16.msra.mxu0 %v7472_v36  ;;  %5571 = vmatpush1.bf16.msra.mxu1 %v7474_v37  ;;  %v7552_v36 = vcombine.low %v640_v14, %v648_v18  ;;  %v7554_v37 = vcombine.low %v641_v21, %v649_v23  ;;  %v720_v14 = vld [vmem:[#allocation5 + $0x1290] sm:$0xff]  ;;  %v721_v21 = vld [vmem:[#allocation5 + $0x1298] sm:$0xff] }
 0x169   :  { %5353 = vmatprep.subr.bf16.mxu0 %v7489_v39  ;;  %5572 = vmatprep.subr.bf16.mxu1 %v7491_v40  ;;  %v7569_v39 = vcombine.high %v656_v31, %v664_v32  ;;  %v7571_v40 = vcombine.high %v657_v34, %v665_v35  ;;  %v728_v18 = vld [vmem:[#allocation5 + $0x12d0] sm:$0xff]  ;;  %v729_v23 = vld [vmem:[#allocation5 + $0x12d8] sm:$0xff] }
 0x16c   :  { %5354 = vmatpush1.bf16.msra.mxu0 %v7488_v46  ;;  %5573 = vmatpush1.bf16.msra.mxu1 %v7490_v48  ;;  %v7568_v46 = vcombine.low %v656_v31, %v664_v32  ;;  %v7570_v48 = vcombine.low %v657_v34, %v665_v35  ;;  %v736_v31 = vld [vmem:[#allocation5 + $0x1310] sm:$0xff]  ;;  %v737_v34 = vld [vmem:[#allocation5 + $0x1318] sm:$0xff] }
 0x16d   :  { %5355 = vmatprep.subr.bf16.mxu0 %v7505_v49  ;;  %5574 = vmatprep.subr.bf16.mxu1 %v7507_v51  ;;  %v7585_v49 = vcombine.high %v672_v41, %v680_v43  ;;  %v7587_v51 = vcombine.high %v673_v44, %v681_v45  ;;  %v744_v32 = vld [vmem:[#allocation5 + $0x1350] sm:$0xff]  ;;  %v745_v35 = vld [vmem:[#allocation5 + $0x1358] sm:$0xff] }
 0x170   :  { %5356 = vmatpush1.bf16.msra.mxu0 %v7504_v60  ;;  %5575 = vmatpush1.bf16.msra.mxu1 %v7506_v62  ;;  %v7584_v60 = vcombine.low %v672_v41, %v680_v43  ;;  %v7586_v62 = vcombine.low %v673_v44, %v681_v45  ;;  %v752_v41 = vld [vmem:[#allocation5 + $0x1390] sm:$0xff]  ;;  %v753_v44 = vld [vmem:[#allocation5 + $0x1398] sm:$0xff] }
 0x171   :  { %5357 = vmatprep.subr.bf16.mxu0 %v7521_v0  ;;  %5576 = vmatprep.subr.bf16.mxu1 %v7523_v3  ;;  %v7601_v0 = vcombine.high %v688_v54, %v696_v56  ;;  %v7603_v3 = vcombine.high %v689_v57, %v697_v59  ;;  %v760_v43 = vld [vmem:[#allocation5 + $0x13d0] sm:$0xff]  ;;  %v761_v45 = vld [vmem:[#allocation5 + $0x13d8] sm:$0xff] }
 0x174   :  { %5358 = vmatpush1.bf16.msra.mxu0 %v7520_v10  ;;  %5577 = vmatpush1.bf16.msra.mxu1 %v7522_v11  ;;  %v7600_v10 = vcombine.low %v688_v54, %v696_v56  ;;  %v7602_v11 = vcombine.low %v689_v57, %v697_v59  ;;  %v768_v54 = vld [vmem:[#allocation5 + $0x1410] sm:$0xff]  ;;  %v769_v57 = vld [vmem:[#allocation5 + $0x1418] sm:$0xff] }
 0x175   :  { %5359 = vmatprep.subr.bf16.mxu0 %v7537_v12  ;;  %5578 = vmatprep.subr.bf16.mxu1 %v7539_v13  ;;  %v7617_v12 = vcombine.high %v704_v4, %v712_v7  ;;  %v7619_v13 = vcombine.high %v705_v8, %v713_v9  ;;  %v776_v56 = vld [vmem:[#allocation5 + $0x1450] sm:$0xff]  ;;  %v777_v59 = vld [vmem:[#allocation5 + $0x1458] sm:$0xff] }
 0x178   :  { %5360 = vmatpush1.bf16.msra.mxu0 %v7536_v24  ;;  %5579 = vmatpush1.bf16.msra.mxu1 %v7538_v26  ;;  %v7616_v24 = vcombine.low %v704_v4, %v712_v7  ;;  %v7618_v26 = vcombine.low %v705_v8, %v713_v9  ;;  %v784_v4 = vld [vmem:[#allocation5 + $0x1490] sm:$0xff]  ;;  %v785_v8 = vld [vmem:[#allocation5 + $0x1498] sm:$0xff] }
 0x179   :  { %5402 = vmatprep.subr.bf16.mxu0 %v7553_v28  ;;  %5621 = vmatprep.subr.bf16.mxu1 %v7555_v29  ;;  %v7633_v28 = vcombine.high %v720_v14, %v728_v18  ;;  %v7635_v29 = vcombine.high %v721_v21, %v729_v23  ;;  %v792_v7 = vld [vmem:[#allocation5 + $0x14d0] sm:$0xff]  ;;  %v793_v9 = vld [vmem:[#allocation5 + $0x14d8] sm:$0xff] }
 0x17b   :  { %5362 = vmatmul.mubr.bf16.vlgmr.msra.gmra.mrb[16].mxu0 %v8522_v53  ;;  %5581 = vmatmul.mubr.bf16.vlgmr.msra.gmra.mrb[16].mxu1 %v8522_v53 }
 0x17c   :  { %5403 = vmatpush1.bf16.msra.mxu0 %v7552_v36  ;;  %5622 = vmatpush1.bf16.msra.mxu1 %v7554_v37  ;;  %v7632_v36 = vcombine.low %v720_v14, %v728_v18  ;;  %v7634_v37 = vcombine.low %v721_v21, %v729_v23  ;;  %v800_v14 = vld [vmem:[#allocation5 + $0x1510] sm:$0xff]  ;;  %v801_v21 = vld [vmem:[#allocation5 + $0x1518] sm:$0xff] }
 0x17d   :  { %5404 = vmatprep.subr.bf16.mxu0 %v7569_v39  ;;  %5623 = vmatprep.subr.bf16.mxu1 %v7571_v40  ;;  %v7649_v39 = vcombine.high %v736_v31, %v744_v32  ;;  %v7651_v40 = vcombine.high %v737_v34, %v745_v35  ;;  %v808_v18 = vld [vmem:[#allocation5 + $0x1550] sm:$0xff]  ;;  %v809_v23 = vld [vmem:[#allocation5 + $0x1558] sm:$0xff] }
 0x17e   :  { %5371 = vmatprep.mubr.bf16.mxu0 %v8524_v1  ;;  %5590 = vmatprep.mubr.bf16.mxu1 %v8524_v1 }
 0x180   :  { %5405 = vmatpush1.bf16.msra.mxu0 %v7568_v46  ;;  %5624 = vmatpush1.bf16.msra.mxu1 %v7570_v48  ;;  %v7648_v46 = vcombine.low %v736_v31, %v744_v32  ;;  %v7650_v48 = vcombine.low %v737_v34, %v745_v35  ;;  %v816_v31 = vld [vmem:[#allocation5 + $0x1590] sm:$0xff]  ;;  %v817_v34 = vld [vmem:[#allocation5 + $0x1598] sm:$0xff] }
 0x181   :  { %5406 = vmatprep.subr.bf16.mxu0 %v7585_v49  ;;  %5625 = vmatprep.subr.bf16.mxu1 %v7587_v51  ;;  %v7665_v49 = vcombine.high %v752_v41, %v760_v43  ;;  %v7667_v51 = vcombine.high %v753_v44, %v761_v45  ;;  %v824_v32 = vld [vmem:[#allocation5 + $0x15d0] sm:$0xff]  ;;  %v825_v35 = vld [vmem:[#allocation5 + $0x15d8] sm:$0xff] }
 0x183   :  { %5372 = vmatmul.mubr.bf16.gmra.mrb[20].mxu0 %v8530_v16  ;;  %5591 = vmatmul.mubr.bf16.gmra.mrb[20].mxu1 %v8530_v16 }
 0x184   :  { %5407 = vmatpush1.bf16.msra.mxu0 %v7584_v60  ;;  %5626 = vmatpush1.bf16.msra.mxu1 %v7586_v62  ;;  %v7664_v60 = vcombine.low %v752_v41, %v760_v43  ;;  %v7666_v62 = vcombine.low %v753_v44, %v761_v45  ;;  %v832_v41 = vld [vmem:[#allocation5 + $0x1610] sm:$0xff]  ;;  %v833_v44 = vld [vmem:[#allocation5 + $0x1618] sm:$0xff] }
 0x185   :  { %5408 = vmatprep.subr.bf16.mxu0 %v7601_v0  ;;  %5627 = vmatprep.subr.bf16.mxu1 %v7603_v3  ;;  %v7681_v0 = vcombine.high %v768_v54, %v776_v56  ;;  %v7683_v3 = vcombine.high %v769_v57, %v777_v59  ;;  %v840_v43 = vld [vmem:[#allocation5 + $0x1650] sm:$0xff]  ;;  %v841_v45 = vld [vmem:[#allocation5 + $0x1658] sm:$0xff] }
 0x186   :  { %5381 = vmatprep.mubr.bf16.mxu0 %v8532_v27  ;;  %5600 = vmatprep.mubr.bf16.mxu1 %v8532_v27 }
 0x188   :  { %5409 = vmatpush1.bf16.msra.mxu0 %v7600_v10  ;;  %5628 = vmatpush1.bf16.msra.mxu1 %v7602_v11  ;;  %v7680_v10 = vcombine.low %v768_v54, %v776_v56  ;;  %v7682_v11 = vcombine.low %v769_v57, %v777_v59  ;;  %v848_v54 = vld [vmem:[#allocation5 + $0x1690] sm:$0xff]  ;;  %v849_v57 = vld [vmem:[#allocation5 + $0x1698] sm:$0xff] }
 0x189   :  { %5410 = vmatprep.subr.bf16.mxu0 %v7617_v12  ;;  %5629 = vmatprep.subr.bf16.mxu1 %v7619_v13  ;;  %v7697_v12 = vcombine.high %v784_v4, %v792_v7  ;;  %v7699_v13 = vcombine.high %v785_v8, %v793_v9  ;;  %v856_v56 = vld [vmem:[#allocation5 + $0x16d0] sm:$0xff]  ;;  %v857_v59 = vld [vmem:[#allocation5 + $0x16d8] sm:$0xff] }
 0x18b   :  { %5382 = vmatmul.mubr.bf16.gmra.mrb[24].mxu0 %v8538_v42  ;;  %5601 = vmatmul.mubr.bf16.gmra.mrb[24].mxu1 %v8538_v42 }
 0x18c   :  { %5411 = vmatpush1.bf16.msra.mxu0 %v7616_v24  ;;  %5630 = vmatpush1.bf16.msra.mxu1 %v7618_v26  ;;  %v7696_v24 = vcombine.low %v784_v4, %v792_v7  ;;  %v7698_v26 = vcombine.low %v785_v8, %v793_v9  ;;  %v864_v4 = vld [vmem:[#allocation5 + $0x1710] sm:$0xff]  ;;  %v865_v8 = vld [vmem:[#allocation5 + $0x1718] sm:$0xff] }
 0x18d   :  { %5412 = vmatprep.subr.bf16.mxu0 %v7633_v28  ;;  %5631 = vmatprep.subr.bf16.mxu1 %v7635_v29  ;;  %v7713_v28 = vcombine.high %v800_v14, %v808_v18  ;;  %v7715_v29 = vcombine.high %v801_v21, %v809_v23  ;;  %v872_v7 = vld [vmem:[#allocation5 + $0x1750] sm:$0xff]  ;;  %v873_v9 = vld [vmem:[#allocation5 + $0x1758] sm:$0xff] }
 0x18e   :  { %5391 = vmatprep.mubr.bf16.mxu0 %v8540_v52  ;;  %5610 = vmatprep.mubr.bf16.mxu1 %v8540_v52 }
 0x190   :  { %5413 = vmatpush1.bf16.msra.mxu0 %v7632_v36  ;;  %5632 = vmatpush1.bf16.msra.mxu1 %v7634_v37  ;;  %v7712_v36 = vcombine.low %v800_v14, %v808_v18  ;;  %v7714_v37 = vcombine.low %v801_v21, %v809_v23  ;;  %v880_v14 = vld [vmem:[#allocation5 + $0x1790] sm:$0xff]  ;;  %v881_v21 = vld [vmem:[#allocation5 + $0x1798] sm:$0xff] }
 0x191   :  { %5414 = vmatprep.subr.bf16.mxu0 %v7649_v39  ;;  %5633 = vmatprep.subr.bf16.mxu1 %v7651_v40  ;;  %v7729_v39 = vcombine.high %v816_v31, %v824_v32  ;;  %v7731_v40 = vcombine.high %v817_v34, %v825_v35  ;;  %v888_v18 = vld [vmem:[#allocation5 + $0x17d0] sm:$0xff]  ;;  %v889_v23 = vld [vmem:[#allocation5 + $0x17d8] sm:$0xff] }
 0x193   :  { %5392 = vmatmul.mubr.bf16.gmra.mrb[28].mxu0 %v8546_v5  ;;  %5611 = vmatmul.mubr.bf16.gmra.mrb[28].mxu1 %v8546_v5 }
 0x194   :  { %5415 = vmatpush1.bf16.msra.mxu0 %v7648_v46  ;;  %5634 = vmatpush1.bf16.msra.mxu1 %v7650_v48  ;;  %v7728_v46 = vcombine.low %v816_v31, %v824_v32  ;;  %v7730_v48 = vcombine.low %v817_v34, %v825_v35  ;;  %v130_v31 = vld [vmem:[#allocation5 + $0x20] sm:$0xff]  ;;  %v131_v34 = vld [vmem:[#allocation5 + $0x28] sm:$0xff] }
 0x195   :  { %5416 = vmatprep.subr.bf16.mxu0 %v7665_v49  ;;  %5635 = vmatprep.subr.bf16.mxu1 %v7667_v51  ;;  %v7745_v49 = vcombine.high %v832_v41, %v840_v43  ;;  %v7747_v51 = vcombine.high %v833_v44, %v841_v45  ;;  %v138_v32 = vld [vmem:[#allocation5 + $0x60] sm:$0xff]  ;;  %v139_v35 = vld [vmem:[#allocation5 + $0x68] sm:$0xff] }
 0x196   :  { %5434 = vmatprep.mubr.bf16.mxu0 %v8548_v17  ;;  %5653 = vmatprep.mubr.bf16.mxu1 %v8548_v17 }
 0x198   :  { %5417 = vmatpush1.bf16.msra.mxu0 %v7664_v60  ;;  %5636 = vmatpush1.bf16.msra.mxu1 %v7666_v62  ;;  %v7744_v60 = vcombine.low %v832_v41, %v840_v43  ;;  %v7746_v62 = vcombine.low %v833_v44, %v841_v45  ;;  %v146_v41 = vld [vmem:[#allocation5 + $0xa0] sm:$0xff]  ;;  %v147_v44 = vld [vmem:[#allocation5 + $0xa8] sm:$0xff] }
 0x199   :  { %5418 = vmatprep.subr.bf16.mxu0 %v7681_v0  ;;  %5637 = vmatprep.subr.bf16.mxu1 %v7683_v3  ;;  %v7761_v0 = vcombine.high %v848_v54, %v856_v56  ;;  %v7763_v3 = vcombine.high %v849_v57, %v857_v59  ;;  %v154_v43 = vld [vmem:[#allocation5 + $0xe0] sm:$0xff]  ;;  %v155_v45 = vld [vmem:[#allocation5 + $0xe8] sm:$0xff] }
 0x19c   :  { %5419 = vmatpush1.bf16.msra.mxu0 %v7680_v10  ;;  %5638 = vmatpush1.bf16.msra.mxu1 %v7682_v11  ;;  %v7760_v10 = vcombine.low %v848_v54, %v856_v56  ;;  %v7762_v11 = vcombine.low %v849_v57, %v857_v59  ;;  %v162_v54 = vld [vmem:[#allocation5 + $0x120] sm:$0xff]  ;;  %v163_v57 = vld [vmem:[#allocation5 + $0x128] sm:$0xff] }
 0x19d   :  { %5420 = vmatprep.subr.bf16.mxu0 %v7697_v12  ;;  %5639 = vmatprep.subr.bf16.mxu1 %v7699_v13  ;;  %v7777_v12 = vcombine.high %v864_v4, %v872_v7  ;;  %v7779_v13 = vcombine.high %v865_v8, %v873_v9  ;;  %v170_v56 = vld [vmem:[#allocation5 + $0x160] sm:$0xff]  ;;  %v171_v59 = vld [vmem:[#allocation5 + $0x168] sm:$0xff] }
 0x1a0   :  { %5421 = vmatpush1.bf16.msra.mxu0 %v7696_v24  ;;  %5640 = vmatpush1.bf16.msra.mxu1 %v7698_v26  ;;  %v7776_v24 = vcombine.low %v864_v4, %v872_v7  ;;  %v7778_v26 = vcombine.low %v865_v8, %v873_v9  ;;  %v178_v4 = vld [vmem:[#allocation5 + $0x1a0] sm:$0xff]  ;;  %v179_v8 = vld [vmem:[#allocation5 + $0x1a8] sm:$0xff] }
 0x1a1   :  { %5422 = vmatprep.subr.bf16.mxu0 %v7713_v28  ;;  %5641 = vmatprep.subr.bf16.mxu1 %v7715_v29  ;;  %v7793_v28 = vcombine.high %v880_v14, %v888_v18  ;;  %v7795_v29 = vcombine.high %v881_v21, %v889_v23  ;;  %v186_v7 = vld [vmem:[#allocation5 + $0x1e0] sm:$0xff]  ;;  %v187_v9 = vld [vmem:[#allocation5 + $0x1e8] sm:$0xff] }
 0x1a4   :  { %5423 = vmatpush1.bf16.msra.mxu0 %v7712_v36  ;;  %5642 = vmatpush1.bf16.msra.mxu1 %v7714_v37  ;;  %v7792_v36 = vcombine.low %v880_v14, %v888_v18  ;;  %v7794_v37 = vcombine.low %v881_v21, %v889_v23  ;;  %v7095_v14 = vcombine.high %v179_v8, %v187_v9  ;;  %v194_v18 = vld [vmem:[#allocation5 + $0x220] sm:$0xff]  ;;  %v195_v23 = vld [vmem:[#allocation5 + $0x228] sm:$0xff] }
 0x1a5   :  { %5424 = vmatprep.subr.bf16.mxu0 %v7729_v39  ;;  %5643 = vmatprep.subr.bf16.mxu1 %v7731_v40  ;;  %v7045_v39 = vcombine.high %v130_v31, %v138_v32  ;;  %v7047_v40 = vcombine.high %v131_v34, %v139_v35  ;;  %v202_v21 = vld [vmem:[#allocation5 + $0x260] sm:$0xff] }
 0x1a8   :  { %5425 = vmatpush1.bf16.msra.mxu0 %v7728_v46  ;;  %5644 = vmatpush1.bf16.msra.mxu1 %v7730_v48  ;;  %v7044_v46 = vcombine.low %v130_v31, %v138_v32  ;;  %v7046_v48 = vcombine.low %v131_v34, %v139_v35  ;;  %v7109_v31 = vcombine.high %v194_v18, %v202_v21  ;;  %v210_v34 = vld [vmem:[#allocation5 + $0x2a0] sm:$0xff] }
 0x1a9   :  { %5426 = vmatprep.subr.bf16.mxu0 %v7745_v49  ;;  %5645 = vmatprep.subr.bf16.mxu1 %v7747_v51  ;;  %v7061_v49 = vcombine.high %v146_v41, %v154_v43  ;;  %v7063_v51 = vcombine.high %v147_v44, %v155_v45  ;;  %v218_v35 = vld [vmem:[#allocation5 + $0x2e0] sm:$0xff] }
 0x1ac   :  { %5427 = vmatpush1.bf16.msra.mxu0 %v7744_v60  ;;  %5646 = vmatpush1.bf16.msra.mxu1 %v7746_v62  ;;  %v7060_v60 = vcombine.low %v146_v41, %v154_v43  ;;  %v7062_v62 = vcombine.low %v147_v44, %v155_v45  ;;  %v894_v41 = vld [vmem:[#allocation7] sm:$0xff] }
 0x1ad   :  { %5428 = vmatprep.subr.bf16.mxu0 %v7761_v0  ;;  %5647 = vmatprep.subr.bf16.mxu1 %v7763_v3  ;;  %v7077_v0 = vcombine.high %v162_v54, %v170_v56  ;;  %v7079_v3 = vcombine.high %v163_v57, %v171_v59 }
 0x1b0   :  { %5429 = vmatpush1.bf16.msra.mxu0 %v7760_v10  ;;  %5648 = vmatpush1.bf16.msra.mxu1 %v7762_v11  ;;  %v898_v10 = vlaneseq  ;;  %v7076_v11 = vcombine.low %v162_v54, %v170_v56  ;;  %v234_v54 = vld [vmem:[#allocation5 + $0x360] sm:$0xff] }
 0x1b1   :  { %5430 = vmatprep.subr.bf16.mxu0 %v7777_v12  ;;  %5649 = vmatprep.subr.bf16.mxu1 %v7779_v13  ;;  %v7078_v12 = vcombine.low %v163_v57, %v171_v59  ;;  %v7093_v13 = vcombine.high %v178_v4, %v186_v7  ;;  %v227_v57 = vld [vmem:[#allocation5 + $0x328] sm:$0xff] }
 0x1b2   :  { %v235_v59 = vld [vmem:[#allocation5 + $0x368] sm:$0xff] }
 0x1b4   :  { %5431 = vmatpush1.bf16.msra.mxu0 %v7776_v24  ;;  %5650 = vmatpush1.bf16.msra.mxu1 %v7778_v26  ;;  %v203_v24 = vld [vmem:[#allocation5 + $0x268] sm:$0xff]  ;;  %v8621_v26 = vshrl.u32 %v898_v10, 7  ;;  %v8649_v10 = vld [vmem:[#allocation5 + $0x3a0] sm:$0xff] }
 0x1b5   :  { %5432 = vmatprep.subr.bf16.mxu0 %v7793_v28  ;;  %5651 = vmatprep.subr.bf16.mxu1 %v7795_v29  ;;  %v7092_v28 = vcombine.low %v178_v4, %v186_v7  ;;  %v7094_v29 = vcombine.low %v179_v8, %v187_v9  ;;  %v7111_v32 = vcombine.high %v195_v23, %v203_v24 }
 0x1b6   :  { %v908_v43 = vsub.s32 2, %v8621_v26  ;;  %v904_v44 = vsub.s32 1, %v8621_v26  ;;  %v7110_v45 = vcombine.low %v195_v23, %v203_v24  ;;  %v7143_v9 = vcombine.high %v227_v57, %v235_v59 }
 0x1b8   :  { %5433 = vmatpush1.bf16.msra.mxu0 %v7792_v36  ;;  %5652 = vmatpush1.bf16.msra.mxu1 %v7794_v37  ;;  %v900_v36 = vsub.s32 0, %v8621_v26  ;;  %v211_v37 = vld [vmem:[#allocation5 + $0x2a8] sm:$0xff] }
 0x1b9   :  { %5694 = vmatprep.subr.bf16.mxu0 %v7045_v39  ;;  %5913 = vmatprep.subr.bf16.mxu1 %v7047_v40  ;;  %v219_v39 = vld [vmem:[#allocation5 + $0x2e8] sm:$0xff]  ;;  %v7108_v40 = vcombine.low %v194_v18, %v202_v21 }
 0x1ba   :  { %v8633_v56 = vrot.slane %v894_v41, %v900_v36  ;;  %v7126_v4 = vcombine.low %v211_v37, %v219_v39  ;;  %v8655_v18 = vld [vmem:[#allocation5 + $0x3a8] sm:$0xff] }
 0x1bb   :  { %5435 = vmatmul.mubr.bf16.vlgmr.msra.gmra.mrb[16].mxu0 %v8554_v55  ;;  %5654 = vmatmul.mubr.bf16.vlgmr.msra.gmra.mrb[16].mxu1 %v8554_v55  ;;  %v8657_v21 = vld [vmem:[#allocation5 + $0x3e8] sm:$0xff] }
 0x1bc   :  { %5695 = vmatpush1.bf16.msra.mxu0 %v7044_v46  ;;  %5914 = vmatpush1.bf16.msra.mxu1 %v7046_v48  ;;  %v912_v46 = vsub.s32 3, %v8621_v26  ;;  %v7125_v48 = vcombine.high %v210_v34, %v218_v35 }
 0x1bd   :  { %5696 = vmatprep.subr.bf16.mxu0 %v7061_v49  ;;  %5915 = vmatprep.subr.bf16.mxu1 %v7063_v51  ;;  %v7127_v49 = vcombine.high %v211_v37, %v219_v39  ;;  %v226_v51 = vld [vmem:[#allocation5 + $0x320] sm:$0xff] }
 0x1be   :  { %5444 = vmatprep.mubr.bf16.mxu0 %v8556_v2  ;;  %5663 = vmatprep.mubr.bf16.mxu1 %v8556_v2  ;;  %v7141_v7 = vcombine.high %v226_v51, %v234_v54 }
 0x1c0   :  { %5697 = vmatpush1.bf16.msra.mxu0 %v7060_v60  ;;  %5916 = vmatpush1.bf16.msra.mxu1 %v7062_v62  ;;  %v8638_v60 = vrot.slane %v894_v41, %v908_v43  ;;  %v8642_v62 = vrot.slane %v894_v41, %v904_v44 }
 0x1c1   :  { %5698 = vmatprep.subr.bf16.mxu0 %v7077_v0  ;;  %5917 = vmatprep.subr.bf16.mxu1 %v7079_v3  ;;  %v7124_v0 = vcombine.low %v210_v34, %v218_v35  ;;  %v8646_v3 = vrot.slane %v894_v41, %v912_v46 }
 0x1c3   :  { %5445 = vmatmul.mubr.bf16.gmra.mrb[20].mxu0 %v8562_v22  ;;  %5664 = vmatmul.mubr.bf16.gmra.mrb[20].mxu1 %v8562_v22 }
 0x1c4   :  { %5699 = vmatpush1.bf16.msra.mxu0 %v7076_v11  ;;  %5918 = vmatpush1.bf16.msra.mxu1 %v7078_v12  ;;  %v8651_v11 = vld [vmem:[#allocation5 + $0x3e0] sm:$0xff] }
 0x1c5   :  { %5700 = vmatprep.subr.bf16.mxu0 %v7093_v13  ;;  %5919 = vmatprep.subr.bf16.mxu1 %v7095_v14 }
 0x1c6   :  { %5454 = vmatprep.mubr.bf16.mxu0 %v8564_v33  ;;  %5673 = vmatprep.mubr.bf16.mxu1 %v8564_v33 }
 0x1c8   :  { %5701 = vmatpush1.bf16.msra.mxu0 %v7092_v28  ;;  %5920 = vmatpush1.bf16.msra.mxu1 %v7094_v29 }
 0x1c9   :  { %5702 = vmatprep.subr.bf16.mxu0 %v7109_v31  ;;  %5921 = vmatprep.subr.bf16.mxu1 %v7111_v32  ;;  %v7140_v31 = vcombine.low %v226_v51, %v234_v54  ;;  %v7142_v32 = vcombine.low %v227_v57, %v235_v59  ;;  %v7159_v51 = vcombine.high %v8655_v18, %v8657_v21  ;;  %v258_v54 = vld [vmem:[#allocation5 + $0x420] sm:$0xff] }
 0x1ca   :  { %v266_v57 = vld [vmem:[#allocation5 + $0x460] sm:$0xff] }
 0x1cb   :  { %5455 = vmatmul.mubr.bf16.gmra.mrb[24].mxu0 %v8570_v50  ;;  %5674 = vmatmul.mubr.bf16.gmra.mrb[24].mxu1 %v8570_v50 }
 0x1cc   :  { %5703 = vmatpush1.bf16.msra.mxu0 %v7108_v40  ;;  %5922 = vmatpush1.bf16.msra.mxu1 %v7110_v45  ;;  %v7157_v40 = vcombine.high %v8649_v10, %v8651_v11 }
 0x1cd   :  { %5704 = vmatprep.subr.bf16.mxu0 %v7125_v48  ;;  %5923 = vmatprep.subr.bf16.mxu1 %v7127_v49 }
 0x1ce   :  { %v4998_v8 = vpop.f32.mrb[0].mxu0  ;;  %5464 = vmatprep.mubr.bf16.mxu0 %v8572_v63  ;;  %v5217_v13 = vpop.f32.mrb[0].mxu1  ;;  %5683 = vmatprep.mubr.bf16.mxu1 %v8572_v63 }
 0x1cf   :  { %v7932_v12 = vadd.f32 %v4998_v8, %v8633_v56  ;;  %v5000_v14 = vpop.f32.mrb[1].mxu0  ;;  %v7948_v23 = vadd.f32 %v5217_v13, %v8638_v60  ;;  %v5219_v28 = vpop.f32.mrb[1].mxu1  ;;  %v7158_v13 = vcombine.low %v8655_v18, %v8657_v21 }
 0x1d0   :  { %v7933_v24 = vadd.f32 %v5000_v14, %v8642_v62  ;;  %v5002_v29 = vpop.f32.mrb[2].mxu0  ;;  %5705 = vmatpush1.bf16.msra.mxu0 %v7124_v0  ;;  %v7949_v34 = vadd.f32 %v5219_v28, %v8646_v3  ;;  %v5221_v37 = vpop.f32.mrb[2].mxu1  ;;  %5924 = vmatpush1.bf16.msra.mxu1 %v7126_v4  ;;  %v259_v4 = vld [vmem:[#allocation5 + $0x428] sm:$0xff]  ;;  %v7173_v14 = vcombine.high %v258_v54, %v266_v57  ;;  %v274_v28 = vld [vmem:[#allocation5 + $0x4a0] sm:$0xff] }
 0x1d1   :  { %v7934_v35 = vadd.f32 %v5002_v29, %v8633_v56  ;;  %v5004_v39 = vpop.f32.mrb[3].mxu0  ;;  %5706 = vmatprep.subr.bf16.mxu0 %v7141_v7  ;;  %v7950_v45 = vadd.f32 %v5221_v37, %v8638_v60  ;;  %v5223_v49 = vpop.f32.mrb[3].mxu1  ;;  %5925 = vmatprep.subr.bf16.mxu1 %v7143_v9  ;;  %v267_v7 = vld [vmem:[#allocation5 + $0x468] sm:$0xff]  ;;  %v7156_v9 = vcombine.low %v8649_v10, %v8651_v11  ;;  %v282_v29 = vld [vmem:[#allocation5 + $0x4e0] sm:$0xff] }
 0x1d2   :  { %v7868_v41 = vpack.c.bf16 %v7933_v24, %v7932_v12  ;;  %v7935_v48 = vadd.f32 %v5004_v39, %v8642_v62  ;;  %v7869_v59 = vpack.c.bf16 %v7949_v34, %v7948_v23  ;;  %v7951_v0 = vadd.f32 %v5223_v49, %v8646_v3  ;;  %v275_v34 = vld [vmem:[#allocation5 + $0x4a8] sm:$0xff] }
 0x1d3   :  { %5465 = vmatmul.mubr.bf16.gmra.mrb[28].mxu0 %v8578_v19  ;;  %5684 = vmatmul.mubr.bf16.gmra.mrb[28].mxu1 %v8578_v19  ;;  %v7175_v24 = vcombine.high %v259_v4, %v267_v7  ;;  %v7172_v39 = vcombine.low %v258_v54, %v266_v57  ;;  %v298_v54 = vld [vmem:[#allocation5 + $0x560] sm:$0xff] }
 0x1d4   :  { %6954 = vst [vmem:[#allocation8] sm:$0xff] %v7868_v41  ;;  %v7876_v8 = vpack.c.bf16 %v7935_v48, %v7934_v35  ;;  %5707 = vmatpush1.bf16.msra.mxu0 %v7140_v31  ;;  %6955 = vst [vmem:[#allocation8 + $0x8] sm:$0xff] %v7869_v59  ;;  %v7877_v12 = vpack.c.bf16 %v7951_v0, %v7950_v45  ;;  %5926 = vmatpush1.bf16.msra.mxu1 %v7142_v32  ;;  %v283_v32 = vld [vmem:[#allocation5 + $0x4e8] sm:$0xff] }
 0x1d5   :  { %5708 = vmatprep.subr.bf16.mxu0 %v7157_v40  ;;  %5927 = vmatprep.subr.bf16.mxu1 %v7159_v51  ;;  %v7174_v40 = vcombine.low %v259_v4, %v267_v7  ;;  %v7189_v51 = vcombine.high %v274_v28, %v282_v29  ;;  %v291_v7 = vld [vmem:[#allocation5 + $0x528] sm:$0xff] }
 0x1d6   :  { %6962 = vst [vmem:[#allocation8 + $0x40] sm:$0xff] %v7876_v8  ;;  %v5008_v23 = vpop.f32.mrb[4].mxu0  ;;  %5726 = vmatprep.mubr.bf16.mxu0 %v8486_v58  ;;  %6963 = vst [vmem:[#allocation8 + $0x48] sm:$0xff] %v7877_v12  ;;  %v5227_v10 = vpop.f32.mrb[4].mxu1  ;;  %5945 = vmatprep.mubr.bf16.mxu1 %v8486_v58 }
 0x1d7   :  { %v7936_v31 = vadd.f32 %v5008_v23, %v8633_v56  ;;  %v5010_v11 = vpop.f32.mrb[5].mxu0  ;;  %v7952_v18 = vadd.f32 %v5227_v10, %v8638_v60  ;;  %v5229_v35 = vpop.f32.mrb[5].mxu1  ;;  %v7191_v23 = vcombine.high %v275_v34, %v283_v32  ;;  %v299_v10 = vld [vmem:[#allocation5 + $0x568] sm:$0xff] }
 0x1d8   :  { %v7937_v21 = vadd.f32 %v5010_v11, %v8642_v62  ;;  %v5012_v37 = vpop.f32.mrb[6].mxu0  ;;  %5709 = vmatpush1.bf16.msra.mxu0 %v7156_v9  ;;  %v7953_v41 = vadd.f32 %v5229_v35, %v8646_v3  ;;  %v5231_v48 = vpop.f32.mrb[6].mxu1  ;;  %5928 = vmatpush1.bf16.msra.mxu1 %v7158_v13  ;;  %v290_v9 = vld [vmem:[#allocation5 + $0x520] sm:$0xff]  ;;  %v7190_v11 = vcombine.low %v275_v34, %v283_v32 }
 0x1d9   :  { %v7938_v45 = vadd.f32 %v5012_v37, %v8633_v56  ;;  %v5014_v49 = vpop.f32.mrb[7].mxu0  ;;  %5710 = vmatprep.subr.bf16.mxu0 %v7173_v14  ;;  %v7954_v0 = vadd.f32 %v5231_v48, %v8638_v60  ;;  %v5233_v12 = vpop.f32.mrb[7].mxu1  ;;  %5929 = vmatprep.subr.bf16.mxu1 %v7175_v24  ;;  %v7188_v14 = vcombine.low %v274_v28, %v282_v29  ;;  %v306_v37 = vld [vmem:[#allocation5 + $0x5a0] sm:$0xff] }
 0x1da   :  { %v7884_v59 = vpack.c.bf16 %v7937_v21, %v7936_v31  ;;  %v7939_v8 = vadd.f32 %v5014_v49, %v8642_v62  ;;  %v7885_v57 = vpack.c.bf16 %v7953_v41, %v7952_v18  ;;  %v7955_v4 = vadd.f32 %v5233_v12, %v8646_v3  ;;  %v314_v18 = vld [vmem:[#allocation5 + $0x5e0] sm:$0xff] }
 0x1db   :  { %v7205_v21 = vcombine.high %v290_v9, %v298_v54  ;;  %v7207_v35 = vcombine.high %v291_v7, %v299_v10  ;;  %v7204_v32 = vcombine.low %v290_v9, %v298_v54  ;;  %v330_v9 = vld [vmem:[#allocation5 + $0x660] sm:$0xff] }
 0x1dc   :  { %6970 = vst [vmem:[#allocation8 + $0x80] sm:$0xff] %v7884_v59  ;;  %v7892_v13 = vpack.c.bf16 %v7939_v8, %v7938_v45  ;;  %5711 = vmatpush1.bf16.msra.mxu0 %v7172_v39  ;;  %6971 = vst [vmem:[#allocation8 + $0x88] sm:$0xff] %v7885_v57  ;;  %v7893_v31 = vpack.c.bf16 %v7955_v4, %v7954_v0  ;;  %5930 = vmatpush1.bf16.msra.mxu1 %v7174_v40  ;;  %v307_v45 = vld [vmem:[#allocation5 + $0x5a8] sm:$0xff] }
 0x1dd   :  { %5712 = vmatprep.subr.bf16.mxu0 %v7189_v51  ;;  %5931 = vmatprep.subr.bf16.mxu1 %v7191_v23  ;;  %v315_v39 = vld [vmem:[#allocation5 + $0x5e8] sm:$0xff]  ;;  %v7206_v51 = vcombine.low %v291_v7, %v299_v10  ;;  %v7221_v23 = vcombine.high %v306_v37, %v314_v18 }
 0x1de   :  { %6978 = vst [vmem:[#allocation8 + $0xc0] sm:$0xff] %v7892_v13  ;;  %v5018_v24 = vpop.f32.mrb[8].mxu0  ;;  %6979 = vst [vmem:[#allocation8 + $0xc8] sm:$0xff] %v7893_v31  ;;  %v5237_v48 = vpop.f32.mrb[8].mxu1  ;;  %v323_v10 = vld [vmem:[#allocation5 + $0x628] sm:$0xff] }
 0x1df   :  { %v7940_v41 = vadd.f32 %v5018_v24, %v8633_v56  ;;  %v5020_v49 = vpop.f32.mrb[9].mxu0  ;;  %v7956_v28 = vadd.f32 %v5237_v48, %v8638_v60  ;;  %v5239_v40 = vpop.f32.mrb[9].mxu1  ;;  %v7223_v24 = vcombine.high %v307_v45, %v315_v39  ;;  %v331_v48 = vld [vmem:[#allocation5 + $0x668] sm:$0xff] }
 0x1e0   :  { %v7941_v29 = vadd.f32 %v5020_v49, %v8642_v62  ;;  %v5022_v34 = vpop.f32.mrb[10].mxu0  ;;  %5713 = vmatpush1.bf16.msra.mxu0 %v7188_v14  ;;  %v7957_v59 = vadd.f32 %v5239_v40, %v8646_v3  ;;  %v5241_v8 = vpop.f32.mrb[10].mxu1  ;;  %5932 = vmatpush1.bf16.msra.mxu1 %v7190_v11  ;;  %v322_v14 = vld [vmem:[#allocation5 + $0x620] sm:$0xff]  ;;  %v7222_v49 = vcombine.low %v307_v45, %v315_v39 }
 0x1e1   :  { %v7942_v0 = vadd.f32 %v5022_v34, %v8633_v56  ;;  %v5024_v12 = vpop.f32.mrb[11].mxu0  ;;  %5714 = vmatprep.subr.bf16.mxu0 %v7205_v21  ;;  %v7958_v4 = vadd.f32 %v5241_v8, %v8638_v60  ;;  %v5243_v31 = vpop.f32.mrb[11].mxu1  ;;  %5933 = vmatprep.subr.bf16.mxu1 %v7207_v35  ;;  %v7220_v21 = vcombine.low %v306_v37, %v314_v18  ;;  %v338_v34 = vld [vmem:[#allocation5 + $0x6a0] sm:$0xff] }
 0x1e2   :  { %v7900_v57 = vpack.c.bf16 %v7941_v29, %v7940_v41  ;;  %v7943_v13 = vadd.f32 %v5024_v12, %v8642_v62  ;;  %v7901_v54 = vpack.c.bf16 %v7957_v59, %v7956_v28  ;;  %v7959_v7 = vadd.f32 %v5243_v31, %v8646_v3  ;;  %v346_v28 = vld [vmem:[#allocation5 + $0x6e0] sm:$0xff] }
 0x1e3   :  { %v7237_v29 = vcombine.high %v322_v14, %v330_v9  ;;  %v7239_v40 = vcombine.high %v323_v10, %v331_v48  ;;  %v7236_v39 = vcombine.low %v322_v14, %v330_v9  ;;  %v362_v14 = vld [vmem:[#allocation5 + $0x760] sm:$0xff] }
 0x1e4   :  { %6986 = vst [vmem:[#allocation8 + $0x100] sm:$0xff] %v7900_v57  ;;  %v7908_v11 = vpack.c.bf16 %v7943_v13, %v7942_v0  ;;  %5715 = vmatpush1.bf16.msra.mxu0 %v7204_v32  ;;  %6987 = vst [vmem:[#allocation8 + $0x108] sm:$0xff] %v7901_v54  ;;  %v7909_v41 = vpack.c.bf16 %v7959_v7, %v7958_v4  ;;  %5934 = vmatpush1.bf16.msra.mxu1 %v7206_v51  ;;  %v339_v0 = vld [vmem:[#allocation5 + $0x6a8] sm:$0xff] }
 0x1e5   :  { %5716 = vmatprep.subr.bf16.mxu0 %v7221_v23  ;;  %5935 = vmatprep.subr.bf16.mxu1 %v7223_v24  ;;  %v347_v32 = vld [vmem:[#allocation5 + $0x6e8] sm:$0xff]  ;;  %v7238_v23 = vcombine.low %v323_v10, %v331_v48  ;;  %v7253_v24 = vcombine.high %v338_v34, %v346_v28 }
 0x1e6   :  { %6994 = vst [vmem:[#allocation8 + $0x140] sm:$0xff] %v7908_v11  ;;  %v5028_v35 = vpop.f32.mrb[12].mxu0  ;;  %6995 = vst [vmem:[#allocation8 + $0x148] sm:$0xff] %v7909_v41  ;;  %v5247_v8 = vpop.f32.mrb[12].mxu1  ;;  %v355_v48 = vld [vmem:[#allocation5 + $0x728] sm:$0xff] }
 0x1e7   :  { %v7944_v59 = vadd.f32 %v5028_v35, %v8633_v56  ;;  %v5030_v12 = vpop.f32.mrb[13].mxu0  ;;  %v7960_v37 = vadd.f32 %v5247_v8, %v8638_v60  ;;  %v5249_v51 = vpop.f32.mrb[13].mxu1  ;;  %v7255_v35 = vcombine.high %v339_v0, %v347_v32  ;;  %v370_v8 = vld [vmem:[#allocation5 + $0x7a0] sm:$0xff] }
 0x1e8   :  { %v7945_v18 = vadd.f32 %v5030_v12, %v8642_v62  ;;  %v5032_v45 = vpop.f32.mrb[14].mxu0  ;;  %5717 = vmatpush1.bf16.msra.mxu0 %v7220_v21  ;;  %v7961_v57 = vadd.f32 %v5249_v51, %v8646_v3  ;;  %v5251_v13 = vpop.f32.mrb[14].mxu1  ;;  %5936 = vmatpush1.bf16.msra.mxu1 %v7222_v49  ;;  %v354_v21 = vld [vmem:[#allocation5 + $0x720] sm:$0xff] }
 0x1e9   :  { %v7946_v4 = vadd.f32 %v5032_v45, %v8633_v56  ;;  %v5034_v31 = vpop.f32.mrb[15].mxu0  ;;  %5718 = vmatprep.subr.bf16.mxu0 %v7237_v29  ;;  %v7962_v7 = vadd.f32 %v5251_v13, %v8638_v60  ;;  %v5253_v41 = vpop.f32.mrb[15].mxu1  ;;  %5937 = vmatprep.subr.bf16.mxu1 %v7239_v40  ;;  %v363_v56 = vld [vmem:[#allocation5 + $0x768] sm:$0xff]  ;;  %v7252_v29 = vcombine.low %v338_v34, %v346_v28  ;;  %v378_v12 = vld [vmem:[#allocation5 + $0x7e0] sm:$0xff] }
 0x1ea   :  { %v7916_v54 = vpack.c.bf16 %v7945_v18, %v7944_v59  ;;  %v7947_v11 = vadd.f32 %v5034_v31, %v8642_v62  ;;  %v7917_v9 = vpack.c.bf16 %v7961_v57, %v7960_v37  ;;  %v7963_v10 = vadd.f32 %v5253_v41, %v8646_v3  ;;  %v371_v37 = vld [vmem:[#allocation5 + $0x7a8] sm:$0xff]  ;;  %v386_v45 = vld [vmem:[#allocation5 + $0x820] sm:$0xff] }
 0x1eb   :  { %v7254_v60 = vcombine.low %v339_v0, %v347_v32  ;;  %v7269_v62 = vcombine.high %v354_v21, %v362_v14  ;;  %v7271_v40 = vcombine.high %v355_v48, %v363_v56  ;;  %v379_v3 = vld [vmem:[#allocation5 + $0x7e8] sm:$0xff]  ;;  %v7268_v18 = vcombine.low %v354_v21, %v362_v14  ;;  %v402_v31 = vld [vmem:[#allocation5 + $0x8a0] sm:$0xff] }
 0x1ec   :  { %7002 = vst [vmem:[#allocation8 + $0x180] sm:$0xff] %v7916_v54  ;;  %v7924_v49 = vpack.c.bf16 %v7947_v11, %v7946_v4  ;;  %5719 = vmatpush1.bf16.msra.mxu0 %v7236_v39  ;;  %7003 = vst [vmem:[#allocation8 + $0x188] sm:$0xff] %v7917_v9  ;;  %v7925_v59 = vpack.c.bf16 %v7963_v10, %v7962_v7  ;;  %5938 = vmatpush1.bf16.msra.mxu1 %v7238_v23  ;;  %v394_v39 = vld [vmem:[#allocation5 + $0x860] sm:$0xff]  ;;  %v387_v0 = vld [vmem:[#allocation5 + $0x828] sm:$0xff] }
 0x1ed   :  { %5720 = vmatprep.subr.bf16.mxu0 %v7253_v24  ;;  %5939 = vmatprep.subr.bf16.mxu1 %v7255_v35  ;;  %v7270_v51 = vcombine.low %v355_v48, %v363_v56  ;;  %v7285_v34 = vcombine.high %v370_v8, %v378_v12  ;;  %v7287_v28 = vcombine.high %v371_v37, %v379_v3  ;;  %v395_v32 = vld [vmem:[#allocation5 + $0x868] sm:$0xff]  ;;  %v410_v24 = vld [vmem:[#allocation5 + $0x8e0] sm:$0xff] }
 0x1ee   :  { %7010 = vst [vmem:[#allocation8 + $0x1c0] sm:$0xff] %v7924_v49  ;;  %7011 = vst [vmem:[#allocation8 + $0x1c8] sm:$0xff] %v7925_v59  ;;  %v7284_v23 = vcombine.low %v370_v8, %v378_v12  ;;  %v7286_v57 = vcombine.low %v371_v37, %v379_v3  ;;  %v7301_v4 = vcombine.high %v386_v45, %v394_v39  ;;  %v403_v54 = vld [vmem:[#allocation5 + $0x8a8] sm:$0xff]  ;;  %v418_v14 = vld [vmem:[#allocation5 + $0x920] sm:$0xff] }
 0x1ef   :  { %v7303_v13 = vcombine.high %v387_v0, %v395_v32  ;;  %v411_v7 = vld [vmem:[#allocation5 + $0x8e8] sm:$0xff]  ;;  %v7300_v11 = vcombine.low %v386_v45, %v394_v39  ;;  %v7302_v41 = vcombine.low %v387_v0, %v395_v32  ;;  %v7317_v35 = vcombine.high %v402_v31, %v410_v24  ;;  %v426_v9 = vld [vmem:[#allocation5 + $0x960] sm:$0xff] }
 0x1f0   :  { %5721 = vmatpush1.bf16.msra.mxu0 %v7252_v29  ;;  %5940 = vmatpush1.bf16.msra.mxu1 %v7254_v60  ;;  %v7319_v21 = vcombine.high %v403_v54, %v411_v7  ;;  %v419_v10 = vld [vmem:[#allocation5 + $0x928] sm:$0xff]  ;;  %v7316_v56 = vcombine.low %v402_v31, %v410_v24  ;;  %v7318_v49 = vcombine.low %v403_v54, %v411_v7  ;;  %v434_v60 = vld [vmem:[#allocation5 + $0x9a0] sm:$0xff] }
 0x1f1   :  { %5722 = vmatprep.subr.bf16.mxu0 %v7269_v62  ;;  %5941 = vmatprep.subr.bf16.mxu1 %v7271_v40  ;;  %v427_v48 = vld [vmem:[#allocation5 + $0x968] sm:$0xff]  ;;  %v7333_v29 = vcombine.high %v418_v14, %v426_v9  ;;  %v442_v62 = vld [vmem:[#allocation5 + $0x9e0] sm:$0xff]  ;;  %v7332_v12 = vcombine.low %v418_v14, %v426_v9 }
 0x1f2   :  { %v7335_v59 = vcombine.high %v419_v10, %v427_v48  ;;  %v435_v40 = vld [vmem:[#allocation5 + $0x9a8] sm:$0xff]  ;;  %v7334_v37 = vcombine.low %v419_v10, %v427_v48  ;;  %v7349_v3 = vcombine.high %v434_v60, %v442_v62  ;;  %v7348_v39 = vcombine.low %v434_v60, %v442_v62 }
 0x1f3   :  { %v443_v8 = vld [vmem:[#allocation5 + $0x9e8] sm:$0xff] }
 0x1f4   :  { %5723 = vmatpush1.bf16.msra.mxu0 %v7268_v18  ;;  %5942 = vmatpush1.bf16.msra.mxu1 %v7270_v51  ;;  %v7351_v18 = vcombine.high %v435_v40, %v443_v8  ;;  %v450_v51 = vld [vmem:[#allocation5 + $0xa20] sm:$0xff]  ;;  %v459_v45 = vld [vmem:[#allocation5 + $0xa68] sm:$0xff]  ;;  %v7350_v0 = vcombine.low %v435_v40, %v443_v8 }
 0x1f5   :  { %5724 = vmatprep.subr.bf16.mxu0 %v7285_v34  ;;  %5943 = vmatprep.subr.bf16.mxu1 %v7287_v28  ;;  %v458_v34 = vld [vmem:[#allocation5 + $0xa60] sm:$0xff]  ;;  %v451_v28 = vld [vmem:[#allocation5 + $0xa28] sm:$0xff] }
 0x1f6   :  { %v7365_v32 = vcombine.high %v450_v51, %v458_v34  ;;  %v475_v31 = vld [vmem:[#allocation5 + $0xae8] sm:$0xff]  ;;  %v7364_v24 = vcombine.low %v450_v51, %v458_v34  ;;  %v7366_v54 = vcombine.low %v451_v28, %v459_v45 }
 0x1f7   :  { %v491_v14 = vld [vmem:[#allocation5 + $0xb68] sm:$0xff] }
 0x1f8   :  { %5725 = vmatpush1.bf16.msra.mxu0 %v7284_v23  ;;  %5944 = vmatpush1.bf16.msra.mxu1 %v7286_v57  ;;  %v7367_v23 = vcombine.high %v451_v28, %v459_v45  ;;  %v466_v57 = vld [vmem:[#allocation5 + $0xaa0] sm:$0xff]  ;;  %v507_v60 = vld [vmem:[#allocation5 + $0xbe8] sm:$0xff] }
 0x1f9   :  { %5767 = vmatprep.subr.bf16.mxu0 %v7301_v4  ;;  %5986 = vmatprep.subr.bf16.mxu1 %v7303_v13  ;;  %v474_v4 = vld [vmem:[#allocation5 + $0xae0] sm:$0xff]  ;;  %v467_v13 = vld [vmem:[#allocation5 + $0xaa8] sm:$0xff] }
 0x1fa   :  { %v7381_v7 = vcombine.high %v466_v57, %v474_v4  ;;  %v7380_v9 = vcombine.low %v466_v57, %v474_v4  ;;  %v7382_v10 = vcombine.low %v467_v13, %v475_v31  ;;  %v523_v51 = vld [vmem:[#allocation5 + $0xc68] sm:$0xff] }
 0x1fb   :  { %5727 = vmatmul.mubr.bf16.vlgmr.msra.gmra.mrb[32].mxu0 %v8490_v15  ;;  %5946 = vmatmul.mubr.bf16.vlgmr.msra.gmra.mrb[32].mxu1 %v8490_v15  ;;  %v539_v57 = vld [vmem:[#allocation5 + $0xce8] sm:$0xff] }
 0x1fc   :  { %5768 = vmatpush1.bf16.msra.mxu0 %v7300_v11  ;;  %5987 = vmatpush1.bf16.msra.mxu1 %v7302_v41  ;;  %v7383_v11 = vcombine.high %v467_v13, %v475_v31  ;;  %v482_v41 = vld [vmem:[#allocation5 + $0xb20] sm:$0xff] }
 0x1fd   :  { %5769 = vmatprep.subr.bf16.mxu0 %v7317_v35  ;;  %5988 = vmatprep.subr.bf16.mxu1 %v7319_v21  ;;  %v490_v35 = vld [vmem:[#allocation5 + $0xb60] sm:$0xff]  ;;  %v483_v21 = vld [vmem:[#allocation5 + $0xb28] sm:$0xff] }
 0x1fe   :  { %5736 = vmatprep.mubr.bf16.mxu0 %v8492_v25  ;;  %5955 = vmatprep.mubr.bf16.mxu1 %v8492_v25  ;;  %v7397_v48 = vcombine.high %v482_v41, %v490_v35  ;;  %v7396_v62 = vcombine.low %v482_v41, %v490_v35  ;;  %v7398_v40 = vcombine.low %v483_v21, %v491_v14  ;;  %v555_v41 = vld [vmem:[#allocation5 + $0xd68] sm:$0xff] }
 0x200   :  { %5770 = vmatpush1.bf16.msra.mxu0 %v7316_v56  ;;  %5989 = vmatpush1.bf16.msra.mxu1 %v7318_v49  ;;  %v7399_v56 = vcombine.high %v483_v21, %v491_v14  ;;  %v498_v49 = vld [vmem:[#allocation5 + $0xba0] sm:$0xff] }
 0x201   :  { %5771 = vmatprep.subr.bf16.mxu0 %v7333_v29  ;;  %5990 = vmatprep.subr.bf16.mxu1 %v7335_v59  ;;  %v506_v29 = vld [vmem:[#allocation5 + $0xbe0] sm:$0xff]  ;;  %v499_v59 = vld [vmem:[#allocation5 + $0xba8] sm:$0xff] }
 0x202   :  { %v7413_v8 = vcombine.high %v498_v49, %v506_v29  ;;  %v7412_v34 = vcombine.low %v498_v49, %v506_v29  ;;  %v7414_v28 = vcombine.low %v499_v59, %v507_v60  ;;  %v571_v49 = vld [vmem:[#allocation5 + $0xde8] sm:$0xff] }
 0x203   :  { %5737 = vmatmul.mubr.bf16.gmra.mrb[36].mxu0 %v8498_v38  ;;  %5956 = vmatmul.mubr.bf16.gmra.mrb[36].mxu1 %v8498_v38 }
 0x204   :  { %5772 = vmatpush1.bf16.msra.mxu0 %v7332_v12  ;;  %5991 = vmatpush1.bf16.msra.mxu1 %v7334_v37  ;;  %v7415_v12 = vcombine.high %v499_v59, %v507_v60  ;;  %v514_v37 = vld [vmem:[#allocation5 + $0xc20] sm:$0xff] }
 0x205   :  { %5773 = vmatprep.subr.bf16.mxu0 %v7349_v3  ;;  %5992 = vmatprep.subr.bf16.mxu1 %v7351_v18  ;;  %v522_v3 = vld [vmem:[#allocation5 + $0xc60] sm:$0xff]  ;;  %v515_v18 = vld [vmem:[#allocation5 + $0xc28] sm:$0xff] }
 0x206   :  { %5746 = vmatprep.mubr.bf16.mxu0 %v8500_v47  ;;  %5965 = vmatprep.mubr.bf16.mxu1 %v8500_v47  ;;  %v7429_v45 = vcombine.high %v514_v37, %v522_v3  ;;  %v7428_v4 = vcombine.low %v514_v37, %v522_v3  ;;  %v7430_v13 = vcombine.low %v515_v18, %v523_v51  ;;  %v587_v37 = vld [vmem:[#allocation5 + $0xe68] sm:$0xff] }
 0x208   :  { %5774 = vmatpush1.bf16.msra.mxu0 %v7348_v39  ;;  %5993 = vmatpush1.bf16.msra.mxu1 %v7350_v0  ;;  %v7431_v39 = vcombine.high %v515_v18, %v523_v51  ;;  %v530_v0 = vld [vmem:[#allocation5 + $0xca0] sm:$0xff] }
 0x209   :  { %5775 = vmatprep.subr.bf16.mxu0 %v7365_v32  ;;  %5994 = vmatprep.subr.bf16.mxu1 %v7367_v23  ;;  %v538_v32 = vld [vmem:[#allocation5 + $0xce0] sm:$0xff]  ;;  %v531_v23 = vld [vmem:[#allocation5 + $0xca8] sm:$0xff] }
 0x20a   :  { %v7445_v31 = vcombine.high %v530_v0, %v538_v32  ;;  %v7444_v35 = vcombine.low %v530_v0, %v538_v32  ;;  %v7446_v21 = vcombine.low %v531_v23, %v539_v57  ;;  %v603_v0 = vld [vmem:[#allocation5 + $0xee8] sm:$0xff] }
 0x20b   :  { %5747 = vmatmul.mubr.bf16.gmra.mrb[40].mxu0 %v8506_v61  ;;  %5966 = vmatmul.mubr.bf16.gmra.mrb[40].mxu1 %v8506_v61 }
 0x20c   :  { %5776 = vmatpush1.bf16.msra.mxu0 %v7364_v24  ;;  %5995 = vmatpush1.bf16.msra.mxu1 %v7366_v54  ;;  %v7447_v24 = vcombine.high %v531_v23, %v539_v57  ;;  %v546_v54 = vld [vmem:[#allocation5 + $0xd20] sm:$0xff] }
 0x20d   :  { %5777 = vmatprep.subr.bf16.mxu0 %v7381_v7  ;;  %5996 = vmatprep.subr.bf16.mxu1 %v7383_v11  ;;  %v554_v7 = vld [vmem:[#allocation5 + $0xd60] sm:$0xff]  ;;  %v547_v11 = vld [vmem:[#allocation5 + $0xd28] sm:$0xff] }
 0x20e   :  { %5756 = vmatprep.mubr.bf16.mxu0 %v8508_v6  ;;  %5975 = vmatprep.mubr.bf16.mxu1 %v8508_v6  ;;  %v7461_v14 = vcombine.high %v546_v54, %v554_v7  ;;  %v7460_v29 = vcombine.low %v546_v54, %v554_v7  ;;  %v7462_v59 = vcombine.low %v547_v11, %v555_v41  ;;  %v619_v54 = vld [vmem:[#allocation5 + $0xf68] sm:$0xff] }
 0x210   :  { %5778 = vmatpush1.bf16.msra.mxu0 %v7380_v9  ;;  %5997 = vmatpush1.bf16.msra.mxu1 %v7382_v10  ;;  %v7463_v9 = vcombine.high %v547_v11, %v555_v41  ;;  %v562_v10 = vld [vmem:[#allocation5 + $0xda0] sm:$0xff] }
 0x211   :  { %5779 = vmatprep.subr.bf16.mxu0 %v7397_v48  ;;  %5998 = vmatprep.subr.bf16.mxu1 %v7399_v56  ;;  %v570_v48 = vld [vmem:[#allocation5 + $0xde0] sm:$0xff]  ;;  %v563_v56 = vld [vmem:[#allocation5 + $0xda8] sm:$0xff] }
 0x212   :  { %v7477_v60 = vcombine.high %v562_v10, %v570_v48  ;;  %v7476_v3 = vcombine.low %v562_v10, %v570_v48  ;;  %v7478_v18 = vcombine.low %v563_v56, %v571_v49  ;;  %v635_v10 = vld [vmem:[#allocation5 + $0xfe8] sm:$0xff] }
 0x213   :  { %5757 = vmatmul.mubr.bf16.gmra.mrb[44].mxu0 %v8514_v20  ;;  %5976 = vmatmul.mubr.bf16.gmra.mrb[44].mxu1 %v8514_v20 }
 0x214   :  { %5780 = vmatpush1.bf16.msra.mxu0 %v7396_v62  ;;  %5999 = vmatpush1.bf16.msra.mxu1 %v7398_v40  ;;  %v7479_v62 = vcombine.high %v563_v56, %v571_v49  ;;  %v578_v40 = vld [vmem:[#allocation5 + $0xe20] sm:$0xff] }
 0x215   :  { %5781 = vmatprep.subr.bf16.mxu0 %v7413_v8  ;;  %6000 = vmatprep.subr.bf16.mxu1 %v7415_v12  ;;  %v586_v8 = vld [vmem:[#allocation5 + $0xe60] sm:$0xff]  ;;  %v579_v12 = vld [vmem:[#allocation5 + $0xe28] sm:$0xff] }
 0x216   :  { %5799 = vmatprep.mubr.bf16.mxu0 %v8516_v30  ;;  %6018 = vmatprep.mubr.bf16.mxu1 %v8516_v30  ;;  %v7493_v51 = vcombine.high %v578_v40, %v586_v8  ;;  %v7492_v32 = vcombine.low %v578_v40, %v586_v8  ;;  %v7494_v23 = vcombine.low %v579_v12, %v587_v37  ;;  %v651_v40 = vld [vmem:[#allocation5 + $0x1068] sm:$0xff] }
 0x218   :  { %5782 = vmatpush1.bf16.msra.mxu0 %v7412_v34  ;;  %6001 = vmatpush1.bf16.msra.mxu1 %v7414_v28  ;;  %v7495_v34 = vcombine.high %v579_v12, %v587_v37  ;;  %v594_v28 = vld [vmem:[#allocation5 + $0xea0] sm:$0xff] }
 0x219   :  { %5783 = vmatprep.subr.bf16.mxu0 %v7429_v45  ;;  %6002 = vmatprep.subr.bf16.mxu1 %v7431_v39  ;;  %v602_v45 = vld [vmem:[#allocation5 + $0xee0] sm:$0xff]  ;;  %v595_v39 = vld [vmem:[#allocation5 + $0xea8] sm:$0xff] }
 0x21a   :  { %v7509_v57 = vcombine.high %v594_v28, %v602_v45  ;;  %v7508_v7 = vcombine.low %v594_v28, %v602_v45  ;;  %v7510_v11 = vcombine.low %v595_v39, %v603_v0  ;;  %v667_v28 = vld [vmem:[#allocation5 + $0x10e8] sm:$0xff] }
 0x21c   :  { %5784 = vmatpush1.bf16.msra.mxu0 %v7428_v4  ;;  %6003 = vmatpush1.bf16.msra.mxu1 %v7430_v13  ;;  %v7511_v4 = vcombine.high %v595_v39, %v603_v0  ;;  %v610_v13 = vld [vmem:[#allocation5 + $0xf20] sm:$0xff] }
 0x21d   :  { %5785 = vmatprep.subr.bf16.mxu0 %v7445_v31  ;;  %6004 = vmatprep.subr.bf16.mxu1 %v7447_v24  ;;  %v618_v31 = vld [vmem:[#allocation5 + $0xf60] sm:$0xff]  ;;  %v611_v24 = vld [vmem:[#allocation5 + $0xf28] sm:$0xff] }
 0x21e   :  { %v7525_v41 = vcombine.high %v610_v13, %v618_v31  ;;  %v7524_v48 = vcombine.low %v610_v13, %v618_v31  ;;  %v7526_v56 = vcombine.low %v611_v24, %v619_v54  ;;  %v683_v13 = vld [vmem:[#allocation5 + $0x1168] sm:$0xff] }
 0x220   :  { %5786 = vmatpush1.bf16.msra.mxu0 %v7444_v35  ;;  %6005 = vmatpush1.bf16.msra.mxu1 %v7446_v21  ;;  %v7527_v35 = vcombine.high %v611_v24, %v619_v54  ;;  %v626_v21 = vld [vmem:[#allocation5 + $0xfa0] sm:$0xff] }
 0x221   :  { %5787 = vmatprep.subr.bf16.mxu0 %v7461_v14  ;;  %6006 = vmatprep.subr.bf16.mxu1 %v7463_v9  ;;  %v634_v14 = vld [vmem:[#allocation5 + $0xfe0] sm:$0xff]  ;;  %v627_v9 = vld [vmem:[#allocation5 + $0xfa8] sm:$0xff] }
 0x222   :  { %v7541_v49 = vcombine.high %v626_v21, %v634_v14  ;;  %v7540_v8 = vcombine.low %v626_v21, %v634_v14  ;;  %v7542_v12 = vcombine.low %v627_v9, %v635_v10  ;;  %v699_v21 = vld [vmem:[#allocation5 + $0x11e8] sm:$0xff] }
 0x224   :  { %5788 = vmatpush1.bf16.msra.mxu0 %v7460_v29  ;;  %6007 = vmatpush1.bf16.msra.mxu1 %v7462_v59  ;;  %v7543_v29 = vcombine.high %v627_v9, %v635_v10  ;;  %v642_v59 = vld [vmem:[#allocation5 + $0x1020] sm:$0xff] }
 0x225   :  { %5789 = vmatprep.subr.bf16.mxu0 %v7477_v60  ;;  %6008 = vmatprep.subr.bf16.mxu1 %v7479_v62  ;;  %v650_v60 = vld [vmem:[#allocation5 + $0x1060] sm:$0xff]  ;;  %v643_v62 = vld [vmem:[#allocation5 + $0x1028] sm:$0xff] }
 0x226   :  { %v7557_v37 = vcombine.high %v642_v59, %v650_v60  ;;  %v7556_v45 = vcombine.low %v642_v59, %v650_v60  ;;  %v7558_v39 = vcombine.low %v643_v62, %v651_v40  ;;  %v715_v59 = vld [vmem:[#allocation5 + $0x1268] sm:$0xff] }
 0x228   :  { %5790 = vmatpush1.bf16.msra.mxu0 %v7476_v3  ;;  %6009 = vmatpush1.bf16.msra.mxu1 %v7478_v18  ;;  %v7559_v3 = vcombine.high %v643_v62, %v651_v40  ;;  %v658_v18 = vld [vmem:[#allocation5 + $0x10a0] sm:$0xff] }
 0x229   :  { %5791 = vmatprep.subr.bf16.mxu0 %v7493_v51  ;;  %6010 = vmatprep.subr.bf16.mxu1 %v7495_v34  ;;  %v666_v51 = vld [vmem:[#allocation5 + $0x10e0] sm:$0xff]  ;;  %v659_v34 = vld [vmem:[#allocation5 + $0x10a8] sm:$0xff] }
 0x22a   :  { %v7573_v0 = vcombine.high %v658_v18, %v666_v51  ;;  %v7572_v31 = vcombine.low %v658_v18, %v666_v51  ;;  %v7574_v24 = vcombine.low %v659_v34, %v667_v28  ;;  %v731_v18 = vld [vmem:[#allocation5 + $0x12e8] sm:$0xff] }
 0x22c   :  { %5792 = vmatpush1.bf16.msra.mxu0 %v7492_v32  ;;  %6011 = vmatpush1.bf16.msra.mxu1 %v7494_v23  ;;  %v7575_v32 = vcombine.high %v659_v34, %v667_v28  ;;  %v674_v23 = vld [vmem:[#allocation5 + $0x1120] sm:$0xff] }
 0x22d   :  { %5793 = vmatprep.subr.bf16.mxu0 %v7509_v57  ;;  %6012 = vmatprep.subr.bf16.mxu1 %v7511_v4  ;;  %v682_v57 = vld [vmem:[#allocation5 + $0x1160] sm:$0xff]  ;;  %v675_v4 = vld [vmem:[#allocation5 + $0x1128] sm:$0xff] }
 0x22e   :  { %v7589_v54 = vcombine.high %v674_v23, %v682_v57  ;;  %v7588_v14 = vcombine.low %v674_v23, %v682_v57  ;;  %v7590_v9 = vcombine.low %v675_v4, %v683_v13  ;;  %v747_v23 = vld [vmem:[#allocation5 + $0x1368] sm:$0xff] }
 0x230   :  { %5794 = vmatpush1.bf16.msra.mxu0 %v7508_v7  ;;  %6013 = vmatpush1.bf16.msra.mxu1 %v7510_v11  ;;  %v7591_v7 = vcombine.high %v675_v4, %v683_v13  ;;  %v690_v11 = vld [vmem:[#allocation5 + $0x11a0] sm:$0xff] }
 0x231   :  { %5795 = vmatprep.subr.bf16.mxu0 %v7525_v41  ;;  %6014 = vmatprep.subr.bf16.mxu1 %v7527_v35  ;;  %v698_v41 = vld [vmem:[#allocation5 + $0x11e0] sm:$0xff]  ;;  %v691_v35 = vld [vmem:[#allocation5 + $0x11a8] sm:$0xff] }
 0x232   :  { %v7605_v10 = vcombine.high %v690_v11, %v698_v41  ;;  %v7604_v60 = vcombine.low %v690_v11, %v698_v41  ;;  %v7606_v62 = vcombine.low %v691_v35, %v699_v21  ;;  %v763_v11 = vld [vmem:[#allocation5 + $0x13e8] sm:$0xff] }
 0x234   :  { %5796 = vmatpush1.bf16.msra.mxu0 %v7524_v48  ;;  %6015 = vmatpush1.bf16.msra.mxu1 %v7526_v56  ;;  %v7607_v48 = vcombine.high %v691_v35, %v699_v21  ;;  %v706_v56 = vld [vmem:[#allocation5 + $0x1220] sm:$0xff] }
 0x235   :  { %5797 = vmatprep.subr.bf16.mxu0 %v7541_v49  ;;  %6016 = vmatprep.subr.bf16.mxu1 %v7543_v29  ;;  %v714_v49 = vld [vmem:[#allocation5 + $0x1260] sm:$0xff]  ;;  %v707_v29 = vld [vmem:[#allocation5 + $0x1228] sm:$0xff] }
 0x236   :  { %v7621_v40 = vcombine.high %v706_v56, %v714_v49  ;;  %v7620_v51 = vcombine.low %v706_v56, %v714_v49  ;;  %v7622_v34 = vcombine.low %v707_v29, %v715_v59  ;;  %v779_v56 = vld [vmem:[#allocation5 + $0x1468] sm:$0xff] }
 0x238   :  { %5798 = vmatpush1.bf16.msra.mxu0 %v7540_v8  ;;  %6017 = vmatpush1.bf16.msra.mxu1 %v7542_v12  ;;  %v7623_v8 = vcombine.high %v707_v29, %v715_v59  ;;  %v722_v12 = vld [vmem:[#allocation5 + $0x12a0] sm:$0xff] }
 0x239   :  { %5840 = vmatprep.subr.bf16.mxu0 %v7557_v37  ;;  %6059 = vmatprep.subr.bf16.mxu1 %v7559_v3  ;;  %v730_v37 = vld [vmem:[#allocation5 + $0x12e0] sm:$0xff]  ;;  %v723_v3 = vld [vmem:[#allocation5 + $0x12a8] sm:$0xff] }
 0x23a   :  { %v7637_v28 = vcombine.high %v722_v12, %v730_v37  ;;  %v7636_v57 = vcombine.low %v722_v12, %v730_v37  ;;  %v7638_v4 = vcombine.low %v723_v3, %v731_v18  ;;  %v795_v12 = vld [vmem:[#allocation5 + $0x14e8] sm:$0xff] }
 0x23b   :  { %5800 = vmatmul.mubr.bf16.vlgmr.msra.gmra.mrb[32].mxu0 %v8522_v53  ;;  %6019 = vmatmul.mubr.bf16.vlgmr.msra.gmra.mrb[32].mxu1 %v8522_v53 }
 0x23c   :  { %5841 = vmatpush1.bf16.msra.mxu0 %v7556_v45  ;;  %6060 = vmatpush1.bf16.msra.mxu1 %v7558_v39  ;;  %v7639_v45 = vcombine.high %v723_v3, %v731_v18  ;;  %v738_v39 = vld [vmem:[#allocation5 + $0x1320] sm:$0xff] }
 0x23d   :  { %5842 = vmatprep.subr.bf16.mxu0 %v7573_v0  ;;  %6061 = vmatprep.subr.bf16.mxu1 %v7575_v32  ;;  %v746_v0 = vld [vmem:[#allocation5 + $0x1360] sm:$0xff]  ;;  %v739_v32 = vld [vmem:[#allocation5 + $0x1328] sm:$0xff] }
 0x23e   :  { %5809 = vmatprep.mubr.bf16.mxu0 %v8524_v1  ;;  %6028 = vmatprep.mubr.bf16.mxu1 %v8524_v1  ;;  %v7653_v13 = vcombine.high %v738_v39, %v746_v0  ;;  %v7652_v41 = vcombine.low %v738_v39, %v746_v0  ;;  %v7654_v35 = vcombine.low %v739_v32, %v747_v23  ;;  %v811_v39 = vld [vmem:[#allocation5 + $0x1568] sm:$0xff] }
 0x240   :  { %5843 = vmatpush1.bf16.msra.mxu0 %v7572_v31  ;;  %6062 = vmatpush1.bf16.msra.mxu1 %v7574_v24  ;;  %v7655_v31 = vcombine.high %v739_v32, %v747_v23  ;;  %v754_v24 = vld [vmem:[#allocation5 + $0x13a0] sm:$0xff] }
 0x241   :  { %5844 = vmatprep.subr.bf16.mxu0 %v7589_v54  ;;  %6063 = vmatprep.subr.bf16.mxu1 %v7591_v7  ;;  %v762_v54 = vld [vmem:[#allocation5 + $0x13e0] sm:$0xff]  ;;  %v755_v7 = vld [vmem:[#allocation5 + $0x13a8] sm:$0xff] }
 0x242   :  { %v7669_v21 = vcombine.high %v754_v24, %v762_v54  ;;  %v7668_v49 = vcombine.low %v754_v24, %v762_v54  ;;  %v7670_v29 = vcombine.low %v755_v7, %v763_v11  ;;  %v827_v24 = vld [vmem:[#allocation5 + $0x15e8] sm:$0xff] }
 0x243   :  { %5810 = vmatmul.mubr.bf16.gmra.mrb[36].mxu0 %v8530_v16  ;;  %6029 = vmatmul.mubr.bf16.gmra.mrb[36].mxu1 %v8530_v16 }
 0x244   :  { %5845 = vmatpush1.bf16.msra.mxu0 %v7588_v14  ;;  %6064 = vmatpush1.bf16.msra.mxu1 %v7590_v9  ;;  %v7671_v14 = vcombine.high %v755_v7, %v763_v11  ;;  %v770_v9 = vld [vmem:[#allocation5 + $0x1420] sm:$0xff] }
 0x245   :  { %5846 = vmatprep.subr.bf16.mxu0 %v7605_v10  ;;  %6065 = vmatprep.subr.bf16.mxu1 %v7607_v48  ;;  %v778_v10 = vld [vmem:[#allocation5 + $0x1460] sm:$0xff]  ;;  %v771_v48 = vld [vmem:[#allocation5 + $0x1428] sm:$0xff] }
 0x246   :  { %5819 = vmatprep.mubr.bf16.mxu0 %v8532_v27  ;;  %6038 = vmatprep.mubr.bf16.mxu1 %v8532_v27  ;;  %v7685_v59 = vcombine.high %v770_v9, %v778_v10  ;;  %v7684_v37 = vcombine.low %v770_v9, %v778_v10  ;;  %v7686_v3 = vcombine.low %v771_v48, %v779_v56  ;;  %v843_v9 = vld [vmem:[#allocation5 + $0x1668] sm:$0xff] }
 0x248   :  { %5847 = vmatpush1.bf16.msra.mxu0 %v7604_v60  ;;  %6066 = vmatpush1.bf16.msra.mxu1 %v7606_v62  ;;  %v7687_v60 = vcombine.high %v771_v48, %v779_v56  ;;  %v786_v62 = vld [vmem:[#allocation5 + $0x14a0] sm:$0xff] }
 0x249   :  { %5848 = vmatprep.subr.bf16.mxu0 %v7621_v40  ;;  %6067 = vmatprep.subr.bf16.mxu1 %v7623_v8  ;;  %v794_v40 = vld [vmem:[#allocation5 + $0x14e0] sm:$0xff]  ;;  %v787_v8 = vld [vmem:[#allocation5 + $0x14a8] sm:$0xff] }
 0x24a   :  { %v7701_v18 = vcombine.high %v786_v62, %v794_v40  ;;  %v7700_v0 = vcombine.low %v786_v62, %v794_v40  ;;  %v7702_v32 = vcombine.low %v787_v8, %v795_v12  ;;  %v859_v62 = vld [vmem:[#allocation5 + $0x16e8] sm:$0xff] }
 0x24b   :  { %5820 = vmatmul.mubr.bf16.gmra.mrb[40].mxu0 %v8538_v42  ;;  %6039 = vmatmul.mubr.bf16.gmra.mrb[40].mxu1 %v8538_v42 }
 0x24c   :  { %5849 = vmatpush1.bf16.msra.mxu0 %v7620_v51  ;;  %6068 = vmatpush1.bf16.msra.mxu1 %v7622_v34  ;;  %v7703_v51 = vcombine.high %v787_v8, %v795_v12  ;;  %v802_v34 = vld [vmem:[#allocation5 + $0x1520] sm:$0xff] }
 0x24d   :  { %5850 = vmatprep.subr.bf16.mxu0 %v7637_v28  ;;  %6069 = vmatprep.subr.bf16.mxu1 %v7639_v45  ;;  %v810_v28 = vld [vmem:[#allocation5 + $0x1560] sm:$0xff]  ;;  %v803_v45 = vld [vmem:[#allocation5 + $0x1528] sm:$0xff] }
 0x24e   :  { %5829 = vmatprep.mubr.bf16.mxu0 %v8540_v52  ;;  %6048 = vmatprep.mubr.bf16.mxu1 %v8540_v52  ;;  %v7717_v23 = vcombine.high %v802_v34, %v810_v28  ;;  %v7716_v54 = vcombine.low %v802_v34, %v810_v28  ;;  %v7718_v7 = vcombine.low %v803_v45, %v811_v39  ;;  %v875_v34 = vld [vmem:[#allocation5 + $0x1768] sm:$0xff] }
 0x250   :  { %5851 = vmatpush1.bf16.msra.mxu0 %v7636_v57  ;;  %6070 = vmatpush1.bf16.msra.mxu1 %v7638_v4  ;;  %v7719_v57 = vcombine.high %v803_v45, %v811_v39  ;;  %v818_v4 = vld [vmem:[#allocation5 + $0x15a0] sm:$0xff] }
 0x251   :  { %5852 = vmatprep.subr.bf16.mxu0 %v7653_v13  ;;  %6071 = vmatprep.subr.bf16.mxu1 %v7655_v31  ;;  %v826_v13 = vld [vmem:[#allocation5 + $0x15e0] sm:$0xff]  ;;  %v819_v31 = vld [vmem:[#allocation5 + $0x15a8] sm:$0xff] }
 0x252   :  { %v7733_v11 = vcombine.high %v818_v4, %v826_v13  ;;  %v7732_v10 = vcombine.low %v818_v4, %v826_v13  ;;  %v7734_v48 = vcombine.low %v819_v31, %v827_v24  ;;  %v891_v4 = vld [vmem:[#allocation5 + $0x17e8] sm:$0xff] }
 0x253   :  { %5830 = vmatmul.mubr.bf16.gmra.mrb[44].mxu0 %v8546_v5  ;;  %6049 = vmatmul.mubr.bf16.gmra.mrb[44].mxu1 %v8546_v5 }
 0x254   :  { %5853 = vmatpush1.bf16.msra.mxu0 %v7652_v41  ;;  %6072 = vmatpush1.bf16.msra.mxu1 %v7654_v35  ;;  %v7735_v41 = vcombine.high %v819_v31, %v827_v24  ;;  %v834_v35 = vld [vmem:[#allocation5 + $0x1620] sm:$0xff] }
 0x255   :  { %5854 = vmatprep.subr.bf16.mxu0 %v7669_v21  ;;  %6073 = vmatprep.subr.bf16.mxu1 %v7671_v14  ;;  %v842_v21 = vld [vmem:[#allocation5 + $0x1660] sm:$0xff]  ;;  %v835_v14 = vld [vmem:[#allocation5 + $0x1628] sm:$0xff] }
 0x256   :  { %5872 = vmatprep.mubr.bf16.mxu0 %v8548_v17  ;;  %6091 = vmatprep.mubr.bf16.mxu1 %v8548_v17  ;;  %v7749_v56 = vcombine.high %v834_v35, %v842_v21  ;;  %v7748_v40 = vcombine.low %v834_v35, %v842_v21  ;;  %v7750_v8 = vcombine.low %v835_v14, %v843_v9  ;;  %v141_v35 = vld [vmem:[#allocation5 + $0x78] sm:$0xff] }
 0x258   :  { %5855 = vmatpush1.bf16.msra.mxu0 %v7668_v49  ;;  %6074 = vmatpush1.bf16.msra.mxu1 %v7670_v29  ;;  %v7751_v49 = vcombine.high %v835_v14, %v843_v9  ;;  %v850_v29 = vld [vmem:[#allocation5 + $0x16a0] sm:$0xff] }
 0x259   :  { %5856 = vmatprep.subr.bf16.mxu0 %v7685_v59  ;;  %6075 = vmatprep.subr.bf16.mxu1 %v7687_v60  ;;  %v858_v59 = vld [vmem:[#allocation5 + $0x16e0] sm:$0xff]  ;;  %v851_v60 = vld [vmem:[#allocation5 + $0x16a8] sm:$0xff] }
 0x25a   :  { %v7765_v12 = vcombine.high %v850_v29, %v858_v59  ;;  %v7764_v28 = vcombine.low %v850_v29, %v858_v59  ;;  %v7766_v45 = vcombine.low %v851_v60, %v859_v62  ;;  %v157_v29 = vld [vmem:[#allocation5 + $0xf8] sm:$0xff] }
 0x25c   :  { %5857 = vmatpush1.bf16.msra.mxu0 %v7684_v37  ;;  %6076 = vmatpush1.bf16.msra.mxu1 %v7686_v3  ;;  %v7767_v37 = vcombine.high %v851_v60, %v859_v62  ;;  %v866_v3 = vld [vmem:[#allocation5 + $0x1720] sm:$0xff] }
 0x25d   :  { %5858 = vmatprep.subr.bf16.mxu0 %v7701_v18  ;;  %6077 = vmatprep.subr.bf16.mxu1 %v7703_v51  ;;  %v874_v18 = vld [vmem:[#allocation5 + $0x1760] sm:$0xff]  ;;  %v867_v51 = vld [vmem:[#allocation5 + $0x1728] sm:$0xff] }
 0x25e   :  { %v7781_v39 = vcombine.high %v866_v3, %v874_v18  ;;  %v7780_v13 = vcombine.low %v866_v3, %v874_v18  ;;  %v7782_v31 = vcombine.low %v867_v51, %v875_v34  ;;  %v173_v3 = vld [vmem:[#allocation5 + $0x178] sm:$0xff] }
 0x260   :  { %5859 = vmatpush1.bf16.msra.mxu0 %v7700_v0  ;;  %6078 = vmatpush1.bf16.msra.mxu1 %v7702_v32  ;;  %v7783_v0 = vcombine.high %v867_v51, %v875_v34  ;;  %v882_v32 = vld [vmem:[#allocation5 + $0x17a0] sm:$0xff] }
 0x261   :  { %5860 = vmatprep.subr.bf16.mxu0 %v7717_v23  ;;  %6079 = vmatprep.subr.bf16.mxu1 %v7719_v57  ;;  %v890_v23 = vld [vmem:[#allocation5 + $0x17e0] sm:$0xff]  ;;  %v883_v57 = vld [vmem:[#allocation5 + $0x17a8] sm:$0xff] }
 0x262   :  { %v7797_v24 = vcombine.high %v882_v32, %v890_v23  ;;  %v7796_v21 = vcombine.low %v882_v32, %v890_v23  ;;  %v7798_v14 = vcombine.low %v883_v57, %v891_v4  ;;  %v189_v32 = vld [vmem:[#allocation5 + $0x1f8] sm:$0xff] }
 0x264   :  { %5861 = vmatpush1.bf16.msra.mxu0 %v7716_v54  ;;  %6080 = vmatpush1.bf16.msra.mxu1 %v7718_v7  ;;  %v7799_v54 = vcombine.high %v883_v57, %v891_v4  ;;  %v132_v7 = vld [vmem:[#allocation5 + $0x30] sm:$0xff] }
 0x265   :  { %5862 = vmatprep.subr.bf16.mxu0 %v7733_v11  ;;  %6081 = vmatprep.subr.bf16.mxu1 %v7735_v41  ;;  %v140_v11 = vld [vmem:[#allocation5 + $0x70] sm:$0xff]  ;;  %v133_v41 = vld [vmem:[#allocation5 + $0x38] sm:$0xff] }
 0x266   :  { %v7049_v9 = vcombine.high %v132_v7, %v140_v11  ;;  %v7048_v59 = vcombine.low %v132_v7, %v140_v11  ;;  %v7050_v60 = vcombine.low %v133_v41, %v141_v35  ;;  %v205_v7 = vld [vmem:[#allocation5 + $0x278] sm:$0xff] }
 0x268   :  { %5863 = vmatpush1.bf16.msra.mxu0 %v7732_v10  ;;  %6082 = vmatpush1.bf16.msra.mxu1 %v7734_v48  ;;  %v7051_v10 = vcombine.high %v133_v41, %v141_v35  ;;  %v148_v48 = vld [vmem:[#allocation5 + $0xb0] sm:$0xff] }
 0x269   :  { %5864 = vmatprep.subr.bf16.mxu0 %v7749_v56  ;;  %6083 = vmatprep.subr.bf16.mxu1 %v7751_v49  ;;  %v156_v56 = vld [vmem:[#allocation5 + $0xf0] sm:$0xff]  ;;  %v149_v49 = vld [vmem:[#allocation5 + $0xb8] sm:$0xff] }
 0x26a   :  { %v7065_v62 = vcombine.high %v148_v48, %v156_v56  ;;  %v7064_v18 = vcombine.low %v148_v48, %v156_v56  ;;  %v7066_v51 = vcombine.low %v149_v49, %v157_v29  ;;  %v213_v48 = vld [vmem:[#allocation5 + $0x2b8] sm:$0xff] }
 0x26b   :  { %v221_v56 = vld [vmem:[#allocation5 + $0x2f8] sm:$0xff] }
 0x26c   :  { %5865 = vmatpush1.bf16.msra.mxu0 %v7748_v40  ;;  %6084 = vmatpush1.bf16.msra.mxu1 %v7750_v8  ;;  %v7067_v40 = vcombine.high %v149_v49, %v157_v29  ;;  %v164_v8 = vld [vmem:[#allocation5 + $0x130] sm:$0xff]  ;;  %v924_v29 = vsub.s32 6, %v8621_v26 }
 0x26d   :  { %5866 = vmatprep.subr.bf16.mxu0 %v7765_v12  ;;  %6085 = vmatprep.subr.bf16.mxu1 %v7767_v37  ;;  %v172_v12 = vld [vmem:[#allocation5 + $0x170] sm:$0xff]  ;;  %v165_v37 = vld [vmem:[#allocation5 + $0x138] sm:$0xff] }
 0x26e   :  { %v7081_v34 = vcombine.high %v164_v8, %v172_v12  ;;  %v7080_v23 = vcombine.low %v164_v8, %v172_v12  ;;  %v7082_v57 = vcombine.low %v165_v37, %v173_v3  ;;  %v7131_v8 = vcombine.high %v213_v48, %v221_v56  ;;  %v228_v12 = vld [vmem:[#allocation5 + $0x330] sm:$0xff] }
 0x270   :  { %5867 = vmatpush1.bf16.msra.mxu0 %v7764_v28  ;;  %6086 = vmatpush1.bf16.msra.mxu1 %v7766_v45  ;;  %v7083_v28 = vcombine.high %v165_v37, %v173_v3  ;;  %v180_v45 = vld [vmem:[#allocation5 + $0x1b0] sm:$0xff]  ;;  %v8324_v3 = vld [vmem:[#allocation7] sm:$0xff] }
 0x271   :  { %5868 = vmatprep.subr.bf16.mxu0 %v7781_v39  ;;  %6087 = vmatprep.subr.bf16.mxu1 %v7783_v0  ;;  %v188_v39 = vld [vmem:[#allocation5 + $0x1f0] sm:$0xff]  ;;  %v181_v0 = vld [vmem:[#allocation5 + $0x1b8] sm:$0xff] }
 0x272   :  { %v7097_v4 = vcombine.high %v180_v45, %v188_v39  ;;  %v7096_v11 = vcombine.low %v180_v45, %v188_v39  ;;  %v7098_v41 = vcombine.low %v181_v0, %v189_v32  ;;  %v236_v37 = vld [vmem:[#allocation5 + $0x370] sm:$0xff] }
 0x274   :  { %5869 = vmatpush1.bf16.msra.mxu0 %v7780_v13  ;;  %6088 = vmatpush1.bf16.msra.mxu1 %v7782_v31  ;;  %v7099_v13 = vcombine.high %v181_v0, %v189_v32  ;;  %v196_v31 = vld [vmem:[#allocation5 + $0x230] sm:$0xff]  ;;  %v7130_v32 = vcombine.low %v213_v48, %v221_v56  ;;  %v7144_v48 = vcombine.low %v228_v12, %v236_v37 }
 0x275   :  { %5870 = vmatprep.subr.bf16.mxu0 %v7797_v24  ;;  %6089 = vmatprep.subr.bf16.mxu1 %v7799_v54  ;;  %v204_v24 = vld [vmem:[#allocation5 + $0x270] sm:$0xff]  ;;  %v197_v54 = vld [vmem:[#allocation5 + $0x238] sm:$0xff] }
 0x276   :  { %v7113_v35 = vcombine.high %v196_v31, %v204_v24  ;;  %v7112_v49 = vcombine.low %v196_v31, %v204_v24  ;;  %v8767_v31 = vld [vmem:[#allocation5 + $0x3f0] sm:$0xff] }
 0x278   :  { %5871 = vmatpush1.bf16.msra.mxu0 %v7796_v21  ;;  %6090 = vmatpush1.bf16.msra.mxu1 %v7798_v14  ;;  %v7115_v21 = vcombine.high %v197_v54, %v205_v7  ;;  %v212_v14 = vld [vmem:[#allocation5 + $0x2b0] sm:$0xff] }
 0x279   :  { %6132 = vmatprep.subr.bf16.mxu0 %v7049_v9  ;;  %6351 = vmatprep.subr.bf16.mxu1 %v7051_v10  ;;  %v220_v9 = vld [vmem:[#allocation5 + $0x2f0] sm:$0xff]  ;;  %v916_v10 = vsub.s32 4, %v8621_v26 }
 0x27a   :  { %v7128_v39 = vcombine.low %v212_v14, %v220_v9 }
 0x27b   :  { %5873 = vmatmul.mubr.bf16.vlgmr.msra.gmra.mrb[32].mxu0 %v8554_v55  ;;  %6092 = vmatmul.mubr.bf16.vlgmr.msra.gmra.mrb[32].mxu1 %v8554_v55 }
 0x27c   :  { %6133 = vmatpush1.bf16.msra.mxu0 %v7048_v59  ;;  %6352 = vmatpush1.bf16.msra.mxu1 %v7050_v60  ;;  %v920_v59 = vsub.s32 5, %v8621_v26  ;;  %v7114_v60 = vcombine.low %v197_v54, %v205_v7 }
 0x27d   :  { %6134 = vmatprep.subr.bf16.mxu0 %v7065_v62  ;;  %6353 = vmatprep.subr.bf16.mxu1 %v7067_v40  ;;  %v8989_v62 = vsub.s32 7, %v8621_v26  ;;  %v7129_v40 = vcombine.high %v212_v14, %v220_v9 }
 0x27e   :  { %5882 = vmatprep.mubr.bf16.mxu0 %v8556_v2  ;;  %6101 = vmatprep.mubr.bf16.mxu1 %v8556_v2  ;;  %v8758_v45 = vrot.slane %v8324_v3, %v920_v59 }
 0x27f   :  { %v8762_v0 = vrot.slane %v8324_v3, %v8989_v62 }
 0x280   :  { %6135 = vmatpush1.bf16.msra.mxu0 %v7064_v18  ;;  %6354 = vmatpush1.bf16.msra.mxu1 %v7066_v51  ;;  %v8749_v18 = vrot.slane %v8324_v3, %v916_v10  ;;  %v229_v51 = vld [vmem:[#allocation5 + $0x338] sm:$0xff] }
 0x281   :  { %6136 = vmatprep.subr.bf16.mxu0 %v7081_v34  ;;  %6355 = vmatprep.subr.bf16.mxu1 %v7083_v28  ;;  %v237_v34 = vld [vmem:[#allocation5 + $0x378] sm:$0xff]  ;;  %v8754_v28 = vrot.slane %v8324_v3, %v924_v29 }
 0x282   :  { %v7146_v56 = vcombine.low %v229_v51, %v237_v34 }
 0x283   :  { %5883 = vmatmul.mubr.bf16.gmra.mrb[36].mxu0 %v8562_v22  ;;  %6102 = vmatmul.mubr.bf16.gmra.mrb[36].mxu1 %v8562_v22 }
 0x284   :  { %6137 = vmatpush1.bf16.msra.mxu0 %v7080_v23  ;;  %6356 = vmatpush1.bf16.msra.mxu1 %v7082_v57  ;;  %v7145_v23 = vcombine.high %v228_v12, %v236_v37  ;;  %v260_v37 = vld [vmem:[#allocation5 + $0x430] sm:$0xff] }
 0x285   :  { %6138 = vmatprep.subr.bf16.mxu0 %v7097_v4  ;;  %6357 = vmatprep.subr.bf16.mxu1 %v7099_v13  ;;  %v7147_v4 = vcombine.high %v229_v51, %v237_v34  ;;  %v8765_v13 = vld [vmem:[#allocation5 + $0x3b0] sm:$0xff] }
 0x286   :  { %5892 = vmatprep.mubr.bf16.mxu0 %v8564_v33  ;;  %6111 = vmatprep.mubr.bf16.mxu1 %v8564_v33  ;;  %v7161_v3 = vcombine.high %v8765_v13, %v8767_v31  ;;  %v268_v51 = vld [vmem:[#allocation5 + $0x470] sm:$0xff] }
 0x288   :  { %6139 = vmatpush1.bf16.msra.mxu0 %v7096_v11  ;;  %6358 = vmatpush1.bf16.msra.mxu1 %v7098_v41  ;;  %v8771_v11 = vld [vmem:[#allocation5 + $0x3b8] sm:$0xff] }
 0x289   :  { %6140 = vmatprep.subr.bf16.mxu0 %v7113_v35  ;;  %6359 = vmatprep.subr.bf16.mxu1 %v7115_v21  ;;  %v8773_v41 = vld [vmem:[#allocation5 + $0x3f8] sm:$0xff] }
 0x28a   :  { %v7163_v12 = vcombine.high %v8771_v11, %v8773_v41 }
 0x28b   :  { %5893 = vmatmul.mubr.bf16.gmra.mrb[40].mxu0 %v8570_v50  ;;  %6112 = vmatmul.mubr.bf16.gmra.mrb[40].mxu1 %v8570_v50 }
 0x28c   :  { %6141 = vmatpush1.bf16.msra.mxu0 %v7112_v49  ;;  %6360 = vmatpush1.bf16.msra.mxu1 %v7114_v60 }
 0x28d   :  { %6142 = vmatprep.subr.bf16.mxu0 %v7129_v40  ;;  %6361 = vmatprep.subr.bf16.mxu1 %v7131_v8 }
 0x28e   :  { %v5436_v57 = vpop.f32.mrb[16].mxu0  ;;  %5902 = vmatprep.mubr.bf16.mxu0 %v8572_v63  ;;  %v5655_v54 = vpop.f32.mrb[16].mxu1  ;;  %6121 = vmatprep.mubr.bf16.mxu1 %v8572_v63 }
 0x28f   :  { %v7964_v24 = vadd.f32 %v5436_v57, %v8749_v18  ;;  %v5438_v7 = vpop.f32.mrb[17].mxu0  ;;  %v7980_v35 = vadd.f32 %v5655_v54, %v8754_v28  ;;  %v5657_v14 = vpop.f32.mrb[17].mxu1 }
 0x290   :  { %v7965_v21 = vadd.f32 %v5438_v7, %v8758_v45  ;;  %v5440_v9 = vpop.f32.mrb[18].mxu0  ;;  %6143 = vmatpush1.bf16.msra.mxu0 %v7128_v39  ;;  %v7981_v49 = vadd.f32 %v5657_v14, %v8762_v0  ;;  %v5659_v40 = vpop.f32.mrb[18].mxu1  ;;  %6362 = vmatpush1.bf16.msra.mxu1 %v7130_v32  ;;  %v261_v32 = vld [vmem:[#allocation5 + $0x438] sm:$0xff] }
 0x291   :  { %v7966_v60 = vadd.f32 %v5440_v9, %v8749_v18  ;;  %v5442_v8 = vpop.f32.mrb[19].mxu0  ;;  %6144 = vmatprep.subr.bf16.mxu0 %v7145_v23  ;;  %v7982_v54 = vadd.f32 %v5659_v40, %v8754_v28  ;;  %v5661_v62 = vpop.f32.mrb[19].mxu1  ;;  %6363 = vmatprep.subr.bf16.mxu1 %v7147_v4  ;;  %v269_v23 = vld [vmem:[#allocation5 + $0x478] sm:$0xff]  ;;  %v7160_v4 = vcombine.low %v8765_v13, %v8767_v31 }
 0x292   :  { %v7870_v57 = vpack.c.bf16 %v7965_v21, %v7964_v24  ;;  %v7967_v7 = vadd.f32 %v5442_v8, %v8758_v45  ;;  %v7871_v34 = vpack.c.bf16 %v7981_v49, %v7980_v35  ;;  %v7983_v39 = vadd.f32 %v5661_v62, %v8762_v0  ;;  %v276_v49 = vld [vmem:[#allocation5 + $0x4b0] sm:$0xff]  ;;  %v277_v40 = vld [vmem:[#allocation5 + $0x4b8] sm:$0xff] }
 0x293   :  { %5903 = vmatmul.mubr.bf16.gmra.mrb[44].mxu0 %v8578_v19  ;;  %6122 = vmatmul.mubr.bf16.gmra.mrb[44].mxu1 %v8578_v19  ;;  %v7162_v35 = vcombine.low %v8771_v11, %v8773_v41  ;;  %v7177_v62 = vcombine.high %v260_v37, %v268_v51  ;;  %v7179_v9 = vcombine.high %v261_v32, %v269_v23 }
 0x294   :  { %6956 = vst [vmem:[#allocation8 + $0x10] sm:$0xff] %v7870_v57  ;;  %v7878_v24 = vpack.c.bf16 %v7967_v7, %v7966_v60  ;;  %6145 = vmatpush1.bf16.msra.mxu0 %v7144_v48  ;;  %6957 = vst [vmem:[#allocation8 + $0x18] sm:$0xff] %v7871_v34  ;;  %v7879_v21 = vpack.c.bf16 %v7983_v39, %v7982_v54  ;;  %6364 = vmatpush1.bf16.msra.mxu1 %v7146_v56  ;;  %v284_v60 = vld [vmem:[#allocation5 + $0x4f0] sm:$0xff]  ;;  %v285_v56 = vld [vmem:[#allocation5 + $0x4f8] sm:$0xff] }
 0x295   :  { %6146 = vmatprep.subr.bf16.mxu0 %v7161_v3  ;;  %6365 = vmatprep.subr.bf16.mxu1 %v7163_v12  ;;  %v7176_v57 = vcombine.low %v260_v37, %v268_v51  ;;  %v7178_v54 = vcombine.low %v261_v32, %v269_v23  ;;  %v300_v37 = vld [vmem:[#allocation5 + $0x570] sm:$0xff]  ;;  %v293_v23 = vld [vmem:[#allocation5 + $0x538] sm:$0xff] }
 0x296   :  { %6964 = vst [vmem:[#allocation8 + $0x50] sm:$0xff] %v7878_v24  ;;  %v5446_v14 = vpop.f32.mrb[20].mxu0  ;;  %6164 = vmatprep.mubr.bf16.mxu0 %v8486_v58  ;;  %6965 = vst [vmem:[#allocation8 + $0x58] sm:$0xff] %v7879_v21  ;;  %v5665_v13 = vpop.f32.mrb[20].mxu1  ;;  %6383 = vmatprep.mubr.bf16.mxu1 %v8486_v58  ;;  %v7193_v24 = vcombine.high %v276_v49, %v284_v60 }
 0x297   :  { %v7968_v48 = vadd.f32 %v5446_v14, %v8749_v18  ;;  %v5448_v31 = vpop.f32.mrb[21].mxu0  ;;  %v7984_v11 = vadd.f32 %v5665_v13, %v8754_v28  ;;  %v5667_v8 = vpop.f32.mrb[21].mxu1 }
 0x298   :  { %v7969_v41 = vadd.f32 %v5448_v31, %v8758_v45  ;;  %v5450_v3 = vpop.f32.mrb[22].mxu0  ;;  %6147 = vmatpush1.bf16.msra.mxu0 %v7160_v4  ;;  %v7985_v7 = vadd.f32 %v5667_v8, %v8762_v0  ;;  %v5669_v34 = vpop.f32.mrb[22].mxu1  ;;  %6366 = vmatpush1.bf16.msra.mxu1 %v7162_v35  ;;  %v7195_v31 = vcombine.high %v277_v40, %v285_v56  ;;  %v292_v4 = vld [vmem:[#allocation5 + $0x530] sm:$0xff]  ;;  %v301_v8 = vld [vmem:[#allocation5 + $0x578] sm:$0xff] }
 0x299   :  { %v7970_v12 = vadd.f32 %v5450_v3, %v8749_v18  ;;  %v5452_v39 = vpop.f32.mrb[23].mxu0  ;;  %6148 = vmatprep.subr.bf16.mxu0 %v7177_v62  ;;  %v7986_v58 = vadd.f32 %v5669_v34, %v8754_v28  ;;  %v5671_v13 = vpop.f32.mrb[23].mxu1  ;;  %6367 = vmatprep.subr.bf16.mxu1 %v7179_v9  ;;  %v7192_v62 = vcombine.low %v276_v49, %v284_v60 }
 0x29a   :  { %v7886_v21 = vpack.c.bf16 %v7969_v41, %v7968_v48  ;;  %v7971_v14 = vadd.f32 %v5452_v39, %v8758_v45  ;;  %v7887_v51 = vpack.c.bf16 %v7985_v7, %v7984_v11  ;;  %v7987_v32 = vadd.f32 %v5671_v13, %v8762_v0  ;;  %v308_v39 = vld [vmem:[#allocation5 + $0x5b0] sm:$0xff] }
 0x29b   :  { %v7194_v41 = vcombine.low %v277_v40, %v285_v56  ;;  %v7209_v3 = vcombine.high %v292_v4, %v300_v37  ;;  %v7211_v34 = vcombine.high %v293_v23, %v301_v8  ;;  %v316_v11 = vld [vmem:[#allocation5 + $0x5f0] sm:$0xff]  ;;  %v7208_v56 = vcombine.low %v292_v4, %v300_v37 }
 0x29c   :  { %6972 = vst [vmem:[#allocation8 + $0x90] sm:$0xff] %v7886_v21  ;;  %v7894_v35 = vpack.c.bf16 %v7971_v14, %v7970_v12  ;;  %6149 = vmatpush1.bf16.msra.mxu0 %v7176_v57  ;;  %6973 = vst [vmem:[#allocation8 + $0x98] sm:$0xff] %v7887_v51  ;;  %v7895_v48 = vpack.c.bf16 %v7987_v32, %v7986_v58  ;;  %6368 = vmatpush1.bf16.msra.mxu1 %v7178_v54  ;;  %v309_v12 = vld [vmem:[#allocation5 + $0x5b8] sm:$0xff]  ;;  %v332_v4 = vld [vmem:[#allocation5 + $0x670] sm:$0xff] }
 0x29d   :  { %6150 = vmatprep.subr.bf16.mxu0 %v7193_v24  ;;  %6369 = vmatprep.subr.bf16.mxu1 %v7195_v31  ;;  %v317_v57 = vld [vmem:[#allocation5 + $0x5f8] sm:$0xff]  ;;  %v7210_v24 = vcombine.low %v293_v23, %v301_v8  ;;  %v7225_v32 = vcombine.high %v308_v39, %v316_v11 }
 0x29e   :  { %6980 = vst [vmem:[#allocation8 + $0xd0] sm:$0xff] %v7894_v35  ;;  %v5456_v9 = vpop.f32.mrb[24].mxu0  ;;  %6981 = vst [vmem:[#allocation8 + $0xd8] sm:$0xff] %v7895_v48  ;;  %v5675_v13 = vpop.f32.mrb[24].mxu1  ;;  %v325_v8 = vld [vmem:[#allocation5 + $0x638] sm:$0xff] }
 0x29f   :  { %v7972_v7 = vadd.f32 %v5456_v9, %v8749_v18  ;;  %v5458_v21 = vpop.f32.mrb[25].mxu0  ;;  %v7988_v49 = vadd.f32 %v5675_v13, %v8754_v28  ;;  %v5677_v54 = vpop.f32.mrb[25].mxu1 }
 0x2a0   :  { %v7973_v60 = vadd.f32 %v5458_v21, %v8758_v45  ;;  %v5460_v40 = vpop.f32.mrb[26].mxu0  ;;  %6151 = vmatpush1.bf16.msra.mxu0 %v7192_v62  ;;  %v7989_v58 = vadd.f32 %v5677_v54, %v8762_v0  ;;  %v5679_v31 = vpop.f32.mrb[26].mxu1  ;;  %6370 = vmatpush1.bf16.msra.mxu1 %v7194_v41  ;;  %v7227_v21 = vcombine.high %v309_v12, %v317_v57  ;;  %v324_v62 = vld [vmem:[#allocation5 + $0x630] sm:$0xff]  ;;  %v333_v54 = vld [vmem:[#allocation5 + $0x678] sm:$0xff] }
 0x2a1   :  { %v7974_v14 = vadd.f32 %v5460_v40, %v8749_v18  ;;  %v5462_v51 = vpop.f32.mrb[27].mxu0  ;;  %6152 = vmatprep.subr.bf16.mxu0 %v7209_v3  ;;  %v7990_v48 = vadd.f32 %v5679_v31, %v8754_v28  ;;  %v5681_v13 = vpop.f32.mrb[27].mxu1  ;;  %6371 = vmatprep.subr.bf16.mxu1 %v7211_v34  ;;  %v7224_v3 = vcombine.low %v308_v39, %v316_v11 }
 0x2a2   :  { %v7902_v35 = vpack.c.bf16 %v7973_v60, %v7972_v7  ;;  %v7975_v9 = vadd.f32 %v5462_v51, %v8758_v45  ;;  %v7903_v37 = vpack.c.bf16 %v7989_v58, %v7988_v49  ;;  %v7991_v23 = vadd.f32 %v5681_v13, %v8762_v0  ;;  %v340_v51 = vld [vmem:[#allocation5 + $0x6b0] sm:$0xff] }
 0x2a3   :  { %v7226_v60 = vcombine.low %v309_v12, %v317_v57  ;;  %v7241_v40 = vcombine.high %v324_v62, %v332_v4  ;;  %v7243_v31 = vcombine.high %v325_v8, %v333_v54  ;;  %v348_v49 = vld [vmem:[#allocation5 + $0x6f0] sm:$0xff]  ;;  %v7240_v57 = vcombine.low %v324_v62, %v332_v4 }
 0x2a4   :  { %6988 = vst [vmem:[#allocation8 + $0x110] sm:$0xff] %v7902_v35  ;;  %v7910_v41 = vpack.c.bf16 %v7975_v9, %v7974_v14  ;;  %6153 = vmatpush1.bf16.msra.mxu0 %v7208_v56  ;;  %6989 = vst [vmem:[#allocation8 + $0x118] sm:$0xff] %v7903_v37  ;;  %v7911_v7 = vpack.c.bf16 %v7991_v23, %v7990_v48  ;;  %6372 = vmatpush1.bf16.msra.mxu1 %v7210_v24  ;;  %v341_v14 = vld [vmem:[#allocation5 + $0x6b8] sm:$0xff]  ;;  %v364_v62 = vld [vmem:[#allocation5 + $0x770] sm:$0xff] }
 0x2a5   :  { %6154 = vmatprep.subr.bf16.mxu0 %v7225_v32  ;;  %6373 = vmatprep.subr.bf16.mxu1 %v7227_v21  ;;  %v349_v56 = vld [vmem:[#allocation5 + $0x6f8] sm:$0xff]  ;;  %v7242_v32 = vcombine.low %v325_v8, %v333_v54  ;;  %v7257_v23 = vcombine.high %v340_v51, %v348_v49 }
 0x2a6   :  { %6996 = vst [vmem:[#allocation8 + $0x150] sm:$0xff] %v7910_v41  ;;  %v5466_v34 = vpop.f32.mrb[28].mxu0  ;;  %6997 = vst [vmem:[#allocation8 + $0x158] sm:$0xff] %v7911_v7  ;;  %v5685_v13 = vpop.f32.mrb[28].mxu1  ;;  %v357_v54 = vld [vmem:[#allocation5 + $0x738] sm:$0xff] }
 0x2a7   :  { %v7976_v58 = vadd.f32 %v5466_v34, %v8749_v18  ;;  %v5468_v35 = vpop.f32.mrb[29].mxu0  ;;  %v7992_v39 = vadd.f32 %v5685_v13, %v8754_v28  ;;  %v5687_v24 = vpop.f32.mrb[29].mxu1 }
 0x2a8   :  { %v7977_v11 = vadd.f32 %v5468_v35, %v8758_v45  ;;  %v5470_v12 = vpop.f32.mrb[30].mxu0  ;;  %6155 = vmatpush1.bf16.msra.mxu0 %v7224_v3  ;;  %v7993_v48 = vadd.f32 %v5687_v24, %v8762_v0  ;;  %v5689_v21 = vpop.f32.mrb[30].mxu1  ;;  %6374 = vmatpush1.bf16.msra.mxu1 %v7226_v60  ;;  %v7259_v35 = vcombine.high %v341_v14, %v349_v56  ;;  %v356_v3 = vld [vmem:[#allocation5 + $0x730] sm:$0xff] }
 0x2a9   :  { %v7978_v9 = vadd.f32 %v5470_v12, %v8749_v18  ;;  %v5472_v37 = vpop.f32.mrb[31].mxu0  ;;  %6156 = vmatprep.subr.bf16.mxu0 %v7241_v40  ;;  %v7994_v7 = vadd.f32 %v5689_v21, %v8754_v28  ;;  %v5691_v13 = vpop.f32.mrb[31].mxu1  ;;  %6375 = vmatprep.subr.bf16.mxu1 %v7243_v31  ;;  %v365_v18 = vld [vmem:[#allocation5 + $0x778] sm:$0xff]  ;;  %v7256_v40 = vcombine.low %v340_v51, %v348_v49  ;;  %v380_v24 = vld [vmem:[#allocation5 + $0x7f0] sm:$0xff] }
 0x2aa   :  { %v7918_v41 = vpack.c.bf16 %v7977_v11, %v7976_v58  ;;  %v7979_v34 = vadd.f32 %v5472_v37, %v8758_v45  ;;  %v7919_v4 = vpack.c.bf16 %v7993_v48, %v7992_v39  ;;  %v7995_v8 = vadd.f32 %v5691_v13, %v8762_v0  ;;  %v372_v11 = vld [vmem:[#allocation5 + $0x7b0] sm:$0xff]  ;;  %v373_v39 = vld [vmem:[#allocation5 + $0x7b8] sm:$0xff] }
 0x2ab   :  { %v7258_v28 = vcombine.low %v341_v14, %v349_v56  ;;  %v7273_v45 = vcombine.high %v356_v3, %v364_v62  ;;  %v7275_v31 = vcombine.high %v357_v54, %v365_v18  ;;  %v381_v0 = vld [vmem:[#allocation5 + $0x7f8] sm:$0xff]  ;;  %v7272_v12 = vcombine.low %v356_v3, %v364_v62  ;;  %v396_v48 = vld [vmem:[#allocation5 + $0x870] sm:$0xff] }
 0x2ac   :  { %7004 = vst [vmem:[#allocation8 + $0x190] sm:$0xff] %v7918_v41  ;;  %v7926_v60 = vpack.c.bf16 %v7979_v34, %v7978_v9  ;;  %6157 = vmatpush1.bf16.msra.mxu0 %v7240_v57  ;;  %7005 = vst [vmem:[#allocation8 + $0x198] sm:$0xff] %v7919_v4  ;;  %v7927_v58 = vpack.c.bf16 %v7995_v8, %v7994_v7  ;;  %6376 = vmatpush1.bf16.msra.mxu1 %v7242_v32  ;;  %v388_v32 = vld [vmem:[#allocation5 + $0x830] sm:$0xff]  ;;  %v389_v14 = vld [vmem:[#allocation5 + $0x838] sm:$0xff] }
 0x2ad   :  { %6158 = vmatprep.subr.bf16.mxu0 %v7257_v23  ;;  %6377 = vmatprep.subr.bf16.mxu1 %v7259_v35  ;;  %v7274_v57 = vcombine.low %v357_v54, %v365_v18  ;;  %v7289_v51 = vcombine.high %v372_v11, %v380_v24  ;;  %v7291_v49 = vcombine.high %v373_v39, %v381_v0  ;;  %v397_v56 = vld [vmem:[#allocation5 + $0x878] sm:$0xff]  ;;  %v404_v41 = vld [vmem:[#allocation5 + $0x8b0] sm:$0xff] }
 0x2ae   :  { %7012 = vst [vmem:[#allocation8 + $0x1d0] sm:$0xff] %v7926_v60  ;;  %7013 = vst [vmem:[#allocation8 + $0x1d8] sm:$0xff] %v7927_v58  ;;  %v7288_v9 = vcombine.low %v372_v11, %v380_v24  ;;  %v7290_v21 = vcombine.low %v373_v39, %v381_v0  ;;  %v7305_v37 = vcombine.high %v388_v32, %v396_v48  ;;  %v412_v7 = vld [vmem:[#allocation5 + $0x8f0] sm:$0xff]  ;;  %v405_v34 = vld [vmem:[#allocation5 + $0x8b8] sm:$0xff] }
 0x2af   :  { %v7307_v23 = vcombine.high %v389_v14, %v397_v56  ;;  %v413_v13 = vld [vmem:[#allocation5 + $0x8f8] sm:$0xff]  ;;  %v7304_v35 = vcombine.low %v388_v32, %v396_v48  ;;  %v7306_v3 = vcombine.low %v389_v14, %v397_v56  ;;  %v7321_v62 = vcombine.high %v404_v41, %v412_v7  ;;  %v420_v8 = vld [vmem:[#allocation5 + $0x930] sm:$0xff] }
 0x2b0   :  { %6159 = vmatpush1.bf16.msra.mxu0 %v7256_v40  ;;  %6378 = vmatpush1.bf16.msra.mxu1 %v7258_v28  ;;  %v7323_v4 = vcombine.high %v405_v34, %v413_v13  ;;  %v428_v54 = vld [vmem:[#allocation5 + $0x970] sm:$0xff]  ;;  %v421_v18 = vld [vmem:[#allocation5 + $0x938] sm:$0xff]  ;;  %v7320_v40 = vcombine.low %v404_v41, %v412_v7  ;;  %v7322_v58 = vcombine.low %v405_v34, %v413_v13 }
 0x2b1   :  { %6160 = vmatprep.subr.bf16.mxu0 %v7273_v45  ;;  %6379 = vmatprep.subr.bf16.mxu1 %v7275_v31  ;;  %v429_v60 = vld [vmem:[#allocation5 + $0x978] sm:$0xff]  ;;  %v7337_v28 = vcombine.high %v420_v8, %v428_v54  ;;  %v436_v31 = vld [vmem:[#allocation5 + $0x9b0] sm:$0xff]  ;;  %v7336_v0 = vcombine.low %v420_v8, %v428_v54 }
 0x2b2   :  { %v7339_v45 = vcombine.high %v421_v18, %v429_v60  ;;  %v444_v11 = vld [vmem:[#allocation5 + $0x9f0] sm:$0xff]  ;;  %v437_v24 = vld [vmem:[#allocation5 + $0x9b8] sm:$0xff] }
 0x2b3   :  { %v445_v39 = vld [vmem:[#allocation5 + $0x9f8] sm:$0xff]  ;;  %v7352_v14 = vcombine.low %v436_v31, %v444_v11 }
 0x2b4   :  { %6161 = vmatpush1.bf16.msra.mxu0 %v7272_v12  ;;  %6380 = vmatpush1.bf16.msra.mxu1 %v7274_v57  ;;  %v7353_v12 = vcombine.high %v436_v31, %v444_v11  ;;  %v7355_v57 = vcombine.high %v437_v24, %v445_v39  ;;  %v453_v32 = vld [vmem:[#allocation5 + $0xa38] sm:$0xff] }
 0x2b5   :  { %6162 = vmatprep.subr.bf16.mxu0 %v7289_v51  ;;  %6381 = vmatprep.subr.bf16.mxu1 %v7291_v49  ;;  %v452_v51 = vld [vmem:[#allocation5 + $0xa30] sm:$0xff]  ;;  %v461_v48 = vld [vmem:[#allocation5 + $0xa78] sm:$0xff] }
 0x2b6   :  { %v460_v49 = vld [vmem:[#allocation5 + $0xa70] sm:$0xff]  ;;  %v477_v41 = vld [vmem:[#allocation5 + $0xaf8] sm:$0xff]  ;;  %v7370_v34 = vcombine.low %v453_v32, %v461_v48 }
 0x2b7   :  { %v7369_v56 = vcombine.high %v452_v51, %v460_v49  ;;  %v7368_v7 = vcombine.low %v452_v51, %v460_v49  ;;  %v532_v49 = vld [vmem:[#allocation5 + $0xcb0] sm:$0xff] }
 0x2b8   :  { %6163 = vmatpush1.bf16.msra.mxu0 %v7288_v9  ;;  %6382 = vmatpush1.bf16.msra.mxu1 %v7290_v21  ;;  %v7371_v9 = vcombine.high %v453_v32, %v461_v48  ;;  %v468_v21 = vld [vmem:[#allocation5 + $0xab0] sm:$0xff]  ;;  %v533_v48 = vld [vmem:[#allocation5 + $0xcb8] sm:$0xff] }
 0x2b9   :  { %6205 = vmatprep.subr.bf16.mxu0 %v7305_v37  ;;  %6424 = vmatprep.subr.bf16.mxu1 %v7307_v23  ;;  %v476_v37 = vld [vmem:[#allocation5 + $0xaf0] sm:$0xff]  ;;  %v469_v23 = vld [vmem:[#allocation5 + $0xab8] sm:$0xff] }
 0x2ba   :  { %v7387_v13 = vcombine.high %v469_v23, %v477_v41  ;;  %v7384_v8 = vcombine.low %v468_v21, %v476_v37  ;;  %v540_v32 = vld [vmem:[#allocation5 + $0xcf0] sm:$0xff] }
 0x2bb   :  { %6165 = vmatmul.mubr.bf16.vlgmr.msra.gmra.mrb[48].mxu0 %v8490_v15  ;;  %6384 = vmatmul.mubr.bf16.vlgmr.msra.gmra.mrb[48].mxu1 %v8490_v15  ;;  %v7338_v15 = vcombine.low %v421_v18, %v429_v60  ;;  %v500_v60 = vld [vmem:[#allocation5 + $0xbb0] sm:$0xff] }
 0x2bc   :  { %6206 = vmatpush1.bf16.msra.mxu0 %v7304_v35  ;;  %6425 = vmatpush1.bf16.msra.mxu1 %v7306_v3  ;;  %v484_v35 = vld [vmem:[#allocation5 + $0xb30] sm:$0xff] }
 0x2bd   :  { %6207 = vmatprep.subr.bf16.mxu0 %v7321_v62  ;;  %6426 = vmatprep.subr.bf16.mxu1 %v7323_v4  ;;  %v492_v3 = vld [vmem:[#allocation5 + $0xb70] sm:$0xff]  ;;  %v485_v62 = vld [vmem:[#allocation5 + $0xb38] sm:$0xff] }
 0x2be   :  { %6174 = vmatprep.mubr.bf16.mxu0 %v8492_v25  ;;  %6393 = vmatprep.mubr.bf16.mxu1 %v8492_v25  ;;  %v7354_v25 = vcombine.low %v437_v24, %v445_v39  ;;  %v493_v4 = vld [vmem:[#allocation5 + $0xb78] sm:$0xff]  ;;  %v7401_v54 = vcombine.high %v484_v35, %v492_v3  ;;  %v516_v24 = vld [vmem:[#allocation5 + $0xc30] sm:$0xff] }
 0x2bf   :  { %v7403_v18 = vcombine.high %v485_v62, %v493_v4  ;;  %v7402_v31 = vcombine.low %v485_v62, %v493_v4  ;;  %v524_v39 = vld [vmem:[#allocation5 + $0xc70] sm:$0xff]  ;;  %v573_v62 = vld [vmem:[#allocation5 + $0xdf8] sm:$0xff] }
 0x2c0   :  { %6208 = vmatpush1.bf16.msra.mxu0 %v7320_v40  ;;  %6427 = vmatpush1.bf16.msra.mxu1 %v7322_v58  ;;  %v508_v40 = vld [vmem:[#allocation5 + $0xbf0] sm:$0xff]  ;;  %v501_v58 = vld [vmem:[#allocation5 + $0xbb8] sm:$0xff] }
 0x2c1   :  { %6209 = vmatprep.subr.bf16.mxu0 %v7337_v28  ;;  %6428 = vmatprep.subr.bf16.mxu1 %v7339_v45  ;;  %v509_v28 = vld [vmem:[#allocation5 + $0xbf8] sm:$0xff]  ;;  %v7400_v45 = vcombine.low %v484_v35, %v492_v3  ;;  %v572_v35 = vld [vmem:[#allocation5 + $0xdf0] sm:$0xff] }
 0x2c2   :  { %v7419_v11 = vcombine.high %v501_v58, %v509_v28  ;;  %v565_v3 = vld [vmem:[#allocation5 + $0xdb8] sm:$0xff] }
 0x2c3   :  { %6175 = vmatmul.mubr.bf16.gmra.mrb[52].mxu0 %v8498_v38  ;;  %6394 = vmatmul.mubr.bf16.gmra.mrb[52].mxu1 %v8498_v38  ;;  %v7385_v38 = vcombine.high %v468_v21, %v476_v37  ;;  %v548_v21 = vld [vmem:[#allocation5 + $0xd30] sm:$0xff] }
 0x2c4   :  { %6210 = vmatpush1.bf16.msra.mxu0 %v7336_v0  ;;  %6429 = vmatpush1.bf16.msra.mxu1 %v7338_v15  ;;  %v517_v0 = vld [vmem:[#allocation5 + $0xc38] sm:$0xff]  ;;  %v556_v37 = vld [vmem:[#allocation5 + $0xd70] sm:$0xff] }
 0x2c5   :  { %6211 = vmatprep.subr.bf16.mxu0 %v7353_v12  ;;  %6430 = vmatprep.subr.bf16.mxu1 %v7355_v57  ;;  %v525_v15 = vld [vmem:[#allocation5 + $0xc78] sm:$0xff]  ;;  %v7416_v12 = vcombine.low %v500_v60, %v508_v40  ;;  %v7433_v57 = vcombine.high %v516_v24, %v524_v39  ;;  %v7464_v4 = vcombine.low %v548_v21, %v556_v37 }
 0x2c6   :  { %6184 = vmatprep.mubr.bf16.mxu0 %v8500_v47  ;;  %6403 = vmatprep.mubr.bf16.mxu1 %v8500_v47  ;;  %v7386_v47 = vcombine.low %v469_v23, %v477_v41  ;;  %v7435_v51 = vcombine.high %v517_v0, %v525_v15  ;;  %v549_v23 = vld [vmem:[#allocation5 + $0xd38] sm:$0xff] }
 0x2c7   :  { %v557_v41 = vld [vmem:[#allocation5 + $0xd78] sm:$0xff] }
 0x2c8   :  { %6212 = vmatpush1.bf16.msra.mxu0 %v7352_v14  ;;  %6431 = vmatpush1.bf16.msra.mxu1 %v7354_v25  ;;  %v541_v14 = vld [vmem:[#allocation5 + $0xcf8] sm:$0xff]  ;;  %v7432_v25 = vcombine.low %v516_v24, %v524_v39  ;;  %v604_v24 = vld [vmem:[#allocation5 + $0xef0] sm:$0xff] }
 0x2c9   :  { %6213 = vmatprep.subr.bf16.mxu0 %v7369_v56  ;;  %6432 = vmatprep.subr.bf16.mxu1 %v7371_v9  ;;  %v7434_v56 = vcombine.low %v517_v0, %v525_v15  ;;  %v7451_v9 = vcombine.high %v533_v48, %v541_v14  ;;  %v597_v39 = vld [vmem:[#allocation5 + $0xeb8] sm:$0xff] }
 0x2ca   :  { %v605_v0 = vld [vmem:[#allocation5 + $0xef8] sm:$0xff] }
 0x2cb   :  { %6185 = vmatmul.mubr.bf16.gmra.mrb[56].mxu0 %v8506_v61  ;;  %6404 = vmatmul.mubr.bf16.gmra.mrb[56].mxu1 %v8506_v61  ;;  %v7417_v61 = vcombine.high %v500_v60, %v508_v40  ;;  %v588_v60 = vld [vmem:[#allocation5 + $0xe70] sm:$0xff]  ;;  %v581_v40 = vld [vmem:[#allocation5 + $0xe38] sm:$0xff] }
 0x2cc   :  { %6214 = vmatpush1.bf16.msra.mxu0 %v7368_v7  ;;  %6433 = vmatpush1.bf16.msra.mxu1 %v7370_v34  ;;  %v7448_v7 = vcombine.low %v532_v49, %v540_v32  ;;  %v7450_v34 = vcombine.low %v533_v48, %v541_v14  ;;  %v621_v48 = vld [vmem:[#allocation5 + $0xf78] sm:$0xff] }
 0x2cd   :  { %6215 = vmatprep.subr.bf16.mxu0 %v7385_v38  ;;  %6434 = vmatprep.subr.bf16.mxu1 %v7387_v13  ;;  %v7465_v38 = vcombine.high %v548_v21, %v556_v37  ;;  %v564_v13 = vld [vmem:[#allocation5 + $0xdb0] sm:$0xff]  ;;  %v629_v37 = vld [vmem:[#allocation5 + $0xfb8] sm:$0xff] }
 0x2ce   :  { %6194 = vmatprep.mubr.bf16.mxu0 %v8508_v6  ;;  %6413 = vmatprep.mubr.bf16.mxu1 %v8508_v6  ;;  %v7418_v6 = vcombine.low %v501_v58, %v509_v28  ;;  %v589_v58 = vld [vmem:[#allocation5 + $0xe78] sm:$0xff]  ;;  %v7480_v28 = vcombine.low %v564_v13, %v572_v35  ;;  %v636_v21 = vld [vmem:[#allocation5 + $0xff0] sm:$0xff] }
 0x2d0   :  { %6216 = vmatpush1.bf16.msra.mxu0 %v7384_v8  ;;  %6435 = vmatpush1.bf16.msra.mxu1 %v7386_v47  ;;  %v7466_v8 = vcombine.low %v549_v23, %v557_v41  ;;  %v7481_v47 = vcombine.high %v564_v13, %v572_v35  ;;  %v652_v13 = vld [vmem:[#allocation5 + $0x1070] sm:$0xff]  ;;  %v645_v35 = vld [vmem:[#allocation5 + $0x1038] sm:$0xff] }
 0x2d1   :  { %6217 = vmatprep.subr.bf16.mxu0 %v7401_v54  ;;  %6436 = vmatprep.subr.bf16.mxu1 %v7403_v18  ;;  %v7483_v54 = vcombine.high %v565_v3, %v573_v62  ;;  %v580_v18 = vld [vmem:[#allocation5 + $0xe30] sm:$0xff] }
 0x2d2   :  { %v7496_v15 = vcombine.low %v580_v18, %v588_v60 }
 0x2d3   :  { %6195 = vmatmul.mubr.bf16.gmra.mrb[60].mxu0 %v8514_v20  ;;  %6414 = vmatmul.mubr.bf16.gmra.mrb[60].mxu1 %v8514_v20  ;;  %v7449_v20 = vcombine.high %v532_v49, %v540_v32  ;;  %v620_v49 = vld [vmem:[#allocation5 + $0xf70] sm:$0xff]  ;;  %v613_v32 = vld [vmem:[#allocation5 + $0xf38] sm:$0xff] }
 0x2d4   :  { %6218 = vmatpush1.bf16.msra.mxu0 %v7400_v45  ;;  %6437 = vmatpush1.bf16.msra.mxu1 %v7402_v31  ;;  %v7482_v45 = vcombine.low %v565_v3, %v573_v62  ;;  %v7497_v31 = vcombine.high %v580_v18, %v588_v60  ;;  %v653_v3 = vld [vmem:[#allocation5 + $0x1078] sm:$0xff]  ;;  %v668_v18 = vld [vmem:[#allocation5 + $0x10f0] sm:$0xff] }
 0x2d5   :  { %6219 = vmatprep.subr.bf16.mxu0 %v7417_v61  ;;  %6438 = vmatprep.subr.bf16.mxu1 %v7419_v11  ;;  %v7499_v61 = vcombine.high %v581_v40, %v589_v58  ;;  %v596_v11 = vld [vmem:[#allocation5 + $0xeb0] sm:$0xff]  ;;  %v661_v60 = vld [vmem:[#allocation5 + $0x10b8] sm:$0xff] }
 0x2d6   :  { %6237 = vmatprep.mubr.bf16.mxu0 %v8516_v30  ;;  %6456 = vmatprep.mubr.bf16.mxu1 %v8516_v30  ;;  %v7467_v30 = vcombine.high %v549_v23, %v557_v41  ;;  %v7512_v14 = vcombine.low %v596_v11, %v604_v24  ;;  %v637_v23 = vld [vmem:[#allocation5 + $0xff8] sm:$0xff] }
 0x2d8   :  { %6220 = vmatpush1.bf16.msra.mxu0 %v7416_v12  ;;  %6439 = vmatpush1.bf16.msra.mxu1 %v7418_v6  ;;  %v7498_v12 = vcombine.low %v581_v40, %v589_v58  ;;  %v7513_v6 = vcombine.high %v596_v11, %v604_v24  ;;  %v669_v40 = vld [vmem:[#allocation5 + $0x10f8] sm:$0xff]  ;;  %v684_v11 = vld [vmem:[#allocation5 + $0x1170] sm:$0xff] }
 0x2d9   :  { %6221 = vmatprep.subr.bf16.mxu0 %v7433_v57  ;;  %6440 = vmatprep.subr.bf16.mxu1 %v7435_v51  ;;  %v7515_v57 = vcombine.high %v597_v39, %v605_v0  ;;  %v612_v51 = vld [vmem:[#allocation5 + $0xf30] sm:$0xff]  ;;  %v677_v24 = vld [vmem:[#allocation5 + $0x1138] sm:$0xff] }
 0x2da   :  { %v7528_v41 = vcombine.low %v612_v51, %v620_v49 }
 0x2dc   :  { %6222 = vmatpush1.bf16.msra.mxu0 %v7432_v25  ;;  %6441 = vmatpush1.bf16.msra.mxu1 %v7434_v56  ;;  %v7514_v25 = vcombine.low %v597_v39, %v605_v0  ;;  %v7529_v56 = vcombine.high %v612_v51, %v620_v49  ;;  %v685_v39 = vld [vmem:[#allocation5 + $0x1178] sm:$0xff]  ;;  %v700_v51 = vld [vmem:[#allocation5 + $0x11f0] sm:$0xff] }
 0x2dd   :  { %6223 = vmatprep.subr.bf16.mxu0 %v7449_v20  ;;  %6442 = vmatprep.subr.bf16.mxu1 %v7451_v9  ;;  %v7531_v20 = vcombine.high %v613_v32, %v621_v48  ;;  %v628_v9 = vld [vmem:[#allocation5 + $0xfb0] sm:$0xff]  ;;  %v693_v49 = vld [vmem:[#allocation5 + $0x11b8] sm:$0xff] }
 0x2de   :  { %v7544_v62 = vcombine.low %v628_v9, %v636_v21 }
 0x2e0   :  { %6224 = vmatpush1.bf16.msra.mxu0 %v7448_v7  ;;  %6443 = vmatpush1.bf16.msra.mxu1 %v7450_v34  ;;  %v7530_v7 = vcombine.low %v613_v32, %v621_v48  ;;  %v7545_v34 = vcombine.high %v628_v9, %v636_v21  ;;  %v701_v32 = vld [vmem:[#allocation5 + $0x11f8] sm:$0xff] }
 0x2e1   :  { %6225 = vmatprep.subr.bf16.mxu0 %v7465_v38  ;;  %6444 = vmatprep.subr.bf16.mxu1 %v7467_v30  ;;  %v7547_v38 = vcombine.high %v629_v37, %v637_v23  ;;  %v644_v30 = vld [vmem:[#allocation5 + $0x1030] sm:$0xff]  ;;  %v709_v9 = vld [vmem:[#allocation5 + $0x1238] sm:$0xff] }
 0x2e2   :  { %v7560_v58 = vcombine.low %v644_v30, %v652_v13  ;;  %v717_v21 = vld [vmem:[#allocation5 + $0x1278] sm:$0xff] }
 0x2e4   :  { %6226 = vmatpush1.bf16.msra.mxu0 %v7464_v4  ;;  %6445 = vmatpush1.bf16.msra.mxu1 %v7466_v8  ;;  %v7546_v4 = vcombine.low %v629_v37, %v637_v23  ;;  %v7561_v8 = vcombine.high %v644_v30, %v652_v13  ;;  %v733_v30 = vld [vmem:[#allocation5 + $0x12f8] sm:$0xff] }
 0x2e5   :  { %6227 = vmatprep.subr.bf16.mxu0 %v7481_v47  ;;  %6446 = vmatprep.subr.bf16.mxu1 %v7483_v54  ;;  %v7563_v47 = vcombine.high %v645_v35, %v653_v3  ;;  %v660_v54 = vld [vmem:[#allocation5 + $0x10b0] sm:$0xff] }
 0x2e6   :  { %v7576_v0 = vcombine.low %v660_v54, %v668_v18 }
 0x2e8   :  { %6228 = vmatpush1.bf16.msra.mxu0 %v7480_v28  ;;  %6447 = vmatpush1.bf16.msra.mxu1 %v7482_v45  ;;  %v7562_v28 = vcombine.low %v645_v35, %v653_v3  ;;  %v7577_v45 = vcombine.high %v660_v54, %v668_v18  ;;  %v7626_v35 = vcombine.low %v709_v9, %v717_v21 }
 0x2e9   :  { %6229 = vmatprep.subr.bf16.mxu0 %v7497_v31  ;;  %6448 = vmatprep.subr.bf16.mxu1 %v7499_v61  ;;  %v7579_v31 = vcombine.high %v661_v60, %v669_v40  ;;  %v676_v61 = vld [vmem:[#allocation5 + $0x1130] sm:$0xff] }
 0x2ea   :  { %v7592_v48 = vcombine.low %v676_v61, %v684_v11 }
 0x2ec   :  { %6230 = vmatpush1.bf16.msra.mxu0 %v7496_v15  ;;  %6449 = vmatpush1.bf16.msra.mxu1 %v7498_v12  ;;  %v7578_v15 = vcombine.low %v661_v60, %v669_v40  ;;  %v7593_v12 = vcombine.high %v676_v61, %v684_v11  ;;  %v756_v40 = vld [vmem:[#allocation5 + $0x13b0] sm:$0xff] }
 0x2ed   :  { %6231 = vmatprep.subr.bf16.mxu0 %v7513_v6  ;;  %6450 = vmatprep.subr.bf16.mxu1 %v7515_v57  ;;  %v7595_v6 = vcombine.high %v677_v24, %v685_v39  ;;  %v692_v57 = vld [vmem:[#allocation5 + $0x11b0] sm:$0xff] }
 0x2ee   :  { %v7608_v37 = vcombine.low %v692_v57, %v700_v51 }
 0x2f0   :  { %6232 = vmatpush1.bf16.msra.mxu0 %v7512_v14  ;;  %6451 = vmatpush1.bf16.msra.mxu1 %v7514_v25  ;;  %v7609_v14 = vcombine.high %v692_v57, %v700_v51  ;;  %v7611_v25 = vcombine.high %v693_v49, %v701_v32  ;;  %v788_v51 = vld [vmem:[#allocation5 + $0x14b0] sm:$0xff] }
 0x2f1   :  { %6233 = vmatprep.subr.bf16.mxu0 %v7529_v56  ;;  %6452 = vmatprep.subr.bf16.mxu1 %v7531_v20  ;;  %v708_v56 = vld [vmem:[#allocation5 + $0x1230] sm:$0xff] }
 0x2f2   :  { %v716_v20 = vld [vmem:[#allocation5 + $0x1270] sm:$0xff] }
 0x2f3   :  { %v7625_v23 = vcombine.high %v708_v56, %v716_v20  ;;  %v7624_v13 = vcombine.low %v708_v56, %v716_v20  ;;  %v804_v56 = vld [vmem:[#allocation5 + $0x1530] sm:$0xff] }
 0x2f4   :  { %6234 = vmatpush1.bf16.msra.mxu0 %v7528_v41  ;;  %6453 = vmatpush1.bf16.msra.mxu1 %v7530_v7  ;;  %v7627_v41 = vcombine.high %v709_v9, %v717_v21  ;;  %v724_v7 = vld [vmem:[#allocation5 + $0x12b0] sm:$0xff]  ;;  %v805_v9 = vld [vmem:[#allocation5 + $0x1538] sm:$0xff] }
 0x2f5   :  { %6235 = vmatprep.subr.bf16.mxu0 %v7545_v34  ;;  %6454 = vmatprep.subr.bf16.mxu1 %v7547_v38  ;;  %v732_v34 = vld [vmem:[#allocation5 + $0x12f0] sm:$0xff]  ;;  %v725_v38 = vld [vmem:[#allocation5 + $0x12b8] sm:$0xff] }
 0x2f6   :  { %v7643_v3 = vcombine.high %v725_v38, %v733_v30  ;;  %v7640_v54 = vcombine.low %v724_v7, %v732_v34  ;;  %v812_v20 = vld [vmem:[#allocation5 + $0x1570] sm:$0xff]  ;;  %v813_v21 = vld [vmem:[#allocation5 + $0x1578] sm:$0xff] }
 0x2f8   :  { %6236 = vmatpush1.bf16.msra.mxu0 %v7544_v62  ;;  %6455 = vmatpush1.bf16.msra.mxu1 %v7546_v4  ;;  %v740_v62 = vld [vmem:[#allocation5 + $0x1330] sm:$0xff] }
 0x2f9   :  { %6278 = vmatprep.subr.bf16.mxu0 %v7561_v8  ;;  %6497 = vmatprep.subr.bf16.mxu1 %v7563_v47  ;;  %v748_v4 = vld [vmem:[#allocation5 + $0x1370] sm:$0xff]  ;;  %v741_v8 = vld [vmem:[#allocation5 + $0x1338] sm:$0xff] }
 0x2fa   :  { %v749_v47 = vld [vmem:[#allocation5 + $0x1378] sm:$0xff]  ;;  %v7657_v18 = vcombine.high %v740_v62, %v748_v4 }
 0x2fb   :  { %6238 = vmatmul.mubr.bf16.vlgmr.msra.gmra.mrb[48].mxu0 %v8522_v53  ;;  %6457 = vmatmul.mubr.bf16.vlgmr.msra.gmra.mrb[48].mxu1 %v8522_v53  ;;  %v7594_v53 = vcombine.low %v677_v24, %v685_v39  ;;  %v7659_v60 = vcombine.high %v741_v8, %v749_v47  ;;  %v7658_v61 = vcombine.low %v741_v8, %v749_v47  ;;  %v772_v24 = vld [vmem:[#allocation5 + $0x1430] sm:$0xff]  ;;  %v845_v8 = vld [vmem:[#allocation5 + $0x1678] sm:$0xff] }
 0x2fc   :  { %6279 = vmatpush1.bf16.msra.mxu0 %v7560_v58  ;;  %6498 = vmatpush1.bf16.msra.mxu1 %v7562_v28  ;;  %v764_v58 = vld [vmem:[#allocation5 + $0x13f0] sm:$0xff]  ;;  %v757_v28 = vld [vmem:[#allocation5 + $0x13b8] sm:$0xff] }
 0x2fd   :  { %6280 = vmatprep.subr.bf16.mxu0 %v7577_v45  ;;  %6499 = vmatprep.subr.bf16.mxu1 %v7579_v31  ;;  %v765_v45 = vld [vmem:[#allocation5 + $0x13f8] sm:$0xff]  ;;  %v7656_v31 = vcombine.low %v740_v62, %v748_v4  ;;  %v780_v39 = vld [vmem:[#allocation5 + $0x1470] sm:$0xff] }
 0x2fe   :  { %6247 = vmatprep.mubr.bf16.mxu0 %v8524_v1  ;;  %6466 = vmatprep.mubr.bf16.mxu1 %v8524_v1  ;;  %v7610_v1 = vcombine.low %v693_v49, %v701_v32  ;;  %v7675_v11 = vcombine.high %v757_v28, %v765_v45  ;;  %v796_v49 = vld [vmem:[#allocation5 + $0x14f0] sm:$0xff]  ;;  %v789_v32 = vld [vmem:[#allocation5 + $0x14b8] sm:$0xff] }
 0x2ff   :  { %v844_v62 = vld [vmem:[#allocation5 + $0x1670] sm:$0xff]  ;;  %v837_v4 = vld [vmem:[#allocation5 + $0x1638] sm:$0xff] }
 0x300   :  { %6281 = vmatpush1.bf16.msra.mxu0 %v7576_v0  ;;  %6500 = vmatpush1.bf16.msra.mxu1 %v7578_v15  ;;  %v773_v0 = vld [vmem:[#allocation5 + $0x1438] sm:$0xff] }
 0x301   :  { %6282 = vmatprep.subr.bf16.mxu0 %v7593_v12  ;;  %6501 = vmatprep.subr.bf16.mxu1 %v7595_v6  ;;  %v781_v15 = vld [vmem:[#allocation5 + $0x1478] sm:$0xff]  ;;  %v7672_v12 = vcombine.low %v756_v40, %v764_v58  ;;  %v7689_v6 = vcombine.high %v772_v24, %v780_v39 }
 0x302   :  { %v7691_v57 = vcombine.high %v773_v0, %v781_v15 }
 0x303   :  { %6248 = vmatmul.mubr.bf16.gmra.mrb[52].mxu0 %v8530_v16  ;;  %6467 = vmatmul.mubr.bf16.gmra.mrb[52].mxu1 %v8530_v16  ;;  %v7641_v16 = vcombine.high %v724_v7, %v732_v34  ;;  %v828_v7 = vld [vmem:[#allocation5 + $0x15f0] sm:$0xff]  ;;  %v821_v34 = vld [vmem:[#allocation5 + $0x15b8] sm:$0xff] }
 0x304   :  { %6283 = vmatpush1.bf16.msra.mxu0 %v7592_v48  ;;  %6502 = vmatpush1.bf16.msra.mxu1 %v7594_v53  ;;  %v797_v48 = vld [vmem:[#allocation5 + $0x14f8] sm:$0xff]  ;;  %v7688_v53 = vcombine.low %v772_v24, %v780_v39  ;;  %v876_v24 = vld [vmem:[#allocation5 + $0x1770] sm:$0xff] }
 0x305   :  { %6284 = vmatprep.subr.bf16.mxu0 %v7609_v14  ;;  %6503 = vmatprep.subr.bf16.mxu1 %v7611_v25  ;;  %v7690_v14 = vcombine.low %v773_v0, %v781_v15  ;;  %v7707_v25 = vcombine.high %v789_v32, %v797_v48  ;;  %v869_v39 = vld [vmem:[#allocation5 + $0x1738] sm:$0xff] }
 0x306   :  { %6257 = vmatprep.mubr.bf16.mxu0 %v8532_v27  ;;  %6476 = vmatprep.mubr.bf16.mxu1 %v8532_v27  ;;  %v7642_v27 = vcombine.low %v725_v38, %v733_v30  ;;  %v829_v38 = vld [vmem:[#allocation5 + $0x15f8] sm:$0xff]  ;;  %v7720_v30 = vcombine.low %v804_v56, %v812_v20 }
 0x307   :  { %v877_v0 = vld [vmem:[#allocation5 + $0x1778] sm:$0xff] }
 0x308   :  { %6285 = vmatpush1.bf16.msra.mxu0 %v7608_v37  ;;  %6504 = vmatpush1.bf16.msra.mxu1 %v7610_v1  ;;  %v7704_v37 = vcombine.low %v788_v51, %v796_v49  ;;  %v7706_v1 = vcombine.low %v789_v32, %v797_v48  ;;  %v893_v32 = vld [vmem:[#allocation5 + $0x17f8] sm:$0xff] }
 0x309   :  { %6286 = vmatprep.subr.bf16.mxu0 %v7625_v23  ;;  %6505 = vmatprep.subr.bf16.mxu1 %v7627_v41  ;;  %v7721_v23 = vcombine.high %v804_v56, %v812_v20  ;;  %v820_v41 = vld [vmem:[#allocation5 + $0x15b0] sm:$0xff]  ;;  %v8858_v20 = vld [vmem:[#allocation7 + $0x8] sm:$0xff] }
 0x30a   :  { %v7736_v47 = vcombine.low %v820_v41, %v828_v7 }
 0x30b   :  { %6258 = vmatmul.mubr.bf16.gmra.mrb[56].mxu0 %v8538_v42  ;;  %6477 = vmatmul.mubr.bf16.gmra.mrb[56].mxu1 %v8538_v42  ;;  %v7673_v42 = vcombine.high %v756_v40, %v764_v58  ;;  %v860_v40 = vld [vmem:[#allocation5 + $0x16f0] sm:$0xff]  ;;  %v853_v58 = vld [vmem:[#allocation5 + $0x16b8] sm:$0xff] }
 0x30c   :  { %6287 = vmatpush1.bf16.msra.mxu0 %v7624_v13  ;;  %6506 = vmatpush1.bf16.msra.mxu1 %v7626_v35  ;;  %v7722_v13 = vcombine.low %v805_v9, %v813_v21  ;;  %v7737_v35 = vcombine.high %v820_v41, %v828_v7 }
 0x30d   :  { %6288 = vmatprep.subr.bf16.mxu0 %v7641_v16  ;;  %6507 = vmatprep.subr.bf16.mxu1 %v7643_v3  ;;  %v7739_v16 = vcombine.high %v821_v34, %v829_v38  ;;  %v836_v3 = vld [vmem:[#allocation5 + $0x1630] sm:$0xff] }
 0x30e   :  { %6267 = vmatprep.mubr.bf16.mxu0 %v8540_v52  ;;  %6486 = vmatprep.mubr.bf16.mxu1 %v8540_v52  ;;  %v7674_v52 = vcombine.low %v757_v28, %v765_v45  ;;  %v861_v28 = vld [vmem:[#allocation5 + $0x16f8] sm:$0xff]  ;;  %v7752_v45 = vcombine.low %v836_v3, %v844_v62 }
 0x310   :  { %6289 = vmatpush1.bf16.msra.mxu0 %v7640_v54  ;;  %6508 = vmatpush1.bf16.msra.mxu1 %v7642_v27  ;;  %v7738_v54 = vcombine.low %v821_v34, %v829_v38  ;;  %v7753_v27 = vcombine.high %v836_v3, %v844_v62 }
 0x311   :  { %6290 = vmatprep.subr.bf16.mxu0 %v7657_v18  ;;  %6509 = vmatprep.subr.bf16.mxu1 %v7659_v60  ;;  %v7755_v18 = vcombine.high %v837_v4, %v845_v8  ;;  %v852_v60 = vld [vmem:[#allocation5 + $0x16b0] sm:$0xff] }
 0x312   :  { %v7768_v15 = vcombine.low %v852_v60, %v860_v40 }
 0x313   :  { %6268 = vmatmul.mubr.bf16.gmra.mrb[60].mxu0 %v8546_v5  ;;  %6487 = vmatmul.mubr.bf16.gmra.mrb[60].mxu1 %v8546_v5  ;;  %v7705_v5 = vcombine.high %v788_v51, %v796_v49  ;;  %v892_v51 = vld [vmem:[#allocation5 + $0x17f0] sm:$0xff]  ;;  %v885_v49 = vld [vmem:[#allocation5 + $0x17b8] sm:$0xff] }
 0x314   :  { %6291 = vmatpush1.bf16.msra.mxu0 %v7656_v31  ;;  %6510 = vmatpush1.bf16.msra.mxu1 %v7658_v61  ;;  %v7754_v31 = vcombine.low %v837_v4, %v845_v8  ;;  %v7769_v61 = vcombine.high %v852_v60, %v860_v40  ;;  %v7802_v56 = vcombine.low %v885_v49, %v893_v32 }
 0x315   :  { %6292 = vmatprep.subr.bf16.mxu0 %v7673_v42  ;;  %6511 = vmatprep.subr.bf16.mxu1 %v7675_v11  ;;  %v7771_v42 = vcombine.high %v853_v58, %v861_v28  ;;  %v868_v11 = vld [vmem:[#allocation5 + $0x1730] sm:$0xff] }
 0x316   :  { %6310 = vmatprep.mubr.bf16.mxu0 %v8548_v17  ;;  %6529 = vmatprep.mubr.bf16.mxu1 %v8548_v17  ;;  %v7723_v17 = vcombine.high %v805_v9, %v813_v21  ;;  %v7784_v48 = vcombine.low %v868_v11, %v876_v24 }
 0x318   :  { %6293 = vmatpush1.bf16.msra.mxu0 %v7672_v12  ;;  %6512 = vmatpush1.bf16.msra.mxu1 %v7674_v52  ;;  %v7770_v12 = vcombine.low %v853_v58, %v861_v28  ;;  %v7785_v52 = vcombine.high %v868_v11, %v876_v24 }
 0x319   :  { %6294 = vmatprep.subr.bf16.mxu0 %v7689_v6  ;;  %6513 = vmatprep.subr.bf16.mxu1 %v7691_v57  ;;  %v7787_v6 = vcombine.high %v869_v39, %v877_v0  ;;  %v884_v57 = vld [vmem:[#allocation5 + $0x17b0] sm:$0xff] }
 0x31c   :  { %6295 = vmatpush1.bf16.msra.mxu0 %v7688_v53  ;;  %6514 = vmatpush1.bf16.msra.mxu1 %v7690_v14  ;;  %v7786_v53 = vcombine.low %v869_v39, %v877_v0  ;;  %v7801_v14 = vcombine.high %v884_v57, %v892_v51 }
 0x31d   :  { %6296 = vmatprep.subr.bf16.mxu0 %v7705_v5  ;;  %6515 = vmatprep.subr.bf16.mxu1 %v7707_v25  ;;  %v7803_v5 = vcombine.high %v885_v49, %v893_v32  ;;  %v7800_v25 = vcombine.low %v884_v57, %v892_v51 }
 0x320   :  { %6297 = vmatpush1.bf16.msra.mxu0 %v7704_v37  ;;  %6516 = vmatpush1.bf16.msra.mxu1 %v7706_v1 }
 0x321   :  { %6298 = vmatprep.subr.bf16.mxu0 %v7721_v23  ;;  %6517 = vmatprep.subr.bf16.mxu1 %v7723_v17 }
 0x324   :  { %6299 = vmatpush1.bf16.msra.mxu0 %v7720_v30  ;;  %6518 = vmatpush1.bf16.msra.mxu1 %v7722_v13 }
 0x325   :  { %6300 = vmatprep.subr.bf16.mxu0 %v7737_v35  ;;  %6519 = vmatprep.subr.bf16.mxu1 %v7739_v16 }
 0x328   :  { %6301 = vmatpush1.bf16.msra.mxu0 %v7736_v47  ;;  %6520 = vmatpush1.bf16.msra.mxu1 %v7738_v54 }
 0x329   :  { %6302 = vmatprep.subr.bf16.mxu0 %v7753_v27  ;;  %6521 = vmatprep.subr.bf16.mxu1 %v7755_v18 }
 0x32c   :  { %6303 = vmatpush1.bf16.msra.mxu0 %v7752_v45  ;;  %6522 = vmatpush1.bf16.msra.mxu1 %v7754_v31 }
 0x32d   :  { %6304 = vmatprep.subr.bf16.mxu0 %v7769_v61  ;;  %6523 = vmatprep.subr.bf16.mxu1 %v7771_v42 }
 0x330   :  { %6305 = vmatpush1.bf16.msra.mxu0 %v7768_v15  ;;  %6524 = vmatpush1.bf16.msra.mxu1 %v7770_v12 }
 0x331   :  { %6306 = vmatprep.subr.bf16.mxu0 %v7785_v52  ;;  %6525 = vmatprep.subr.bf16.mxu1 %v7787_v6 }
 0x334   :  { %6307 = vmatpush1.bf16.msra.mxu0 %v7784_v48  ;;  %6526 = vmatpush1.bf16.msra.mxu1 %v7786_v53 }
 0x335   :  { %6308 = vmatprep.subr.bf16.mxu0 %v7801_v14  ;;  %6527 = vmatprep.subr.bf16.mxu1 %v7803_v5 }
 0x338   :  { %6309 = vmatpush1.bf16.msra.mxu0 %v7800_v25  ;;  %6528 = vmatpush1.bf16.msra.mxu1 %v7802_v56 }
 0x33b   :  { %6311 = vmatmul.mubr.bf16.vlgmr.msra.gmra.mrb[48].mxu0 %v8554_v55  ;;  %6530 = vmatmul.mubr.bf16.vlgmr.msra.gmra.mrb[48].mxu1 %v8554_v55  ;;  %v8864_v55 = vrot.slane %v8858_v20, %v900_v36 }
 0x33c   :  { %6320 = vmatprep.mubr.bf16.mxu0 %v8556_v2  ;;  %6539 = vmatprep.mubr.bf16.mxu1 %v8556_v2  ;;  %v8870_v2 = vrot.slane %v8858_v20, %v908_v43 }
 0x343   :  { %6321 = vmatmul.mubr.bf16.gmra.mrb[52].mxu0 %v8562_v22  ;;  %6540 = vmatmul.mubr.bf16.gmra.mrb[52].mxu1 %v8562_v22  ;;  %v8875_v22 = vrot.slane %v8858_v20, %v904_v44 }
 0x344   :  { %6330 = vmatprep.mubr.bf16.mxu0 %v8564_v33  ;;  %6549 = vmatprep.mubr.bf16.mxu1 %v8564_v33  ;;  %v8881_v33 = vrot.slane %v8858_v20, %v912_v46 }
 0x34b   :  { %6331 = vmatmul.mubr.bf16.gmra.mrb[56].mxu0 %v8570_v50  ;;  %6550 = vmatmul.mubr.bf16.gmra.mrb[56].mxu1 %v8570_v50 }
 0x34c   :  { %6340 = vmatprep.mubr.bf16.mxu0 %v8572_v63  ;;  %6559 = vmatprep.mubr.bf16.mxu1 %v8572_v63 }
 0x34e   :  { %v5874_v50 = vpop.f32.mrb[32].mxu0  ;;  %v6093_v9 = vpop.f32.mrb[32].mxu1 }
 0x34f   :  { %v7996_v36 = vadd.f32 %v5874_v50, %v8864_v55  ;;  %v5876_v43 = vpop.f32.mrb[33].mxu0  ;;  %v8012_v21 = vadd.f32 %v6093_v9, %v8870_v2  ;;  %v6095_v44 = vpop.f32.mrb[33].mxu1 }
 0x350   :  { %v7997_v37 = vadd.f32 %v5876_v43, %v8875_v22  ;;  %v5878_v1 = vpop.f32.mrb[34].mxu0  ;;  %v8013_v23 = vadd.f32 %v6095_v44, %v8881_v33  ;;  %v6097_v41 = vpop.f32.mrb[34].mxu1 }
 0x351   :  { %v7998_v17 = vadd.f32 %v5878_v1, %v8864_v55  ;;  %v5880_v46 = vpop.f32.mrb[35].mxu0  ;;  %v8014_v63 = vadd.f32 %v6097_v41, %v8870_v2  ;;  %v6099_v38 = vpop.f32.mrb[35].mxu1 }
 0x352   :  { %v7872_v7 = vpack.c.bf16 %v7997_v37, %v7996_v36  ;;  %v7999_v34 = vadd.f32 %v5880_v46, %v8875_v22  ;;  %v7873_v30 = vpack.c.bf16 %v8013_v23, %v8012_v21  ;;  %v8015_v13 = vadd.f32 %v6099_v38, %v8881_v33 }
 0x353   :  { %6341 = vmatmul.mubr.bf16.gmra.mrb[60].mxu0 %v8578_v19  ;;  %6560 = vmatmul.mubr.bf16.gmra.mrb[60].mxu1 %v8578_v19 }
 0x354   :  { %6958 = vst [vmem:[#allocation8 + $0x20] sm:$0xff] %v7872_v7  ;;  %v7880_v35 = vpack.c.bf16 %v7999_v34, %v7998_v17  ;;  %6959 = vst [vmem:[#allocation8 + $0x28] sm:$0xff] %v7873_v30  ;;  %v7881_v16 = vpack.c.bf16 %v8015_v13, %v8014_v63 }
 0x356   :  { %6966 = vst [vmem:[#allocation8 + $0x60] sm:$0xff] %v7880_v35  ;;  %v5884_v3 = vpop.f32.mrb[36].mxu0  ;;  %6967 = vst [vmem:[#allocation8 + $0x68] sm:$0xff] %v7881_v16  ;;  %v6103_v4 = vpop.f32.mrb[36].mxu1 }
 0x357   :  { %v8000_v62 = vadd.f32 %v5884_v3, %v8864_v55  ;;  %v5886_v8 = vpop.f32.mrb[37].mxu0  ;;  %v8016_v47 = vadd.f32 %v6103_v4, %v8870_v2  ;;  %v6105_v27 = vpop.f32.mrb[37].mxu1 }
 0x358   :  { %v8001_v54 = vadd.f32 %v5886_v8, %v8875_v22  ;;  %v5888_v18 = vpop.f32.mrb[38].mxu0  ;;  %v8017_v60 = vadd.f32 %v6105_v27, %v8881_v33  ;;  %v6107_v19 = vpop.f32.mrb[38].mxu1 }
 0x359   :  { %v8002_v40 = vadd.f32 %v5888_v18, %v8864_v55  ;;  %v5890_v58 = vpop.f32.mrb[39].mxu0  ;;  %v8018_v45 = vadd.f32 %v6107_v19, %v8870_v2  ;;  %v6109_v61 = vpop.f32.mrb[39].mxu1 }
 0x35a   :  { %v7888_v28 = vpack.c.bf16 %v8001_v54, %v8000_v62  ;;  %v8003_v31 = vadd.f32 %v5890_v58, %v8875_v22  ;;  %v7889_v42 = vpack.c.bf16 %v8017_v60, %v8016_v47  ;;  %v8019_v11 = vadd.f32 %v6109_v61, %v8881_v33 }
 0x35c   :  { %6974 = vst [vmem:[#allocation8 + $0xa0] sm:$0xff] %v7888_v28  ;;  %v7896_v24 = vpack.c.bf16 %v8003_v31, %v8002_v40  ;;  %6975 = vst [vmem:[#allocation8 + $0xa8] sm:$0xff] %v7889_v42  ;;  %v7897_v39 = vpack.c.bf16 %v8019_v11, %v8018_v45 }
 0x35e   :  { %6982 = vst [vmem:[#allocation8 + $0xe0] sm:$0xff] %v7896_v24  ;;  %v5894_v0 = vpop.f32.mrb[40].mxu0  ;;  %6983 = vst [vmem:[#allocation8 + $0xe8] sm:$0xff] %v7897_v39  ;;  %v6113_v12 = vpop.f32.mrb[40].mxu1 }
 0x35f   :  { %v8004_v15 = vadd.f32 %v5894_v0, %v8864_v55  ;;  %v5896_v52 = vpop.f32.mrb[41].mxu0  ;;  %v8020_v6 = vadd.f32 %v6113_v12, %v8870_v2  ;;  %v6115_v51 = vpop.f32.mrb[41].mxu1 }
 0x360   :  { %v8005_v57 = vadd.f32 %v5896_v52, %v8875_v22  ;;  %v5898_v49 = vpop.f32.mrb[42].mxu0  ;;  %v8021_v32 = vadd.f32 %v6115_v51, %v8881_v33  ;;  %v6117_v53 = vpop.f32.mrb[42].mxu1 }
 0x361   :  { %v8006_v48 = vadd.f32 %v5898_v49, %v8864_v55  ;;  %v5900_v14 = vpop.f32.mrb[43].mxu0  ;;  %v8022_v25 = vadd.f32 %v6117_v53, %v8870_v2  ;;  %v6119_v50 = vpop.f32.mrb[43].mxu1 }
 0x362   :  { %v7904_v5 = vpack.c.bf16 %v8005_v57, %v8004_v15  ;;  %v8007_v56 = vadd.f32 %v5900_v14, %v8875_v22  ;;  %v7905_v36 = vpack.c.bf16 %v8021_v32, %v8020_v6  ;;  %v8023_v9 = vadd.f32 %v6119_v50, %v8881_v33 }
 0x364   :  { %6990 = vst [vmem:[#allocation8 + $0x120] sm:$0xff] %v7904_v5  ;;  %v7912_v43 = vpack.c.bf16 %v8007_v56, %v8006_v48  ;;  %6991 = vst [vmem:[#allocation8 + $0x128] sm:$0xff] %v7905_v36  ;;  %v7913_v21 = vpack.c.bf16 %v8023_v9, %v8022_v25 }
 0x366   :  { %6998 = vst [vmem:[#allocation8 + $0x160] sm:$0xff] %v7912_v43  ;;  %v5904_v37 = vpop.f32.mrb[44].mxu0  ;;  %6999 = vst [vmem:[#allocation8 + $0x168] sm:$0xff] %v7913_v21  ;;  %v6123_v1 = vpop.f32.mrb[44].mxu1 }
 0x367   :  { %v8008_v44 = vadd.f32 %v5904_v37, %v8864_v55  ;;  %v5906_v23 = vpop.f32.mrb[45].mxu0  ;;  %v8024_v17 = vadd.f32 %v6123_v1, %v8870_v2  ;;  %v6125_v46 = vpop.f32.mrb[45].mxu1 }
 0x368   :  { %v8009_v41 = vadd.f32 %v5906_v23, %v8875_v22  ;;  %v5908_v7 = vpop.f32.mrb[46].mxu0  ;;  %v8025_v63 = vadd.f32 %v6125_v46, %v8881_v33  ;;  %v6127_v38 = vpop.f32.mrb[46].mxu1 }
 0x369   :  { %v8010_v34 = vadd.f32 %v5908_v7, %v8864_v55  ;;  %v5910_v30 = vpop.f32.mrb[47].mxu0  ;;  %v8026_v35 = vadd.f32 %v6127_v38, %v8870_v2  ;;  %v6129_v3 = vpop.f32.mrb[47].mxu1  ;;  %v8921_v55 = vrot.slane %v8858_v20, %v916_v10  ;;  %v8926_v2 = vrot.slane %v8858_v20, %v924_v29 }
 0x36a   :  { %v7920_v13 = vpack.c.bf16 %v8009_v41, %v8008_v44  ;;  %v8011_v16 = vadd.f32 %v5910_v30, %v8875_v22  ;;  %v7921_v62 = vpack.c.bf16 %v8025_v63, %v8024_v17  ;;  %v8027_v4 = vadd.f32 %v6129_v3, %v8881_v33 }
 0x36b   :  { %v8931_v22 = vrot.slane %v8858_v20, %v920_v59  ;;  %v8990_v33 = vsub.s32 7, %v8621_v26 }
 0x36c   :  { %7006 = vst [vmem:[#allocation8 + $0x1a0] sm:$0xff] %v7920_v13  ;;  %v7928_v8 = vpack.c.bf16 %v8011_v16, %v8010_v34  ;;  %7007 = vst [vmem:[#allocation8 + $0x1a8] sm:$0xff] %v7921_v62  ;;  %v7929_v47 = vpack.c.bf16 %v8027_v4, %v8026_v35 }
 0x36d   :  { %v8936_v54 = vrot.slane %v8858_v20, %v8990_v33 }
 0x36e   :  { %7014 = vst [vmem:[#allocation8 + $0x1e0] sm:$0xff] %v7928_v8  ;;  %7015 = vst [vmem:[#allocation8 + $0x1e8] sm:$0xff] %v7929_v47 }
 0x40e   :  { %v6312_v27 = vpop.f32.mrb[48].mxu0  ;;  %v6531_v10 = vpop.f32.mrb[48].mxu1 }
 0x40f   :  { %v8028_v18 = vadd.f32 %v6312_v27, %v8921_v55  ;;  %v6314_v60 = vpop.f32.mrb[49].mxu0  ;;  %v8044_v40 = vadd.f32 %v6531_v10, %v8926_v2  ;;  %v6533_v19 = vpop.f32.mrb[49].mxu1 }
 0x410   :  { %v8029_v29 = vadd.f32 %v6314_v60, %v8931_v22  ;;  %v6316_v58 = vpop.f32.mrb[50].mxu0  ;;  %v8045_v28 = vadd.f32 %v6533_v19, %v8936_v54  ;;  %v6535_v45 = vpop.f32.mrb[50].mxu1 }
 0x411   :  { %v8030_v59 = vadd.f32 %v6316_v58, %v8921_v55  ;;  %v6318_v26 = vpop.f32.mrb[51].mxu0  ;;  %v8046_v20 = vadd.f32 %v6535_v45, %v8926_v2  ;;  %v6537_v42 = vpop.f32.mrb[51].mxu1 }
 0x412   :  { %v7874_v31 = vpack.c.bf16 %v8029_v29, %v8028_v18  ;;  %v8031_v61 = vadd.f32 %v6318_v26, %v8931_v22  ;;  %v7875_v11 = vpack.c.bf16 %v8045_v28, %v8044_v40  ;;  %v8047_v24 = vadd.f32 %v6537_v42, %v8936_v54 }
 0x414   :  { %6960 = vst [vmem:[#allocation8 + $0x30] sm:$0xff] %v7874_v31  ;;  %v7882_v39 = vpack.c.bf16 %v8031_v61, %v8030_v59  ;;  %6961 = vst [vmem:[#allocation8 + $0x38] sm:$0xff] %v7875_v11  ;;  %v7883_v0 = vpack.c.bf16 %v8047_v24, %v8046_v20 }
 0x416   :  { %6968 = vst [vmem:[#allocation8 + $0x70] sm:$0xff] %v7882_v39  ;;  %v6322_v15 = vpop.f32.mrb[52].mxu0  ;;  %6969 = vst [vmem:[#allocation8 + $0x78] sm:$0xff] %v7883_v0  ;;  %v6541_v52 = vpop.f32.mrb[52].mxu1 }
 0x417   :  { %v8032_v12 = vadd.f32 %v6322_v15, %v8921_v55  ;;  %v6324_v6 = vpop.f32.mrb[53].mxu0  ;;  %v8048_v57 = vadd.f32 %v6541_v52, %v8926_v2  ;;  %v6543_v49 = vpop.f32.mrb[53].mxu1 }
 0x418   :  { %v8033_v51 = vadd.f32 %v6324_v6, %v8931_v22  ;;  %v6326_v32 = vpop.f32.mrb[54].mxu0  ;;  %v8049_v48 = vadd.f32 %v6543_v49, %v8936_v54  ;;  %v6545_v14 = vpop.f32.mrb[54].mxu1 }
 0x419   :  { %v8034_v53 = vadd.f32 %v6326_v32, %v8921_v55  ;;  %v6328_v5 = vpop.f32.mrb[55].mxu0  ;;  %v8050_v56 = vadd.f32 %v6545_v14, %v8926_v2  ;;  %v6547_v36 = vpop.f32.mrb[55].mxu1 }
 0x41a   :  { %v7890_v25 = vpack.c.bf16 %v8033_v51, %v8032_v12  ;;  %v8035_v50 = vadd.f32 %v6328_v5, %v8931_v22  ;;  %v7891_v9 = vpack.c.bf16 %v8049_v48, %v8048_v57  ;;  %v8051_v43 = vadd.f32 %v6547_v36, %v8936_v54 }
 0x41c   :  { %6976 = vst [vmem:[#allocation8 + $0xb0] sm:$0xff] %v7890_v25  ;;  %v7898_v21 = vpack.c.bf16 %v8035_v50, %v8034_v53  ;;  %6977 = vst [vmem:[#allocation8 + $0xb8] sm:$0xff] %v7891_v9  ;;  %v7899_v37 = vpack.c.bf16 %v8051_v43, %v8050_v56 }
 0x41e   :  { %6984 = vst [vmem:[#allocation8 + $0xf0] sm:$0xff] %v7898_v21  ;;  %v6332_v44 = vpop.f32.mrb[56].mxu0  ;;  %6985 = vst [vmem:[#allocation8 + $0xf8] sm:$0xff] %v7899_v37  ;;  %v6551_v23 = vpop.f32.mrb[56].mxu1 }
 0x41f   :  { %v8036_v1 = vadd.f32 %v6332_v44, %v8921_v55  ;;  %v6334_v17 = vpop.f32.mrb[57].mxu0  ;;  %v8052_v41 = vadd.f32 %v6551_v23, %v8926_v2  ;;  %v6553_v7 = vpop.f32.mrb[57].mxu1 }
 0x420   :  { %v8037_v46 = vadd.f32 %v6334_v17, %v8931_v22  ;;  %v6336_v63 = vpop.f32.mrb[58].mxu0  ;;  %v8053_v34 = vadd.f32 %v6553_v7, %v8936_v54  ;;  %v6555_v30 = vpop.f32.mrb[58].mxu1 }
 0x421   :  { %v8038_v38 = vadd.f32 %v6336_v63, %v8921_v55  ;;  %v6338_v13 = vpop.f32.mrb[59].mxu0  ;;  %v8054_v16 = vadd.f32 %v6555_v30, %v8926_v2  ;;  %v6557_v62 = vpop.f32.mrb[59].mxu1 }
 0x422   :  { %v7906_v35 = vpack.c.bf16 %v8037_v46, %v8036_v1  ;;  %v8039_v3 = vadd.f32 %v6338_v13, %v8931_v22  ;;  %v7907_v4 = vpack.c.bf16 %v8053_v34, %v8052_v41  ;;  %v8055_v8 = vadd.f32 %v6557_v62, %v8936_v54 }
 0x424   :  { %6992 = vst [vmem:[#allocation8 + $0x130] sm:$0xff] %v7906_v35  ;;  %v7914_v47 = vpack.c.bf16 %v8039_v3, %v8038_v38  ;;  %6993 = vst [vmem:[#allocation8 + $0x138] sm:$0xff] %v7907_v4  ;;  %v7915_v33 = vpack.c.bf16 %v8055_v8, %v8054_v16 }
 0x426   :  { %7000 = vst [vmem:[#allocation8 + $0x170] sm:$0xff] %v7914_v47  ;;  %v6342_v27 = vpop.f32.mrb[60].mxu0  ;;  %7001 = vst [vmem:[#allocation8 + $0x178] sm:$0xff] %v7915_v33  ;;  %v6561_v10 = vpop.f32.mrb[60].mxu1 }
 0x427   :  { %v8040_v18 = vadd.f32 %v6342_v27, %v8921_v55  ;;  %v6344_v60 = vpop.f32.mrb[61].mxu0  ;;  %v8056_v40 = vadd.f32 %v6561_v10, %v8926_v2  ;;  %v6563_v19 = vpop.f32.mrb[61].mxu1 }
 0x428   :  { %v8041_v29 = vadd.f32 %v6344_v60, %v8931_v22  ;;  %v6346_v58 = vpop.f32.mrb[62].mxu0  ;;  %v8057_v28 = vadd.f32 %v6563_v19, %v8936_v54  ;;  %v6565_v45 = vpop.f32.mrb[62].mxu1 }
 0x429   :  { %v8042_v59 = vadd.f32 %v6346_v58, %v8921_v55  ;;  %v6348_v26 = vpop.f32.mrb[63].mxu0  ;;  %v8058_v20 = vadd.f32 %v6565_v45, %v8926_v2  ;;  %v6567_v42 = vpop.f32.mrb[63].mxu1 }
 0x42a   :  { %v7922_v31 = vpack.c.bf16 %v8041_v29, %v8040_v18  ;;  %v8043_v61 = vadd.f32 %v6348_v26, %v8931_v22  ;;  %v7923_v11 = vpack.c.bf16 %v8057_v28, %v8056_v40  ;;  %v8059_v24 = vadd.f32 %v6567_v42, %v8936_v54 }
 0x42c   :  { %7008 = vst [vmem:[#allocation8 + $0x1b0] sm:$0xff] %v7922_v31  ;;  %v7930_v39 = vpack.c.bf16 %v8043_v61, %v8042_v59  ;;  %7009 = vst [vmem:[#allocation8 + $0x1b8] sm:$0xff] %v7923_v11  ;;  %v7931_v0 = vpack.c.bf16 %v8059_v24, %v8058_v20 }
 0x42e   :  { %7016 = vst [vmem:[#allocation8 + $0x1f0] sm:$0xff] %v7930_v39  ;;  %7017 = vst [vmem:[#allocation8 + $0x1f8] sm:$0xff] %v7931_v0 }
 0x42f   :  { %8402 = shalt.err (!%p8399_p0)
}
 0x430   :  { %s8403_s29 = scalar_lea.hbm %s8988_s3, 8192 }
 0x431   :  { %p8404_p1 = scmp.ne.s32.totalorder %s8988_s3, %s8403_s29  ;;  %p8407_p2 = scmp.lt.u32.totalorder %s8403_s29, %s8988_s3 }
 0x433   :  { %p8409_p3 = pnand %p8407_p2, %p8404_p1 }
 0x435   :  { %8412 = shalt.err (!%p8409_p3)
}
 0x436   :  { %7029 = dma.vmem_to_hbm [thread:$0]  %s7024_s25, 8192, %s8988_s3, [#allocation4], %s8420_s22, %s8420_s22, %s8421_s23  }
 0x437   :  { %8417 = dma.done.wait [#allocation4], 8192  }
 0x438   :  { %8418 = vsyncadd [#allocation4], 4294959104 }
 0x439   :  { %7033 = vsyncpa [#allocation3], 1 }
 0x43a   :  { %7034 = vsyncpa [#allocation6], 1 }
 0x43b   :  { %7035 = vsyncpa [#allocation4], 1 }

</bundles_post_ra>
